<compile_context>
chip_gen: v7x
topology: tpu7x:2x2x1
jax: 0.10.0
libtpu: 0.0.40
codegen_flags: <defaults>
</compile_context>

<pallas_src>
import functools

import jax
import jax.numpy as jnp
import numpy as np
from jax.experimental import pallas as pl
from jax.experimental.pallas import tpu as pltpu


# ---------------------------------------------------------------------------
# Fused kernel: tconv -> [up | cropped skip] slab -> conv2 -> InstanceNorm -> LeakyReLU
# ---------------------------------------------------------------------------

def _expanding_block_kernel(xd_ref, skip_ref, w1_ref, b1_ref, w2_ref, b2_ref,
                            o_ref, st1_ref, cat_ref, st2_ref, *,
                            wp, npix, ho, wo, sh, sw, ca, cb,
                            eps, slope, use_in):
    """One batch image per grid step.

    xd_ref  : (1, Cin, L)        zero-dilated + zero-padded x, flat (row pitch wp)
    skip_ref: (1, Cb, HS, WS)    raw skip image (crop done here)
    w1_ref  : (Ca, 9*Cin)        tconv weights folded over taps (equivalent fwd conv)
    w2_ref  : (Cout, 9*(Ca+Cb))  conv2 weights folded over taps and concat channels
    b1_ref  : (Ca, 1), b2_ref: (Cout, 1)
    o_ref   : (1, Cout, npix)    flat output, npix = ho * wp (junk cols sliced off in XLA)
    st1_ref : (9*Cin, npix)      stacked tap slab for stage 1      (VMEM scratch)
    cat_ref : (Ca+Cb, L)         concat slab, pre-padded for conv2 (VMEM scratch)
    st2_ref : (9*(Ca+Cb), npix)  stacked tap slab for stage 2      (VMEM scratch)
    """
    cin = xd_ref.shape[1]
    ccat = ca + cb

    # Validity mask over the flat pixel axis (junk columns excluded), built in-kernel.
    col = jax.lax.broadcasted_iota(jnp.int32, (1, npix), 1) % wp
    validf = (col < wo).astype(jnp.float32)                       # (1, npix)
    inv_valid = 1.0 / float(ho * wo)

    # ---- Stage 1: ConvTranspose2d == VALID 3x3 conv of the zero-dilated input. ----
    # Fold the 9 taps into the contraction dim -> one (Ca, 9*Cin)@(9*Cin, npix) matmul.
    for ky in range(3):
        for kx in range(3):
            off = ky * wp + kx
            t = ky * 3 + kx
            st1_ref[t * cin:(t + 1) * cin, :] = xd_ref[0, :, off:off + npix]
    up = jnp.dot(w1_ref[...], st1_ref[...], preferred_element_type=jnp.float32)
    up = (up + b1_ref[...]) * validf            # (Ca, npix) f32, junk columns zeroed

    # ---- Assemble concat([up, cropped skip]) with the conv2 zero ring, in VMEM. ----
    cat_ref[...] = jnp.zeros_like(cat_ref)
    # up half: same pitch, shifted by one pad row + one pad col (= wp + 1).
    cat_ref[0:ca, wp + 1: wp + 1 + npix] = up.astype(cat_ref.dtype)
    # skip half: center crop + 1-pixel pad ring realized by the row placement.
    for r in range(ho):
        q = (1 + r) * wp + 1
        cat_ref[ca:ccat, q:q + wo] = skip_ref[0, :, sh + r, sw:sw + wo]

    # ---- Stage 2: Conv2d(k=3, p=1) over the concat, folded into one matmul. ----
    for ky in range(3):
        for kx in range(3):
            off = ky * wp + kx
            t = ky * 3 + kx
            st2_ref[t * ccat:(t + 1) * ccat, :] = cat_ref[:, off:off + npix]
    acc = jnp.dot(w2_ref[...], st2_ref[...], preferred_element_type=jnp.float32)
    acc = acc + b2_ref[...]                                       # (Cout, npix) f32

    # ---- InstanceNorm2d (biased var over valid pixels) + LeakyReLU, in f32. ----
    if use_in:
        mean = jnp.sum(acc * validf, axis=1, keepdims=True) * inv_valid
        cent = acc - mean
        var = jnp.sum(cent * cent * validf, axis=1, keepdims=True) * inv_valid
        acc = cent * jax.lax.rsqrt(var + eps)
    o_ref[0] = jnp.where(acc >= 0.0, acc, slope * acc).astype(o_ref.dtype)


# ---------------------------------------------------------------------------
# Wrapper
# ---------------------------------------------------------------------------

def expanding_block_forward(x, skip_x, params, *, use_in=True,
                            compute_dtype=jnp.float32):
    """ExpandingBlock.forward as one fused Pallas call (grid over the batch).

    x: (N, Cin, H, W); skip_x: (N, Cin//2, HS, WS) with HS >= 2H, WS >= 2W.
    params: tconv_w (Cin, Cin//2, 3, 3), tconv_b (Cin//2,),
            conv2_w (Cin//2, Cin, 3, 3), conv2_b (Cin//2,).
    """
    n, cin, h, w = x.shape
    ca = params["tconv_w"].shape[1]          # tconv out channels = Cin // 2
    cb = skip_x.shape[1]
    cout = params["conv2_w"].shape[0]
    ho, wo = 2 * h, 2 * w
    hs, ws = skip_x.shape[2], skip_x.shape[3]
    ccat = ca + cb

    # crop() offsets (PyTorch semantics; ho, wo are even).
    sh = hs // 2 - ho // 2
    sw = ws // 2 - wo // 2

    # Flat row pitch: smallest wp >= wo + 2 with npix = ho*wp a multiple of 128
    # (lane-dense matmul N-dim and unmasked output stores).
    wp = wo + 2
    while (ho * wp) % 128 != 0:
        wp += 1
    npix = ho * wp
    ell = (ho + 3) * wp                      # flat slab length (extra rows keep tap
                                             # reads in-bounds; extras are zero/junk)

    # Zero-dilated (stride 2) + padded x so a VALID 3x3 conv reproduces the tconv
    # (low=1, high>=2, matching k=3, s=2, p=1, output_padding=1), then flatten (free).
    # TODO(synk): the stride-2 zero-dilation is a lane-strided scatter with no clean
    # in-kernel Pallas equivalent; it stays as this single XLA lax.pad.
    zero = jnp.zeros((), x.dtype)
    xd = jax.lax.pad(x, zero, ((0, 0, 0), (0, 0, 0), (1, 3, 1), (1, wp - 2 * w, 1)))
    xd = xd.reshape(n, cin, ell).astype(compute_dtype)
    skip_c = skip_x.astype(compute_dtype)    # raw skip; crop + pad happen in-kernel

    # Fold taps into the contraction dim: row index = tap*C + channel.
    w_eq = jnp.transpose(jnp.flip(params["tconv_w"], axis=(2, 3)), (1, 0, 2, 3))
    w1 = jnp.transpose(w_eq.reshape(ca, cin, 9), (0, 2, 1)).reshape(ca, 9 * cin)
    w2 = jnp.transpose(params["conv2_w"].reshape(cout, ccat, 9),
                       (0, 2, 1)).reshape(cout, 9 * ccat)
    w1 = w1.astype(compute_dtype)
    w2 = w2.astype(compute_dtype)
    b1 = params["tconv_b"].reshape(ca, 1).astype(jnp.float32)
    b2 = params["conv2_b"].reshape(cout, 1).astype(jnp.float32)

    # Explicit VMEM budget (double-buffered blocks + scratch) instead of the default
    # scoped limit.  NOTE: for large decoder maps this whole-image-per-step scheme
    # should switch to row-band tiling + two-pass InstanceNorm (v7x VMEM = 64 MiB).
    isz = jnp.dtype(compute_dtype).itemsize
    scratch_bytes = (9 * cin * npix + ccat * ell + 9 * ccat * npix) * isz
    block_bytes = 2 * ((cin * ell + cb * hs * ws) * isz + cout * npix * 4)
    vmem_need = scratch_bytes + block_bytes + (1 << 20)
    vmem_limit = int(min(64 * 1024 * 1024, max(32 * 1024 * 1024, 2 * vmem_need)))

    kernel = functools.partial(
        _expanding_block_kernel, wp=wp, npix=npix, ho=ho, wo=wo, sh=sh, sw=sw,
        ca=ca, cb=cb, eps=1e-5, slope=0.2, use_in=use_in)

    cost = pl.CostEstimate(
        flops=int(2 * n * npix * (ca * 9 * cin + cout * 9 * ccat)
                  + 12 * n * cout * npix),
        transcendentals=int(n * cout),
        bytes_accessed=int(isz * (n * cin * ell + n * cb * hs * ws
                                  + ca * 9 * cin + cout * 9 * ccat)
                           + 4 * (n * cout * npix + ca + cout)))

    out_flat = pl.pallas_call(
        kernel,
        out_shape=jax.ShapeDtypeStruct((n, cout, npix), jnp.float32),
        grid_spec=pltpu.PrefetchScalarGridSpec(
            num_scalar_prefetch=0,
            grid=(n,),
            in_specs=[
                pl.BlockSpec((1, cin, ell), lambda i: (i, 0, 0)),
                pl.BlockSpec((1, cb, hs, ws), lambda i: (i, 0, 0, 0)),
                pl.BlockSpec((ca, 9 * cin), lambda i: (0, 0)),
                pl.BlockSpec((ca, 1), lambda i: (0, 0)),
                pl.BlockSpec((cout, 9 * ccat), lambda i: (0, 0)),
                pl.BlockSpec((cout, 1), lambda i: (0, 0)),
            ],
            out_specs=pl.BlockSpec((1, cout, npix), lambda i: (i, 0, 0)),
            scratch_shapes=[
                pltpu.VMEM((9 * cin, npix), compute_dtype),   # stage-1 tap slab
                pltpu.VMEM((ccat, ell), compute_dtype),       # padded concat slab
                pltpu.VMEM((9 * ccat, npix), compute_dtype),  # stage-2 tap slab
            ],
        ),
        compiler_params=pltpu.CompilerParams(
            dimension_semantics=("parallel",),
            vmem_limit_bytes=vmem_limit),
        cost_estimate=cost,
    )(xd, skip_c, w1, b1, w2, b2)

    # Drop the junk columns per row: (N, Cout, ho*wp) -> (N, Cout, ho, wo).
    return out_flat.reshape(n, cout, ho, wp)[:, :, :, :wo]


# ---------------------------------------------------------------------------
# Pure-NumPy reference (direct PyTorch-semantics implementation)
# ---------------------------------------------------------------------------

def _ref_expanding_block(x, skip, w_t, b_t, w2, b2, use_in=True):
    x = np.asarray(x, np.float64)
    skip = np.asarray(skip, np.float64)
    w_t = np.asarray(w_t, np.float64)
    b_t = np.asarray(b_t, np.float64)
    w2 = np.asarray(w2, np.float64)
    b2 = np.asarray(b2, np.float64)

    n, ci, h, w = x.shape
    co = w_t.shape[1]
    ho, wo = 2 * h, 2 * w

    # ConvTranspose2d(k=3, s=2, p=1, output_padding=1): scatter form of the definition.
    y = np.zeros((n, co, ho + 2, wo + 2), np.float64)
    for ky in range(3):
        for kx in range(3):
            contrib = np.einsum("nchw,cd->ndhw", x, w_t[:, :, ky, kx])
            y[:, :, ky:ky + 2 * h:2, kx:kx + 2 * w:2] += contrib
    y = y[:, :, 1:1 + ho, 1:1 + wo] + b_t[None, :, None, None]

    # crop() from the spec.
    sh = skip.shape[2] // 2 - round(ho / 2)
    sw = skip.shape[3] // 2 - round(wo / 2)
    skip_c = skip[:, :, sh:sh + ho, sw:sw + wo]
    cat = np.concatenate([y, skip_c], axis=1)

    # Conv2d(k=3, padding=1).
    co2 = w2.shape[0]
    xp = np.pad(cat, ((0, 0), (0, 0), (1, 1), (1, 1)))
    z = np.zeros((n, co2, ho, wo), np.float64)
    for ky in range(3):
        for kx in range(3):
            z += np.einsum("nchw,dc->ndhw", xp[:, :, ky:ky + ho, kx:kx + wo],
                           w2[:, :, ky, kx])
    z += b2[None, :, None, None]

    if use_in:
        mean = z.mean(axis=(2, 3), keepdims=True)
        var = z.var(axis=(2, 3), keepdims=True)   # biased, like InstanceNorm2d
        z = (z - mean) / np.sqrt(var + 1e-5)
    return np.where(z >= 0, z, 0.2 * z)


# ---------------------------------------------------------------------------
# Test
# ---------------------------------------------------------------------------

if __name__ == "__main__":
    key = jax.random.PRNGKey(0)
    k1, k2, k3, k4, k5, k6 = jax.random.split(key, 6)

    N, C, H, W = 2, 4, 16, 16            # input_channels=4 -> output channels 2
    HS, WS = 2 * H + 5, 2 * W + 7        # skip is larger and gets center-cropped

    x = jax.random.normal(k1, (N, C, H, W), dtype=jnp.float32)
    skip = jax.random.normal(k2, (N, C // 2, HS, WS), dtype=jnp.float32)

    params = {
        # ConvTranspose2d(C, C//2, 3, stride=2, padding=1, output_padding=1):
        #   weight (in, out, kh, kw), bias (out,)
        "tconv_w": jax.random.normal(k3, (C, C // 2, 3, 3), dtype=jnp.float32) * 0.2,
        "tconv_b": jax.random.normal(k4, (C // 2,), dtype=jnp.float32) * 0.1,
        # Conv2d(C, C//2, 3, padding=1): weight (out, in, kh, kw), bias (out,)
        "conv2_w": jax.random.normal(k5, (C // 2, C, 3, 3), dtype=jnp.float32) * 0.2,
        "conv2_b": jax.random.normal(k6, (C // 2,), dtype=jnp.float32) * 0.1,
    }

    ref = _ref_expanding_block(np.asarray(x), np.asarray(skip),
                               np.asarray(params["tconv_w"]), np.asarray(params["tconv_b"]),
                               np.asarray(params["conv2_w"]), np.asarray(params["conv2_b"]),
                               use_in=True)

    # f32 path (tight tolerance).
    fwd32 = jax.jit(functools.partial(expanding_block_forward, use_in=True,
                                      compute_dtype=jnp.float32))
    out32 = jax.block_until_ready(fwd32(x, skip, params))
    assert out32.shape == (N, C // 2, 2 * H, 2 * W), out32.shape
    np.testing.assert_allclose(np.asarray(out32), ref, atol=1e-3, rtol=1e-3)

    # bf16 activations/weights path (halves HBM traffic; IN/LeakyReLU stay f32).
    fwd16 = jax.jit(functools.partial(expanding_block_forward, use_in=True,
                                      compute_dtype=jnp.bfloat16))
    out16 = jax.block_until_ready(fwd16(x, skip, params))
    assert out16.shape == (N, C // 2, 2 * H, 2 * W), out16.shape
    np.testing.assert_allclose(np.asarray(out16), ref, atol=8e-2, rtol=5e-2)

    print("KERNEL_OK")
</pallas_src>

<mosaic_0001>
module attributes {stable_mosaic.version = 11 : i64} {
  func.func @_expanding_block_kernel(%arg0: i32, %arg1: memref<1x4x1260xf32, #tpu.memory_space<vmem>>, %arg2: memref<1x2x37x39xf32, #tpu.memory_space<vmem>>, %arg3: memref<2x36xf32, #tpu.memory_space<vmem>>, %arg4: memref<2x1xf32, #tpu.memory_space<vmem>>, %arg5: memref<2x36xf32, #tpu.memory_space<vmem>>, %arg6: memref<2x1xf32, #tpu.memory_space<vmem>>, %arg7: memref<1x2x1152xf32, #tpu.memory_space<vmem>>, %arg8: memref<36x1152xf32, #tpu.memory_space<vmem>>, %arg9: memref<4x1260xf32, #tpu.memory_space<vmem>>, %arg10: memref<36x1152xf32, #tpu.memory_space<vmem>>) attributes {dimension_semantics = [#tpu.dimension_semantics<parallel>], iteration_bounds = array<i64: 2>, scalar_prefetch = 0 : i64, scratch_operands = 3 : i64, tpu.core_type = #tpu.core_type<tc>, window_params = [{transform_indices = @transform_0, window_bounds = array<i64: 1, 4, 1260>}, {transform_indices = @transform_1, window_bounds = array<i64: 1, 2, 37, 39>}, {pipeline_mode = #tpu.pipeline_mode<synchronous>, transform_indices = @transform_2, window_bounds = array<i64: 2, 36>}, {pipeline_mode = #tpu.pipeline_mode<synchronous>, transform_indices = @transform_3, window_bounds = array<i64: 2, 1>}, {pipeline_mode = #tpu.pipeline_mode<synchronous>, transform_indices = @transform_4, window_bounds = array<i64: 2, 36>}, {pipeline_mode = #tpu.pipeline_mode<synchronous>, transform_indices = @transform_5, window_bounds = array<i64: 2, 1>}, {transform_indices = @transform_6, window_bounds = array<i64: 1, 2, 1152>}]} {
    %0 = tpu.iota {dimensions = array<i32: 1>} : vector<1x1152xi32>
    %c36_i32 = arith.constant 36 : i32
    %c0_i32 = arith.constant 0 : i32
    %1 = arith.cmpi eq, %c36_i32, %c0_i32 : i32
    %c1_i32 = arith.constant 1 : i32
    %2 = arith.select %1, %c1_i32, %c36_i32 : i32
    %3 = vector.broadcast %2 : i32 to vector<1x1152xi32>
    %4 = arith.remsi %0, %3 : vector<1x1152xi32>
    %c0_i32_0 = arith.constant 0 : i32
    %5 = vector.broadcast %c0_i32_0 : i32 to vector<1x1152xi32>
    %6 = arith.cmpi ne, %4, %5 : vector<1x1152xi32>
    %c0_i32_1 = arith.constant 0 : i32
    %7 = vector.broadcast %c0_i32_1 : i32 to vector<1x1152xi32>
    %8 = arith.cmpi slt, %4, %7 : vector<1x1152xi32>
    %c0_i32_2 = arith.constant 0 : i32
    %9 = arith.cmpi slt, %2, %c0_i32_2 : i32
    %10 = vector.broadcast %9 : i1 to vector<1x1152xi1>
    %11 = vector.broadcast %10 : vector<1x1152xi1> to vector<1x1152xi1>
    %12 = arith.xori %8, %11 : vector<1x1152xi1>
    %13 = arith.andi %12, %6 : vector<1x1152xi1>
    %14 = vector.broadcast %2 : i32 to vector<1x1152xi32>
    %15 = arith.addi %4, %14 : vector<1x1152xi32>
    %16 = arith.select %13, %15, %4 : vector<1x1152xi1>, vector<1x1152xi32>
    %c32_i32 = arith.constant 32 : i32
    %17 = vector.broadcast %c32_i32 : i32 to vector<1x1152xi32>
    %18 = arith.cmpi slt, %16, %17 : vector<1x1152xi32>
    %19 = arith.extui %18 : vector<1x1152xi1> to vector<1x1152xi32>
    %20 = arith.sitofp %19 : vector<1x1152xi32> to vector<1x1152xf32>
    %c0 = arith.constant 0 : index
    %c0_3 = arith.constant 0 : index
    %c0_4 = arith.constant 0 : index
    %21 = vector.load %arg1[%c0, %c0_3, %c0_4] : memref<1x4x1260xf32, #tpu.memory_space<vmem>>, vector<1x4x1152xf32>
    %22 = vector.shape_cast %21 : vector<1x4x1152xf32> to vector<4x1152xf32>
    %c0_5 = arith.constant 0 : index
    %c0_6 = arith.constant 0 : index
    %23 = vector.load %arg8[%c0_5, %c0_6] : memref<36x1152xf32, #tpu.memory_space<vmem>>, vector<4x1152xf32>
    tpu.vector_store %arg8[%c0_5, %c0_6], %22 {strides = array<i32>} : memref<36x1152xf32, #tpu.memory_space<vmem>>, vector<4x1152xf32>,
    %c0_7 = arith.constant 0 : index
    %c0_8 = arith.constant 0 : index
    %c1 = arith.constant 1 : index
    %24 = vector.load %arg1[%c0_7, %c0_8, %c1] : memref<1x4x1260xf32, #tpu.memory_space<vmem>>, vector<1x4x1152xf32>
    %25 = vector.shape_cast %24 : vector<1x4x1152xf32> to vector<4x1152xf32>
    %c4 = arith.constant 4 : index
    %c0_9 = arith.constant 0 : index
    %26 = vector.load %arg8[%c4, %c0_9] : memref<36x1152xf32, #tpu.memory_space<vmem>>, vector<4x1152xf32>
    tpu.vector_store %arg8[%c4, %c0_9], %25 {strides = array<i32>} : memref<36x1152xf32, #tpu.memory_space<vmem>>, vector<4x1152xf32>,
    %c0_10 = arith.constant 0 : index
    %c0_11 = arith.constant 0 : index
    %c2 = arith.constant 2 : index
    %27 = vector.load %arg1[%c0_10, %c0_11, %c2] : memref<1x4x1260xf32, #tpu.memory_space<vmem>>, vector<1x4x1152xf32>
    %28 = vector.shape_cast %27 : vector<1x4x1152xf32> to vector<4x1152xf32>
    %c8 = arith.constant 8 : index
    %c0_12 = arith.constant 0 : index
    %29 = vector.load %arg8[%c8, %c0_12] : memref<36x1152xf32, #tpu.memory_space<vmem>>, vector<4x1152xf32>
    tpu.vector_store %arg8[%c8, %c0_12], %28 {strides = array<i32>} : memref<36x1152xf32, #tpu.memory_space<vmem>>, vector<4x1152xf32>,
    %c0_13 = arith.constant 0 : index
    %c0_14 = arith.constant 0 : index
    %c36 = arith.constant 36 : index
    %30 = vector.load %arg1[%c0_13, %c0_14, %c36] : memref<1x4x1260xf32, #tpu.memory_space<vmem>>, vector<1x4x1152xf32>
    %31 = vector.shape_cast %30 : vector<1x4x1152xf32> to vector<4x1152xf32>
    %c12 = arith.constant 12 : index
    %c0_15 = arith.constant 0 : index
    %32 = vector.load %arg8[%c12, %c0_15] : memref<36x1152xf32, #tpu.memory_space<vmem>>, vector<4x1152xf32>
    tpu.vector_store %arg8[%c12, %c0_15], %31 {strides = array<i32>} : memref<36x1152xf32, #tpu.memory_space<vmem>>, vector<4x1152xf32>,
    %c0_16 = arith.constant 0 : index
    %c0_17 = arith.constant 0 : index
    %c37 = arith.constant 37 : index
    %33 = vector.load %arg1[%c0_16, %c0_17, %c37] : memref<1x4x1260xf32, #tpu.memory_space<vmem>>, vector<1x4x1152xf32>
    %34 = vector.shape_cast %33 : vector<1x4x1152xf32> to vector<4x1152xf32>
    %c16 = arith.constant 16 : index
    %c0_18 = arith.constant 0 : index
    %35 = vector.load %arg8[%c16, %c0_18] : memref<36x1152xf32, #tpu.memory_space<vmem>>, vector<4x1152xf32>
    tpu.vector_store %arg8[%c16, %c0_18], %34 {strides = array<i32>} : memref<36x1152xf32, #tpu.memory_space<vmem>>, vector<4x1152xf32>,
    %c0_19 = arith.constant 0 : index
    %c0_20 = arith.constant 0 : index
    %c38 = arith.constant 38 : index
    %36 = vector.load %arg1[%c0_19, %c0_20, %c38] : memref<1x4x1260xf32, #tpu.memory_space<vmem>>, vector<1x4x1152xf32>
    %37 = vector.shape_cast %36 : vector<1x4x1152xf32> to vector<4x1152xf32>
    %c20 = arith.constant 20 : index
    %c0_21 = arith.constant 0 : index
    %38 = vector.load %arg8[%c20, %c0_21] : memref<36x1152xf32, #tpu.memory_space<vmem>>, vector<4x1152xf32>
    tpu.vector_store %arg8[%c20, %c0_21], %37 {strides = array<i32>} : memref<36x1152xf32, #tpu.memory_space<vmem>>, vector<4x1152xf32>,
    %c0_22 = arith.constant 0 : index
    %c0_23 = arith.constant 0 : index
    %c72 = arith.constant 72 : index
    %39 = vector.load %arg1[%c0_22, %c0_23, %c72] : memref<1x4x1260xf32, #tpu.memory_space<vmem>>, vector<1x4x1152xf32>
    %40 = vector.shape_cast %39 : vector<1x4x1152xf32> to vector<4x1152xf32>
    %c24 = arith.constant 24 : index
    %c0_24 = arith.constant 0 : index
    %41 = vector.load %arg8[%c24, %c0_24] : memref<36x1152xf32, #tpu.memory_space<vmem>>, vector<4x1152xf32>
    tpu.vector_store %arg8[%c24, %c0_24], %40 {strides = array<i32>} : memref<36x1152xf32, #tpu.memory_space<vmem>>, vector<4x1152xf32>,
    %c0_25 = arith.constant 0 : index
    %c0_26 = arith.constant 0 : index
    %c73 = arith.constant 73 : index
    %42 = vector.load %arg1[%c0_25, %c0_26, %c73] : memref<1x4x1260xf32, #tpu.memory_space<vmem>>, vector<1x4x1152xf32>
    %43 = vector.shape_cast %42 : vector<1x4x1152xf32> to vector<4x1152xf32>
    %c28 = arith.constant 28 : index
    %c0_27 = arith.constant 0 : index
    %44 = vector.load %arg8[%c28, %c0_27] : memref<36x1152xf32, #tpu.memory_space<vmem>>, vector<4x1152xf32>
    tpu.vector_store %arg8[%c28, %c0_27], %43 {strides = array<i32>} : memref<36x1152xf32, #tpu.memory_space<vmem>>, vector<4x1152xf32>,
    %c0_28 = arith.constant 0 : index
    %c0_29 = arith.constant 0 : index
    %c74 = arith.constant 74 : index
    %45 = vector.load %arg1[%c0_28, %c0_29, %c74] : memref<1x4x1260xf32, #tpu.memory_space<vmem>>, vector<1x4x1152xf32>
    %46 = vector.shape_cast %45 : vector<1x4x1152xf32> to vector<4x1152xf32>
    %c32 = arith.constant 32 : index
    %c0_30 = arith.constant 0 : index
    %47 = vector.load %arg8[%c32, %c0_30] : memref<36x1152xf32, #tpu.memory_space<vmem>>, vector<4x1152xf32>
    tpu.vector_store %arg8[%c32, %c0_30], %46 {strides = array<i32>} : memref<36x1152xf32, #tpu.memory_space<vmem>>, vector<4x1152xf32>,
    %c0_31 = arith.constant 0 : index
    %c0_32 = arith.constant 0 : index
    %48 = vector.load %arg3[%c0_31, %c0_32] : memref<2x36xf32, #tpu.memory_space<vmem>>, vector<2x36xf32>
    %c0_33 = arith.constant 0 : index
    %c0_34 = arith.constant 0 : index
    %49 = vector.load %arg8[%c0_33, %c0_34] : memref<36x1152xf32, #tpu.memory_space<vmem>>, vector<36x1152xf32>
    %cst = arith.constant dense<0.000000e+00> : vector<2x1152xf32>
    %50 = tpu.matmul %48, %49, %cst {dimension_numbers = #tpu.dot_dimension_numbers<[1], [0], [0], [1], [0, 0, 1, 1], [], []>} : vector<2x36xf32>, vector<36x1152xf32>, vector<2x1152xf32> -> vector<2x1152xf32>
    %c0_35 = arith.constant 0 : index
    %c0_36 = arith.constant 0 : index
    %51 = vector.load %arg4[%c0_35, %c0_36] : memref<2x1xf32, #tpu.memory_space<vmem>>, vector<2x1xf32>
    %52 = vector.broadcast %51 : vector<2x1xf32> to vector<2x1152xf32>
    %53 = arith.addf %50, %52 : vector<2x1152xf32>
    %54 = vector.broadcast %20 : vector<1x1152xf32> to vector<2x1152xf32>
    %55 = arith.mulf %53, %54 : vector<2x1152xf32>
    %cst_37 = arith.constant 0.000000e+00 : f32
    %56 = vector.broadcast %cst_37 : f32 to vector<4x1260xf32>
    %c0_38 = arith.constant 0 : index
    %c0_39 = arith.constant 0 : index
    %57 = vector.load %arg9[%c0_38, %c0_39] : memref<4x1260xf32, #tpu.memory_space<vmem>>, vector<4x1260xf32>
    tpu.vector_store %arg9[%c0_38, %c0_39], %56 {strides = array<i32>} : memref<4x1260xf32, #tpu.memory_space<vmem>>, vector<4x1260xf32>,
    %c0_40 = arith.constant 0 : index
    %c37_41 = arith.constant 37 : index
    %58 = vector.load %arg9[%c0_40, %c37_41] : memref<4x1260xf32, #tpu.memory_space<vmem>>, vector<2x1152xf32>
    tpu.vector_store %arg9[%c0_40, %c37_41], %55 {strides = array<i32>} : memref<4x1260xf32, #tpu.memory_space<vmem>>, vector<2x1152xf32>,
    %c0_42 = arith.constant 0 : index
    %c0_43 = arith.constant 0 : index
    %c2_44 = arith.constant 2 : index
    %c3 = arith.constant 3 : index
    %59 = vector.load %arg2[%c0_42, %c0_43, %c2_44, %c3] : memref<1x2x37x39xf32, #tpu.memory_space<vmem>>, vector<1x2x1x32xf32>
    %60 = vector.shape_cast %59 : vector<1x2x1x32xf32> to vector<2x32xf32>
    %c2_45 = arith.constant 2 : index
    %c37_46 = arith.constant 37 : index
    %61 = vector.load %arg9[%c2_45, %c37_46] : memref<4x1260xf32, #tpu.memory_space<vmem>>, vector<2x32xf32>
    tpu.vector_store %arg9[%c2_45, %c37_46], %60 {strides = array<i32>} : memref<4x1260xf32, #tpu.memory_space<vmem>>, vector<2x32xf32>,
    %c0_47 = arith.constant 0 : index
    %c0_48 = arith.constant 0 : index
    %c3_49 = arith.constant 3 : index
    %c3_50 = arith.constant 3 : index
    %62 = vector.load %arg2[%c0_47, %c0_48, %c3_49, %c3_50] : memref<1x2x37x39xf32, #tpu.memory_space<vmem>>, vector<1x2x1x32xf32>
    %63 = vector.shape_cast %62 : vector<1x2x1x32xf32> to vector<2x32xf32>
    %c2_51 = arith.constant 2 : index
    %c73_52 = arith.constant 73 : index
    %64 = vector.load %arg9[%c2_51, %c73_52] : memref<4x1260xf32, #tpu.memory_space<vmem>>, vector<2x32xf32>
    tpu.vector_store %arg9[%c2_51, %c73_52], %63 {strides = array<i32>} : memref<4x1260xf32, #tpu.memory_space<vmem>>, vector<2x32xf32>,
    %c0_53 = arith.constant 0 : index
    %c0_54 = arith.constant 0 : index
    %c4_55 = arith.constant 4 : index
    %c3_56 = arith.constant 3 : index
    %65 = vector.load %arg2[%c0_53, %c0_54, %c4_55, %c3_56] : memref<1x2x37x39xf32, #tpu.memory_space<vmem>>, vector<1x2x1x32xf32>
    %66 = vector.shape_cast %65 : vector<1x2x1x32xf32> to vector<2x32xf32>
    %c2_57 = arith.constant 2 : index
    %c109 = arith.constant 109 : index
    %67 = vector.load %arg9[%c2_57, %c109] : memref<4x1260xf32, #tpu.memory_space<vmem>>, vector<2x32xf32>
    tpu.vector_store %arg9[%c2_57, %c109], %66 {strides = array<i32>} : memref<4x1260xf32, #tpu.memory_space<vmem>>, vector<2x32xf32>,
    %c0_58 = arith.constant 0 : index
    %c0_59 = arith.constant 0 : index
    %c5 = arith.constant 5 : index
    %c3_60 = arith.constant 3 : index
    %68 = vector.load %arg2[%c0_58, %c0_59, %c5, %c3_60] : memref<1x2x37x39xf32, #tpu.memory_space<vmem>>, vector<1x2x1x32xf32>
    %69 = vector.shape_cast %68 : vector<1x2x1x32xf32> to vector<2x32xf32>
    %c2_61 = arith.constant 2 : index
    %c145 = arith.constant 145 : index
    %70 = vector.load %arg9[%c2_61, %c145] : memref<4x1260xf32, #tpu.memory_space<vmem>>, vector<2x32xf32>
    tpu.vector_store %arg9[%c2_61, %c145], %69 {strides = array<i32>} : memref<4x1260xf32, #tpu.memory_space<vmem>>, vector<2x32xf32>,
    %c0_62 = arith.constant 0 : index
    %c0_63 = arith.constant 0 : index
    %c6 = arith.constant 6 : index
    %c3_64 = arith.constant 3 : index
    %71 = vector.load %arg2[%c0_62, %c0_63, %c6, %c3_64] : memref<1x2x37x39xf32, #tpu.memory_space<vmem>>, vector<1x2x1x32xf32>
    %72 = vector.shape_cast %71 : vector<1x2x1x32xf32> to vector<2x32xf32>
    %c2_65 = arith.constant 2 : index
    %c181 = arith.constant 181 : index
    %73 = vector.load %arg9[%c2_65, %c181] : memref<4x1260xf32, #tpu.memory_space<vmem>>, vector<2x32xf32>
    tpu.vector_store %arg9[%c2_65, %c181], %72 {strides = array<i32>} : memref<4x1260xf32, #tpu.memory_space<vmem>>, vector<2x32xf32>,
    %c0_66 = arith.constant 0 : index
    %c0_67 = arith.constant 0 : index
    %c7 = arith.constant 7 : index
    %c3_68 = arith.constant 3 : index
    %74 = vector.load %arg2[%c0_66, %c0_67, %c7, %c3_68] : memref<1x2x37x39xf32, #tpu.memory_space<vmem>>, vector<1x2x1x32xf32>
    %75 = vector.shape_cast %74 : vector<1x2x1x32xf32> to vector<2x32xf32>
    %c2_69 = arith.constant 2 : index
    %c217 = arith.constant 217 : index
    %76 = vector.load %arg9[%c2_69, %c217] : memref<4x1260xf32, #tpu.memory_space<vmem>>, vector<2x32xf32>
    tpu.vector_store %arg9[%c2_69, %c217], %75 {strides = array<i32>} : memref<4x1260xf32, #tpu.memory_space<vmem>>, vector<2x32xf32>,
    %c0_70 = arith.constant 0 : index
    %c0_71 = arith.constant 0 : index
    %c8_72 = arith.constant 8 : index
    %c3_73 = arith.constant 3 : index
    %77 = vector.load %arg2[%c0_70, %c0_71, %c8_72, %c3_73] : memref<1x2x37x39xf32, #tpu.memory_space<vmem>>, vector<1x2x1x32xf32>
    %78 = vector.shape_cast %77 : vector<1x2x1x32xf32> to vector<2x32xf32>
    %c2_74 = arith.constant 2 : index
    %c253 = arith.constant 253 : index
    %79 = vector.load %arg9[%c2_74, %c253] : memref<4x1260xf32, #tpu.memory_space<vmem>>, vector<2x32xf32>
    tpu.vector_store %arg9[%c2_74, %c253], %78 {strides = array<i32>} : memref<4x1260xf32, #tpu.memory_space<vmem>>, vector<2x32xf32>,
    %c0_75 = arith.constant 0 : index
    %c0_76 = arith.constant 0 : index
    %c9 = arith.constant 9 : index
    %c3_77 = arith.constant 3 : index
    %80 = vector.load %arg2[%c0_75, %c0_76, %c9, %c3_77] : memref<1x2x37x39xf32, #tpu.memory_space<vmem>>, vector<1x2x1x32xf32>
    %81 = vector.shape_cast %80 : vector<1x2x1x32xf32> to vector<2x32xf32>
    %c2_78 = arith.constant 2 : index
    %c289 = arith.constant 289 : index
    %82 = vector.load %arg9[%c2_78, %c289] : memref<4x1260xf32, #tpu.memory_space<vmem>>, vector<2x32xf32>
    tpu.vector_store %arg9[%c2_78, %c289], %81 {strides = array<i32>} : memref<4x1260xf32, #tpu.memory_space<vmem>>, vector<2x32xf32>,
    %c0_79 = arith.constant 0 : index
    %c0_80 = arith.constant 0 : index
    %c10 = arith.constant 10 : index
    %c3_81 = arith.constant 3 : index
    %83 = vector.load %arg2[%c0_79, %c0_80, %c10, %c3_81] : memref<1x2x37x39xf32, #tpu.memory_space<vmem>>, vector<1x2x1x32xf32>
    %84 = vector.shape_cast %83 : vector<1x2x1x32xf32> to vector<2x32xf32>
    %c2_82 = arith.constant 2 : index
    %c325 = arith.constant 325 : index
    %85 = vector.load %arg9[%c2_82, %c325] : memref<4x1260xf32, #tpu.memory_space<vmem>>, vector<2x32xf32>
    tpu.vector_store %arg9[%c2_82, %c325], %84 {strides = array<i32>} : memref<4x1260xf32, #tpu.memory_space<vmem>>, vector<2x32xf32>,
    %c0_83 = arith.constant 0 : index
    %c0_84 = arith.constant 0 : index
    %c11 = arith.constant 11 : index
    %c3_85 = arith.constant 3 : index
    %86 = vector.load %arg2[%c0_83, %c0_84, %c11, %c3_85] : memref<1x2x37x39xf32, #tpu.memory_space<vmem>>, vector<1x2x1x32xf32>
    %87 = vector.shape_cast %86 : vector<1x2x1x32xf32> to vector<2x32xf32>
    %c2_86 = arith.constant 2 : index
    %c361 = arith.constant 361 : index
    %88 = vector.load %arg9[%c2_86, %c361] : memref<4x1260xf32, #tpu.memory_space<vmem>>, vector<2x32xf32>
    tpu.vector_store %arg9[%c2_86, %c361], %87 {strides = array<i32>} : memref<4x1260xf32, #tpu.memory_space<vmem>>, vector<2x32xf32>,
    %c0_87 = arith.constant 0 : index
    %c0_88 = arith.constant 0 : index
    %c12_89 = arith.constant 12 : index
    %c3_90 = arith.constant 3 : index
    %89 = vector.load %arg2[%c0_87, %c0_88, %c12_89, %c3_90] : memref<1x2x37x39xf32, #tpu.memory_space<vmem>>, vector<1x2x1x32xf32>
    %90 = vector.shape_cast %89 : vector<1x2x1x32xf32> to vector<2x32xf32>
    %c2_91 = arith.constant 2 : index
    %c397 = arith.constant 397 : index
    %91 = vector.load %arg9[%c2_91, %c397] : memref<4x1260xf32, #tpu.memory_space<vmem>>, vector<2x32xf32>
    tpu.vector_store %arg9[%c2_91, %c397], %90 {strides = array<i32>} : memref<4x1260xf32, #tpu.memory_space<vmem>>, vector<2x32xf32>,
    %c0_92 = arith.constant 0 : index
    %c0_93 = arith.constant 0 : index
    %c13 = arith.constant 13 : index
    %c3_94 = arith.constant 3 : index
    %92 = vector.load %arg2[%c0_92, %c0_93, %c13, %c3_94] : memref<1x2x37x39xf32, #tpu.memory_space<vmem>>, vector<1x2x1x32xf32>
    %93 = vector.shape_cast %92 : vector<1x2x1x32xf32> to vector<2x32xf32>
    %c2_95 = arith.constant 2 : index
    %c433 = arith.constant 433 : index
    %94 = vector.load %arg9[%c2_95, %c433] : memref<4x1260xf32, #tpu.memory_space<vmem>>, vector<2x32xf32>
    tpu.vector_store %arg9[%c2_95, %c433], %93 {strides = array<i32>} : memref<4x1260xf32, #tpu.memory_space<vmem>>, vector<2x32xf32>,
    %c0_96 = arith.constant 0 : index
    %c0_97 = arith.constant 0 : index
    %c14 = arith.constant 14 : index
    %c3_98 = arith.constant 3 : index
    %95 = vector.load %arg2[%c0_96, %c0_97, %c14, %c3_98] : memref<1x2x37x39xf32, #tpu.memory_space<vmem>>, vector<1x2x1x32xf32>
    %96 = vector.shape_cast %95 : vector<1x2x1x32xf32> to vector<2x32xf32>
    %c2_99 = arith.constant 2 : index
    %c469 = arith.constant 469 : index
    %97 = vector.load %arg9[%c2_99, %c469] : memref<4x1260xf32, #tpu.memory_space<vmem>>, vector<2x32xf32>
    tpu.vector_store %arg9[%c2_99, %c469], %96 {strides = array<i32>} : memref<4x1260xf32, #tpu.memory_space<vmem>>, vector<2x32xf32>,
    %c0_100 = arith.constant 0 : index
    %c0_101 = arith.constant 0 : index
    %c15 = arith.constant 15 : index
    %c3_102 = arith.constant 3 : index
    %98 = vector.load %arg2[%c0_100, %c0_101, %c15, %c3_102] : memref<1x2x37x39xf32, #tpu.memory_space<vmem>>, vector<1x2x1x32xf32>
    %99 = vector.shape_cast %98 : vector<1x2x1x32xf32> to vector<2x32xf32>
    %c2_103 = arith.constant 2 : index
    %c505 = arith.constant 505 : index
    %100 = vector.load %arg9[%c2_103, %c505] : memref<4x1260xf32, #tpu.memory_space<vmem>>, vector<2x32xf32>
    tpu.vector_store %arg9[%c2_103, %c505], %99 {strides = array<i32>} : memref<4x1260xf32, #tpu.memory_space<vmem>>, vector<2x32xf32>,
    %c0_104 = arith.constant 0 : index
    %c0_105 = arith.constant 0 : index
    %c16_106 = arith.constant 16 : index
    %c3_107 = arith.constant 3 : index
    %101 = vector.load %arg2[%c0_104, %c0_105, %c16_106, %c3_107] : memref<1x2x37x39xf32, #tpu.memory_space<vmem>>, vector<1x2x1x32xf32>
    %102 = vector.shape_cast %101 : vector<1x2x1x32xf32> to vector<2x32xf32>
    %c2_108 = arith.constant 2 : index
    %c541 = arith.constant 541 : index
    %103 = vector.load %arg9[%c2_108, %c541] : memref<4x1260xf32, #tpu.memory_space<vmem>>, vector<2x32xf32>
    tpu.vector_store %arg9[%c2_108, %c541], %102 {strides = array<i32>} : memref<4x1260xf32, #tpu.memory_space<vmem>>, vector<2x32xf32>,
    %c0_109 = arith.constant 0 : index
    %c0_110 = arith.constant 0 : index
    %c17 = arith.constant 17 : index
    %c3_111 = arith.constant 3 : index
    %104 = vector.load %arg2[%c0_109, %c0_110, %c17, %c3_111] : memref<1x2x37x39xf32, #tpu.memory_space<vmem>>, vector<1x2x1x32xf32>
    %105 = vector.shape_cast %104 : vector<1x2x1x32xf32> to vector<2x32xf32>
    %c2_112 = arith.constant 2 : index
    %c577 = arith.constant 577 : index
    %106 = vector.load %arg9[%c2_112, %c577] : memref<4x1260xf32, #tpu.memory_space<vmem>>, vector<2x32xf32>
    tpu.vector_store %arg9[%c2_112, %c577], %105 {strides = array<i32>} : memref<4x1260xf32, #tpu.memory_space<vmem>>, vector<2x32xf32>,
    %c0_113 = arith.constant 0 : index
    %c0_114 = arith.constant 0 : index
    %c18 = arith.constant 18 : index
    %c3_115 = arith.constant 3 : index
    %107 = vector.load %arg2[%c0_113, %c0_114, %c18, %c3_115] : memref<1x2x37x39xf32, #tpu.memory_space<vmem>>, vector<1x2x1x32xf32>
    %108 = vector.shape_cast %107 : vector<1x2x1x32xf32> to vector<2x32xf32>
    %c2_116 = arith.constant 2 : index
    %c613 = arith.constant 613 : index
    %109 = vector.load %arg9[%c2_116, %c613] : memref<4x1260xf32, #tpu.memory_space<vmem>>, vector<2x32xf32>
    tpu.vector_store %arg9[%c2_116, %c613], %108 {strides = array<i32>} : memref<4x1260xf32, #tpu.memory_space<vmem>>, vector<2x32xf32>,
    %c0_117 = arith.constant 0 : index
    %c0_118 = arith.constant 0 : index
    %c19 = arith.constant 19 : index
    %c3_119 = arith.constant 3 : index
    %110 = vector.load %arg2[%c0_117, %c0_118, %c19, %c3_119] : memref<1x2x37x39xf32, #tpu.memory_space<vmem>>, vector<1x2x1x32xf32>
    %111 = vector.shape_cast %110 : vector<1x2x1x32xf32> to vector<2x32xf32>
    %c2_120 = arith.constant 2 : index
    %c649 = arith.constant 649 : index
    %112 = vector.load %arg9[%c2_120, %c649] : memref<4x1260xf32, #tpu.memory_space<vmem>>, vector<2x32xf32>
    tpu.vector_store %arg9[%c2_120, %c649], %111 {strides = array<i32>} : memref<4x1260xf32, #tpu.memory_space<vmem>>, vector<2x32xf32>,
    %c0_121 = arith.constant 0 : index
    %c0_122 = arith.constant 0 : index
    %c20_123 = arith.constant 20 : index
    %c3_124 = arith.constant 3 : index
    %113 = vector.load %arg2[%c0_121, %c0_122, %c20_123, %c3_124] : memref<1x2x37x39xf32, #tpu.memory_space<vmem>>, vector<1x2x1x32xf32>
    %114 = vector.shape_cast %113 : vector<1x2x1x32xf32> to vector<2x32xf32>
    %c2_125 = arith.constant 2 : index
    %c685 = arith.constant 685 : index
    %115 = vector.load %arg9[%c2_125, %c685] : memref<4x1260xf32, #tpu.memory_space<vmem>>, vector<2x32xf32>
    tpu.vector_store %arg9[%c2_125, %c685], %114 {strides = array<i32>} : memref<4x1260xf32, #tpu.memory_space<vmem>>, vector<2x32xf32>,
    %c0_126 = arith.constant 0 : index
    %c0_127 = arith.constant 0 : index
    %c21 = arith.constant 21 : index
    %c3_128 = arith.constant 3 : index
    %116 = vector.load %arg2[%c0_126, %c0_127, %c21, %c3_128] : memref<1x2x37x39xf32, #tpu.memory_space<vmem>>, vector<1x2x1x32xf32>
    %117 = vector.shape_cast %116 : vector<1x2x1x32xf32> to vector<2x32xf32>
    %c2_129 = arith.constant 2 : index
    %c721 = arith.constant 721 : index
    %118 = vector.load %arg9[%c2_129, %c721] : memref<4x1260xf32, #tpu.memory_space<vmem>>, vector<2x32xf32>
    tpu.vector_store %arg9[%c2_129, %c721], %117 {strides = array<i32>} : memref<4x1260xf32, #tpu.memory_space<vmem>>, vector<2x32xf32>,
    %c0_130 = arith.constant 0 : index
    %c0_131 = arith.constant 0 : index
    %c22 = arith.constant 22 : index
    %c3_132 = arith.constant 3 : index
    %119 = vector.load %arg2[%c0_130, %c0_131, %c22, %c3_132] : memref<1x2x37x39xf32, #tpu.memory_space<vmem>>, vector<1x2x1x32xf32>
    %120 = vector.shape_cast %119 : vector<1x2x1x32xf32> to vector<2x32xf32>
    %c2_133 = arith.constant 2 : index
    %c757 = arith.constant 757 : index
    %121 = vector.load %arg9[%c2_133, %c757] : memref<4x1260xf32, #tpu.memory_space<vmem>>, vector<2x32xf32>
    tpu.vector_store %arg9[%c2_133, %c757], %120 {strides = array<i32>} : memref<4x1260xf32, #tpu.memory_space<vmem>>, vector<2x32xf32>,
    %c0_134 = arith.constant 0 : index
    %c0_135 = arith.constant 0 : index
    %c23 = arith.constant 23 : index
    %c3_136 = arith.constant 3 : index
    %122 = vector.load %arg2[%c0_134, %c0_135, %c23, %c3_136] : memref<1x2x37x39xf32, #tpu.memory_space<vmem>>, vector<1x2x1x32xf32>
    %123 = vector.shape_cast %122 : vector<1x2x1x32xf32> to vector<2x32xf32>
    %c2_137 = arith.constant 2 : index
    %c793 = arith.constant 793 : index
    %124 = vector.load %arg9[%c2_137, %c793] : memref<4x1260xf32, #tpu.memory_space<vmem>>, vector<2x32xf32>
    tpu.vector_store %arg9[%c2_137, %c793], %123 {strides = array<i32>} : memref<4x1260xf32, #tpu.memory_space<vmem>>, vector<2x32xf32>,
    %c0_138 = arith.constant 0 : index
    %c0_139 = arith.constant 0 : index
    %c24_140 = arith.constant 24 : index
    %c3_141 = arith.constant 3 : index
    %125 = vector.load %arg2[%c0_138, %c0_139, %c24_140, %c3_141] : memref<1x2x37x39xf32, #tpu.memory_space<vmem>>, vector<1x2x1x32xf32>
    %126 = vector.shape_cast %125 : vector<1x2x1x32xf32> to vector<2x32xf32>
    %c2_142 = arith.constant 2 : index
    %c829 = arith.constant 829 : index
    %127 = vector.load %arg9[%c2_142, %c829] : memref<4x1260xf32, #tpu.memory_space<vmem>>, vector<2x32xf32>
    tpu.vector_store %arg9[%c2_142, %c829], %126 {strides = array<i32>} : memref<4x1260xf32, #tpu.memory_space<vmem>>, vector<2x32xf32>,
    %c0_143 = arith.constant 0 : index
    %c0_144 = arith.constant 0 : index
    %c25 = arith.constant 25 : index
    %c3_145 = arith.constant 3 : index
    %128 = vector.load %arg2[%c0_143, %c0_144, %c25, %c3_145] : memref<1x2x37x39xf32, #tpu.memory_space<vmem>>, vector<1x2x1x32xf32>
    %129 = vector.shape_cast %128 : vector<1x2x1x32xf32> to vector<2x32xf32>
    %c2_146 = arith.constant 2 : index
    %c865 = arith.constant 865 : index
    %130 = vector.load %arg9[%c2_146, %c865] : memref<4x1260xf32, #tpu.memory_space<vmem>>, vector<2x32xf32>
    tpu.vector_store %arg9[%c2_146, %c865], %129 {strides = array<i32>} : memref<4x1260xf32, #tpu.memory_space<vmem>>, vector<2x32xf32>,
    %c0_147 = arith.constant 0 : index
    %c0_148 = arith.constant 0 : index
    %c26 = arith.constant 26 : index
    %c3_149 = arith.constant 3 : index
    %131 = vector.load %arg2[%c0_147, %c0_148, %c26, %c3_149] : memref<1x2x37x39xf32, #tpu.memory_space<vmem>>, vector<1x2x1x32xf32>
    %132 = vector.shape_cast %131 : vector<1x2x1x32xf32> to vector<2x32xf32>
    %c2_150 = arith.constant 2 : index
    %c901 = arith.constant 901 : index
    %133 = vector.load %arg9[%c2_150, %c901] : memref<4x1260xf32, #tpu.memory_space<vmem>>, vector<2x32xf32>
    tpu.vector_store %arg9[%c2_150, %c901], %132 {strides = array<i32>} : memref<4x1260xf32, #tpu.memory_space<vmem>>, vector<2x32xf32>,
    %c0_151 = arith.constant 0 : index
    %c0_152 = arith.constant 0 : index
    %c27 = arith.constant 27 : index
    %c3_153 = arith.constant 3 : index
    %134 = vector.load %arg2[%c0_151, %c0_152, %c27, %c3_153] : memref<1x2x37x39xf32, #tpu.memory_space<vmem>>, vector<1x2x1x32xf32>
    %135 = vector.shape_cast %134 : vector<1x2x1x32xf32> to vector<2x32xf32>
    %c2_154 = arith.constant 2 : index
    %c937 = arith.constant 937 : index
    %136 = vector.load %arg9[%c2_154, %c937] : memref<4x1260xf32, #tpu.memory_space<vmem>>, vector<2x32xf32>
    tpu.vector_store %arg9[%c2_154, %c937], %135 {strides = array<i32>} : memref<4x1260xf32, #tpu.memory_space<vmem>>, vector<2x32xf32>,
    %c0_155 = arith.constant 0 : index
    %c0_156 = arith.constant 0 : index
    %c28_157 = arith.constant 28 : index
    %c3_158 = arith.constant 3 : index
    %137 = vector.load %arg2[%c0_155, %c0_156, %c28_157, %c3_158] : memref<1x2x37x39xf32, #tpu.memory_space<vmem>>, vector<1x2x1x32xf32>
    %138 = vector.shape_cast %137 : vector<1x2x1x32xf32> to vector<2x32xf32>
    %c2_159 = arith.constant 2 : index
    %c973 = arith.constant 973 : index
    %139 = vector.load %arg9[%c2_159, %c973] : memref<4x1260xf32, #tpu.memory_space<vmem>>, vector<2x32xf32>
    tpu.vector_store %arg9[%c2_159, %c973], %138 {strides = array<i32>} : memref<4x1260xf32, #tpu.memory_space<vmem>>, vector<2x32xf32>,
    %c0_160 = arith.constant 0 : index
    %c0_161 = arith.constant 0 : index
    %c29 = arith.constant 29 : index
    %c3_162 = arith.constant 3 : index
    %140 = vector.load %arg2[%c0_160, %c0_161, %c29, %c3_162] : memref<1x2x37x39xf32, #tpu.memory_space<vmem>>, vector<1x2x1x32xf32>
    %141 = vector.shape_cast %140 : vector<1x2x1x32xf32> to vector<2x32xf32>
    %c2_163 = arith.constant 2 : index
    %c1009 = arith.constant 1009 : index
    %142 = vector.load %arg9[%c2_163, %c1009] : memref<4x1260xf32, #tpu.memory_space<vmem>>, vector<2x32xf32>
    tpu.vector_store %arg9[%c2_163, %c1009], %141 {strides = array<i32>} : memref<4x1260xf32, #tpu.memory_space<vmem>>, vector<2x32xf32>,
    %c0_164 = arith.constant 0 : index
    %c0_165 = arith.constant 0 : index
    %c30 = arith.constant 30 : index
    %c3_166 = arith.constant 3 : index
    %143 = vector.load %arg2[%c0_164, %c0_165, %c30, %c3_166] : memref<1x2x37x39xf32, #tpu.memory_space<vmem>>, vector<1x2x1x32xf32>
    %144 = vector.shape_cast %143 : vector<1x2x1x32xf32> to vector<2x32xf32>
    %c2_167 = arith.constant 2 : index
    %c1045 = arith.constant 1045 : index
    %145 = vector.load %arg9[%c2_167, %c1045] : memref<4x1260xf32, #tpu.memory_space<vmem>>, vector<2x32xf32>
    tpu.vector_store %arg9[%c2_167, %c1045], %144 {strides = array<i32>} : memref<4x1260xf32, #tpu.memory_space<vmem>>, vector<2x32xf32>,
    %c0_168 = arith.constant 0 : index
    %c0_169 = arith.constant 0 : index
    %c31 = arith.constant 31 : index
    %c3_170 = arith.constant 3 : index
    %146 = vector.load %arg2[%c0_168, %c0_169, %c31, %c3_170] : memref<1x2x37x39xf32, #tpu.memory_space<vmem>>, vector<1x2x1x32xf32>
    %147 = vector.shape_cast %146 : vector<1x2x1x32xf32> to vector<2x32xf32>
    %c2_171 = arith.constant 2 : index
    %c1081 = arith.constant 1081 : index
    %148 = vector.load %arg9[%c2_171, %c1081] : memref<4x1260xf32, #tpu.memory_space<vmem>>, vector<2x32xf32>
    tpu.vector_store %arg9[%c2_171, %c1081], %147 {strides = array<i32>} : memref<4x1260xf32, #tpu.memory_space<vmem>>, vector<2x32xf32>,
    %c0_172 = arith.constant 0 : index
    %c0_173 = arith.constant 0 : index
    %c32_174 = arith.constant 32 : index
    %c3_175 = arith.constant 3 : index
    %149 = vector.load %arg2[%c0_172, %c0_173, %c32_174, %c3_175] : memref<1x2x37x39xf32, #tpu.memory_space<vmem>>, vector<1x2x1x32xf32>
    %150 = vector.shape_cast %149 : vector<1x2x1x32xf32> to vector<2x32xf32>
    %c2_176 = arith.constant 2 : index
    %c1117 = arith.constant 1117 : index
    %151 = vector.load %arg9[%c2_176, %c1117] : memref<4x1260xf32, #tpu.memory_space<vmem>>, vector<2x32xf32>
    tpu.vector_store %arg9[%c2_176, %c1117], %150 {strides = array<i32>} : memref<4x1260xf32, #tpu.memory_space<vmem>>, vector<2x32xf32>,
    %c0_177 = arith.constant 0 : index
    %c0_178 = arith.constant 0 : index
    %c33 = arith.constant 33 : index
    %c3_179 = arith.constant 3 : index
    %152 = vector.load %arg2[%c0_177, %c0_178, %c33, %c3_179] : memref<1x2x37x39xf32, #tpu.memory_space<vmem>>, vector<1x2x1x32xf32>
    %153 = vector.shape_cast %152 : vector<1x2x1x32xf32> to vector<2x32xf32>
    %c2_180 = arith.constant 2 : index
    %c1153 = arith.constant 1153 : index
    %154 = vector.load %arg9[%c2_180, %c1153] : memref<4x1260xf32, #tpu.memory_space<vmem>>, vector<2x32xf32>
    tpu.vector_store %arg9[%c2_180, %c1153], %153 {strides = array<i32>} : memref<4x1260xf32, #tpu.memory_space<vmem>>, vector<2x32xf32>,
    %c0_181 = arith.constant 0 : index
    %c0_182 = arith.constant 0 : index
    %155 = vector.load %arg9[%c0_181, %c0_182] : memref<4x1260xf32, #tpu.memory_space<vmem>>, vector<4x1152xf32>
    %c0_183 = arith.constant 0 : index
    %c0_184 = arith.constant 0 : index
    %156 = vector.load %arg10[%c0_183, %c0_184] : memref<36x1152xf32, #tpu.memory_space<vmem>>, vector<4x1152xf32>
    tpu.vector_store %arg10[%c0_183, %c0_184], %155 {strides = array<i32>} : memref<36x1152xf32, #tpu.memory_space<vmem>>, vector<4x1152xf32>,
    %c0_185 = arith.constant 0 : index
    %c1_186 = arith.constant 1 : index
    %157 = vector.load %arg9[%c0_185, %c1_186] : memref<4x1260xf32, #tpu.memory_space<vmem>>, vector<4x1152xf32>
    %c4_187 = arith.constant 4 : index
    %c0_188 = arith.constant 0 : index
    %158 = vector.load %arg10[%c4_187, %c0_188] : memref<36x1152xf32, #tpu.memory_space<vmem>>, vector<4x1152xf32>
    tpu.vector_store %arg10[%c4_187, %c0_188], %157 {strides = array<i32>} : memref<36x1152xf32, #tpu.memory_space<vmem>>, vector<4x1152xf32>,
    %c0_189 = arith.constant 0 : index
    %c2_190 = arith.constant 2 : index
    %159 = vector.load %arg9[%c0_189, %c2_190] : memref<4x1260xf32, #tpu.memory_space<vmem>>, vector<4x1152xf32>
    %c8_191 = arith.constant 8 : index
    %c0_192 = arith.constant 0 : index
    %160 = vector.load %arg10[%c8_191, %c0_192] : memref<36x1152xf32, #tpu.memory_space<vmem>>, vector<4x1152xf32>
    tpu.vector_store %arg10[%c8_191, %c0_192], %159 {strides = array<i32>} : memref<36x1152xf32, #tpu.memory_space<vmem>>, vector<4x1152xf32>,
    %c0_193 = arith.constant 0 : index
    %c36_194 = arith.constant 36 : index
    %161 = vector.load %arg9[%c0_193, %c36_194] : memref<4x1260xf32, #tpu.memory_space<vmem>>, vector<4x1152xf32>
    %c12_195 = arith.constant 12 : index
    %c0_196 = arith.constant 0 : index
    %162 = vector.load %arg10[%c12_195, %c0_196] : memref<36x1152xf32, #tpu.memory_space<vmem>>, vector<4x1152xf32>
    tpu.vector_store %arg10[%c12_195, %c0_196], %161 {strides = array<i32>} : memref<36x1152xf32, #tpu.memory_space<vmem>>, vector<4x1152xf32>,
    %c0_197 = arith.constant 0 : index
    %c37_198 = arith.constant 37 : index
    %163 = vector.load %arg9[%c0_197, %c37_198] : memref<4x1260xf32, #tpu.memory_space<vmem>>, vector<4x1152xf32>
    %c16_199 = arith.constant 16 : index
    %c0_200 = arith.constant 0 : index
    %164 = vector.load %arg10[%c16_199, %c0_200] : memref<36x1152xf32, #tpu.memory_space<vmem>>, vector<4x1152xf32>
    tpu.vector_store %arg10[%c16_199, %c0_200], %163 {strides = array<i32>} : memref<36x1152xf32, #tpu.memory_space<vmem>>, vector<4x1152xf32>,
    %c0_201 = arith.constant 0 : index
    %c38_202 = arith.constant 38 : index
    %165 = vector.load %arg9[%c0_201, %c38_202] : memref<4x1260xf32, #tpu.memory_space<vmem>>, vector<4x1152xf32>
    %c20_203 = arith.constant 20 : index
    %c0_204 = arith.constant 0 : index
    %166 = vector.load %arg10[%c20_203, %c0_204] : memref<36x1152xf32, #tpu.memory_space<vmem>>, vector<4x1152xf32>
    tpu.vector_store %arg10[%c20_203, %c0_204], %165 {strides = array<i32>} : memref<36x1152xf32, #tpu.memory_space<vmem>>, vector<4x1152xf32>,
    %c0_205 = arith.constant 0 : index
    %c72_206 = arith.constant 72 : index
    %167 = vector.load %arg9[%c0_205, %c72_206] : memref<4x1260xf32, #tpu.memory_space<vmem>>, vector<4x1152xf32>
    %c24_207 = arith.constant 24 : index
    %c0_208 = arith.constant 0 : index
    %168 = vector.load %arg10[%c24_207, %c0_208] : memref<36x1152xf32, #tpu.memory_space<vmem>>, vector<4x1152xf32>
    tpu.vector_store %arg10[%c24_207, %c0_208], %167 {strides = array<i32>} : memref<36x1152xf32, #tpu.memory_space<vmem>>, vector<4x1152xf32>,
    %c0_209 = arith.constant 0 : index
    %c73_210 = arith.constant 73 : index
    %169 = vector.load %arg9[%c0_209, %c73_210] : memref<4x1260xf32, #tpu.memory_space<vmem>>, vector<4x1152xf32>
    %c28_211 = arith.constant 28 : index
    %c0_212 = arith.constant 0 : index
    %170 = vector.load %arg10[%c28_211, %c0_212] : memref<36x1152xf32, #tpu.memory_space<vmem>>, vector<4x1152xf32>
    tpu.vector_store %arg10[%c28_211, %c0_212], %169 {strides = array<i32>} : memref<36x1152xf32, #tpu.memory_space<vmem>>, vector<4x1152xf32>,
    %c0_213 = arith.constant 0 : index
    %c74_214 = arith.constant 74 : index
    %171 = vector.load %arg9[%c0_213, %c74_214] : memref<4x1260xf32, #tpu.memory_space<vmem>>, vector<4x1152xf32>
    %c32_215 = arith.constant 32 : index
    %c0_216 = arith.constant 0 : index
    %172 = vector.load %arg10[%c32_215, %c0_216] : memref<36x1152xf32, #tpu.memory_space<vmem>>, vector<4x1152xf32>
    tpu.vector_store %arg10[%c32_215, %c0_216], %171 {strides = array<i32>} : memref<36x1152xf32, #tpu.memory_space<vmem>>, vector<4x1152xf32>,
    %c0_217 = arith.constant 0 : index
    %c0_218 = arith.constant 0 : index
    %173 = vector.load %arg5[%c0_217, %c0_218] : memref<2x36xf32, #tpu.memory_space<vmem>>, vector<2x36xf32>
    %c0_219 = arith.constant 0 : index
    %c0_220 = arith.constant 0 : index
    %174 = vector.load %arg10[%c0_219, %c0_220] : memref<36x1152xf32, #tpu.memory_space<vmem>>, vector<36x1152xf32>
    %cst_221 = arith.constant dense<0.000000e+00> : vector<2x1152xf32>
    %175 = tpu.matmul %173, %174, %cst_221 {dimension_numbers = #tpu.dot_dimension_numbers<[1], [0], [0], [1], [0, 0, 1, 1], [], []>} : vector<2x36xf32>, vector<36x1152xf32>, vector<2x1152xf32> -> vector<2x1152xf32>
    %c0_222 = arith.constant 0 : index
    %c0_223 = arith.constant 0 : index
    %176 = vector.load %arg6[%c0_222, %c0_223] : memref<2x1xf32, #tpu.memory_space<vmem>>, vector<2x1xf32>
    %177 = vector.broadcast %176 : vector<2x1xf32> to vector<2x1152xf32>
    %178 = arith.addf %175, %177 : vector<2x1152xf32>
    %179 = vector.broadcast %20 : vector<1x1152xf32> to vector<2x1152xf32>
    %180 = arith.mulf %178, %179 : vector<2x1152xf32>
    %cst_224 = arith.constant dense<0.000000e+00> : vector<2xf32>
    %181 = vector.multi_reduction <add>, %180, %cst_224 [1] : vector<2x1152xf32> to vector<2xf32>
    %182 = vector.shape_cast %181 : vector<2xf32> to vector<2x1xf32>
    %cst_225 = arith.constant 9.765625E-4 : f32
    %183 = vector.broadcast %cst_225 : f32 to vector<2x1xf32>
    %184 = arith.mulf %182, %183 : vector<2x1xf32>
    %185 = vector.broadcast %184 : vector<2x1xf32> to vector<2x1152xf32>
    %186 = arith.subf %178, %185 : vector<2x1152xf32>
    %187 = arith.mulf %186, %186 : vector<2x1152xf32>
    %188 = vector.broadcast %20 : vector<1x1152xf32> to vector<2x1152xf32>
    %189 = arith.mulf %187, %188 : vector<2x1152xf32>
    %cst_226 = arith.constant dense<0.000000e+00> : vector<2xf32>
    %190 = vector.multi_reduction <add>, %189, %cst_226 [1] : vector<2x1152xf32> to vector<2xf32>
    %191 = vector.shape_cast %190 : vector<2xf32> to vector<2x1xf32>
    %cst_227 = arith.constant 9.765625E-4 : f32
    %192 = vector.broadcast %cst_227 : f32 to vector<2x1xf32>
    %193 = arith.mulf %191, %192 : vector<2x1xf32>
    %cst_228 = arith.constant 9.99999974E-6 : f32
    %194 = vector.broadcast %cst_228 : f32 to vector<2x1xf32>
    %195 = arith.addf %193, %194 : vector<2x1xf32>
    %196 = math.rsqrt %195 : vector<2x1xf32>
    %197 = vector.broadcast %196 : vector<2x1xf32> to vector<2x1152xf32>
    %198 = arith.mulf %186, %197 : vector<2x1152xf32>
    %cst_229 = arith.constant 0.000000e+00 : f32
    %199 = vector.broadcast %cst_229 : f32 to vector<2x1152xf32>
    %200 = arith.cmpf oge, %198, %199 : vector<2x1152xf32>
    %cst_230 = arith.constant 2.000000e-01 : f32
    %201 = vector.broadcast %cst_230 : f32 to vector<2x1152xf32>
    %202 = arith.mulf %201, %198 : vector<2x1152xf32>
    %203 = arith.select %200, %198, %202 : vector<2x1152xi1>, vector<2x1152xf32>
    %c0_231 = arith.constant 0 : index
    %c0_232 = arith.constant 0 : index
    %c0_233 = arith.constant 0 : index
    %204 = vector.load %arg7[%c0_231, %c0_232, %c0_233] : memref<1x2x1152xf32, #tpu.memory_space<vmem>>, vector<1x2x1152xf32>
    %205 = vector.shape_cast %204 : vector<1x2x1152xf32> to vector<2x1152xf32>
    %206 = vector.shape_cast %203 : vector<2x1152xf32> to vector<1x2x1152xf32>
    tpu.vector_store %arg7[%c0_231, %c0_232, %c0_233], %206 {strides = array<i32>} : memref<1x2x1152xf32, #tpu.memory_space<vmem>>, vector<1x2x1152xf32>,
    return
  }
  func.func @transform_0(%arg0: i32) -> (i32, i32, i32) {
    %c0_i32 = arith.constant 0 : i32
    %c0_i32_0 = arith.constant 0 : i32
    %c0_i32_1 = arith.constant 0 : i32
    return %arg0, %c0_i32, %c0_i32_0 : i32, i32, i32
  }
  func.func @transform_1(%arg0: i32) -> (i32, i32, i32, i32) {
    %c0_i32 = arith.constant 0 : i32
    %c0_i32_0 = arith.constant 0 : i32
    %c0_i32_1 = arith.constant 0 : i32
    %c0_i32_2 = arith.constant 0 : i32
    return %arg0, %c0_i32, %c0_i32_0, %c0_i32_1 : i32, i32, i32, i32
  }
  func.func @transform_2(%arg0: i32) -> (i32, i32) {
    %c0_i32 = arith.constant 0 : i32
    %c0_i32_0 = arith.constant 0 : i32
    %c0_i32_1 = arith.constant 0 : i32
    return %c0_i32, %c0_i32_0 : i32, i32
  }
  func.func @transform_3(%arg0: i32) -> (i32, i32) {
    %c0_i32 = arith.constant 0 : i32
    %c0_i32_0 = arith.constant 0 : i32
    %c0_i32_1 = arith.constant 0 : i32
    return %c0_i32, %c0_i32_0 : i32, i32
  }
  func.func @transform_4(%arg0: i32) -> (i32, i32) {
    %c0_i32 = arith.constant 0 : i32
    %c0_i32_0 = arith.constant 0 : i32
    %c0_i32_1 = arith.constant 0 : i32
    return %c0_i32, %c0_i32_0 : i32, i32
  }
  func.func @transform_5(%arg0: i32) -> (i32, i32) {
    %c0_i32 = arith.constant 0 : i32
    %c0_i32_0 = arith.constant 0 : i32
    %c0_i32_1 = arith.constant 0 : i32
    return %c0_i32, %c0_i32_0 : i32, i32
  }
  func.func @transform_6(%arg0: i32) -> (i32, i32, i32) {
    %c0_i32 = arith.constant 0 : i32
    %c0_i32_0 = arith.constant 0 : i32
    %c0_i32_1 = arith.constant 0 : i32
    return %arg0, %c0_i32, %c0_i32_0 : i32, i32, i32
  }
}

</mosaic_0001>

<bundles_post_ra>
// kernel: expanding_block_forward.1
= control target key start
LH: loop header
LB: loop body
LE: loop exit
PB: predicated region body
PF: predicated region fallthrough
CT: control target
= control target key end

     0   :  { %s3486_s21 = smov 0   ;;  %s4560_s0 = inlined_call_operand.vmem [shape: f32[2,4,1260], index: 0, kind: input, shape index: {}]   ;;  %s4561_s1 = inlined_call_operand.vmem [shape: f32[2,2,37,39], index: 1, kind: input, shape index: {}]   ;;  %s4562_s2 = inlined_call_operand.vmem [shape: f32[2,36], index: 2, kind: input, shape index: {}]   ;;  %s4563_s3 = inlined_call_operand.vmem [shape: f32[2,1], index: 3, kind: input, shape index: {}]   ;;  %s4564_s4 = inlined_call_operand.vmem [shape: f32[2,36], index: 4, kind: input, shape index: {}]   ;;  %s4565_s5 = inlined_call_operand.vmem [shape: f32[2,1], index: 5, kind: input, shape index: {}]   ;;  %s4566_s6 = inlined_call_operand.vmem [shape: f32[2,2,1152], index: 6, kind: output, shape index: {}]  }
   0x1 LB: > { %s3144_s22 = sadd.s32 4294967295, %s3406_s21   ;;  %p3148_p0 = scmp.ge.s32.totalorder %s3406_s21, 1  ;;  %s3406_s21 = sphi %s3486_s21, %s16_s21  }
   0x2   : > { %p222_p1 = scmp.lt.s32.totalorder %s3406_s21, 3 }
   0x4   : > { %p223_p2 = pnand %p3148_p0, %p222_p1 }
   0x5   : > { %p257_p3 = scmp.lt.s32.totalorder (!%p223_p2), %s3144_s22, 1  ;;  %s3408_s27 = smov (!%p223_p2), 126   ;;  %v3416_v13 = vmov (!%p223_p2), 0.0   ;;  %vm4576_vm0 = vcmask (!%p223_p2), 1031168   ;;  %vm4574_vm1 = vcmask (!%p223_p2), 752640   ;;  %vm4575_vm2 = vcmask (!%p223_p2), 1039360  }
   0x6   : > { %226 = sbr.rel (%p223_p2) target bundleno = 1444 (0x5a4), region = 44  ;;  %s3409_s28 = smov (!%p223_p2), 127   ;;  %1131 = vmatprep.mubr.f32.mxu0 (!%p223_p2), %v3416_v13  ;;  %1430 = vst [vmem:[#allocation3] sm:$0xff] (!%p223_p2), %v3416_v13  ;;  %1431 = vst [vmem:[#allocation3 + $0x8] sm:$0xff] (!%p223_p2), %v3416_v13  ;;  %1202 = vmatprep.mubr.f32.mxu1 (!%p223_p2), %v3416_v13  ;;  %vm4573_vm3 = vcmask (!%p223_p2), 744448   ;;  %vm4572_vm4 = vcmask (!%p223_p2), 736256  }
   0x7   : > { %s3410_s29 = smov (!%p223_p2), 92   ;;  %s3411_s30 = smov (!%p223_p2), 91   ;;  %1432 = vst [vmem:[#allocation3 + $0x10] sm:$0xff] (!%p223_p2), %v3416_v13  ;;  %1433 = vst [vmem:[#allocation3 + $0x18] sm:$0xff] (!%p223_p2), %v3416_v13  ;;  %vm4571_vm5 = vcmask (!%p223_p2), 457728   ;;  %vm4570_vm6 = vcmask (!%p223_p2), 449536  }
   0x8   : > { %s3412_s7 = smov (!%p223_p2), 90   ;;  %s3413_s8 = smov (!%p223_p2), 56   ;;  %vm1497_vm7 = vcmask (!%p223_p2), 1043459   ;;  %vm1499_vm8 = vcmask (!%p223_p2), 1047559   ;;  %vm4569_vm9 = vcmask (!%p223_p2), 441344   ;;  %vm1039_vm10 = vcmask (!%p223_p2), 1043456  }
   0x9   : > { %s3414_s9 = smov (!%p223_p2), 55   ;;  %s3415_s10 = smov (!%p223_p2), 54   ;;  %vm4568_vm11 = vcmask (!%p223_p2), 293888   ;;  %vm4567_vm12 = vmmov (!%p223_p2), 0   ;;  %vm1530_vm13 = vcmask (!%p223_p2), 867328   ;;  %vm1504_vm14 = vcmask (!%p223_p2), 560426  }
   0xa   : > { %s3418_s17 = smov (!%p223_p2), 70   ;;  %s3419_s18 = smov (!%p223_p2), 122   ;;  %vm1517_vm15 = vcmask (!%p223_p2), 855626  }
   0xb   : > { %s3420_s19 = smov (!%p223_p2), 106   ;;  %s3421_s20 = smov (!%p223_p2), 86  }
   0xc   : > { %s3423_s24 = smov (!%p223_p2), 30   ;;  %s3424_s25 = smov (!%p223_p2), 14  }
   0xd   : > { %s4660_s22 = smov (!%p257_p3, %s3144_s22), 1  ;;  %s3427_s12 = smov 46  }
   0xe   : > { %s3306_s23 = smul.u32 40, %s4660_s22  ;;  %s3428_s13 = smov 102  }
   0xf   : > { %s3307_s11 = smul.u32 80, %s4660_s22  ;;  %s3429_s15 = smov 98  }
  0x10   : > { %s3500_s26 = scalar_lea.vmem %s4560_s0, %s3306_s23  ;;  %s3422_s23 = smov 34  }
  0x11   : > { %v3503_v0 = vld [vmem:[%s3500_s26 + $0x8] sm:$0xff]  ;;  %v3506_v1 = vld [vmem:[%s3500_s26] sm:$0xff]  ;;  %v3509_v2 = vld [vmem:[%s3500_s26 + $0x10] sm:$0xff]  ;;  %s3728_s14 = scalar_lea.vmem %s4561_s1, %s3307_s11  ;;  %s3426_s11 = smov 50  }
  0x12   : > { %561 = vrot.lane.b32.xlu1 %v3503_v0, %s3408_s27  ;;  %v3515_v3 = vcombine.high %v3503_v0, %v3503_v0  ;;  %496 = vrot.lane.b32.xlu0 %v3506_v1, %s3409_s28  ;;  %v552_v4 = vcombine.high %v3506_v1, %v3506_v1  ;;  %v3522_v5 = vld [vmem:[%s3500_s26 + $0x18] sm:$0xff]  ;;  %470 = vst [vmem:[#allocation2] sm:$0xf] %v3506_v1  ;;  %472 = vst [vmem:[#allocation2 + $0x10] sm:$0xf] %v3503_v0  ;;  %v3610_v12 = vld [vmem:[%s3500_s26 + $0x20] sm:$0xff] }
  0x13   : > { %474 = vst [vmem:[#allocation2 + $0x20] sm:$0xf] %v3509_v2  ;;  %v3529_v6 = vcombine.high %v3509_v2, %v3509_v2  ;;  %476 = vst [vmem:[#allocation2 + $0x30] sm:$0xf] %v3522_v5  ;;  %v3534_v7 = vcombine.high %v3522_v5, %v3522_v5  ;;  %v616_v8 = vcombine.low %v3503_v0, %v3503_v0  ;;  %v457_v28 = vld [vmem:[%s3500_s26 + $0x20] sm:$0xf] }
  0x14   : > { %471 = vst [vmem:[#allocation2 + $0x8] sm:$0xf] %v552_v4  ;;  %473 = vst [vmem:[#allocation2 + $0x18] sm:$0xf] %v3515_v3  ;;  %v489_v9 = vcombine.low %v3506_v1, %v3506_v1  ;;  %v491_v10 = vcombine.low %v3509_v2, %v3509_v2  ;;  %v492_v11 = vcombine.low %v3522_v5, %v3522_v5  ;;  %s3425_s26 = smov 10   ;;  %s3430_s16 = smov 66  }
  0x15   : > { %475 = vst [vmem:[#allocation2 + $0x28] sm:$0xf] %v3529_v6  ;;  %477 = vst [vmem:[#allocation2 + $0x38] sm:$0xf] %v3534_v7  ;;  %v493_v14 = vcombine.low %v3610_v12, %v3610_v12  ;;  %v556_v40 = vcombine.high %v3610_v12, %v3610_v12 }
  0x16   : > { %559 = vrot.lane.b32.xlu1 %v552_v4, %s3408_s27  ;;  %622 = vrot.lane.b32.xlu0 %v3506_v1, %s3410_s29  ;;  %478 = vst [vmem:[#allocation2 + $0x40] sm:$0xf] %v457_v28 }
  0x1a   : > { %624 = vrot.lane.b32.xlu1 %v616_v8, %s3410_s29  ;;  %498 = vrot.lane.b32.xlu0 %v616_v8, %s3409_s28 }
  0x1e   : > { %557 = vrot.lane.b32.xlu1 %v3506_v1, %s3408_s27  ;;  %494 = vrot.lane.b32.xlu0 %v489_v9, %s3409_s28 }
  0x22   : > { %500 = vrot.lane.b32.xlu1 %v3503_v0, %s3409_s28  ;;  %620 = vrot.lane.b32.xlu0 %v489_v9, %s3410_s29 }
  0x26   : > { %563 = vrot.lane.b32.xlu1 %v3515_v3, %s3408_s27  ;;  %502 = vrot.lane.b32.xlu0 %v491_v10, %s3409_s28 }
  0x2a   : > { %626 = vrot.lane.b32.xlu1 %v3503_v0, %s3410_s29  ;;  %565 = vrot.lane.b32.xlu0 %v3509_v2, %s3408_s27 }
  0x2e   : > { %685 = vrot.lane.b32.xlu1 %v552_v4, %s3411_s30  ;;  %628 = vrot.lane.b32.xlu0 %v491_v10, %s3410_s29 }
  0x32   : > { %748 = vrot.lane.b32.xlu1 %v3506_v1, %s3412_s7  ;;  %687 = vrot.lane.b32.xlu0 %v3503_v0, %s3411_s30 }
  0x36   : > { %811 = vrot.lane.b32.xlu1 %v552_v4, %s3413_s8  ;;  %750 = vrot.lane.b32.xlu0 %v616_v8, %s3412_s7 }
  0x3a   : > { %874 = vrot.lane.b32.xlu1 %v3506_v1, %s3414_s9  ;;  %813 = vrot.lane.b32.xlu0 %v3503_v0, %s3413_s8 }
  0x3e   : > { %683 = vrot.lane.b32.xlu1 %v3506_v1, %s3411_s30  ;;  %876 = vrot.lane.b32.xlu0 %v616_v8, %s3414_s9  ;;  %v1506_v8 = vld [vmem:[%s3728_s14 + $0x3] sm:$0x1] }
  0x42   : > { %809 = vrot.lane.b32.xlu1 %v3506_v1, %s3413_s8  ;;  %746 = vrot.lane.b32.xlu0 %v489_v9, %s3412_s7 }
  0x46   : > { %689 = vrot.lane.b32.xlu1 %v3515_v3, %s3411_s30  ;;  %872 = vrot.lane.b32.xlu0 %v489_v9, %s3414_s9  ;;  %v1507_v9 = vld [vmem:[%s3728_s14 + $0x2b] sm:$0x1] }
  0x4a   : > { %752 = vrot.lane.b32.xlu1 %v3503_v0, %s3412_s7  ;;  %691 = vrot.lane.b32.xlu0 %v3509_v2, %s3411_s30 }
  0x4e   : > { %815 = vrot.lane.b32.xlu1 %v3515_v3, %s3413_s8  ;;  %754 = vrot.lane.b32.xlu0 %v491_v10, %s3412_s7 }
  0x52   : > { %878 = vrot.lane.b32.xlu1 %v3503_v0, %s3414_s9  ;;  %817 = vrot.lane.b32.xlu0 %v3509_v2, %s3413_s8 }
  0x56   : > { %504 = vrot.lane.b32.xlu1 %v3509_v2, %s3409_s28  ;;  %880 = vrot.lane.b32.xlu0 %v491_v10, %s3414_s9  ;;  %v1510_v10 = vrot.slane %v1506_v8, 6 }
  0x5a   : > { %567 = vrot.lane.b32.xlu1 %v3529_v6, %s3408_s27  ;;  %506 = vrot.lane.b32.xlu0 %v492_v11, %s3409_s28 }
  0x5e   : > { %630 = vrot.lane.b32.xlu1 %v3509_v2, %s3410_s29  ;;  %569 = vrot.lane.b32.xlu0 %v3522_v5, %s3408_s27 }
  0x62   : > { %937 = vrot.lane.b32.xlu1 %v552_v4, %s3415_s10  ;;  %632 = vrot.lane.b32.xlu0 %v492_v11, %s3410_s29 }
  0x66   : > { %935 = vrot.lane.b32.xlu1 %v3506_v1, %s3415_s10  ;;  %939 = vrot.lane.b32.xlu0 %v3503_v0, %s3415_s10 }
  0x6a   : > { %510 = vrot.lane.b32.xlu1 %v493_v14, %s3409_s28  ;;  %508 = vrot.lane.b32.xlu0 %v3522_v5, %s3409_s28 }
  0x6e   : > { %573 = vrot.lane.b32.xlu1 %v3610_v12, %s3408_s27  ;;  %571 = vrot.lane.b32.xlu0 %v3534_v7, %s3408_s27 }
  0x72   : > { %636 = vrot.lane.b32.xlu1 %v493_v14, %s3410_s29  ;;  %634 = vrot.lane.b32.xlu0 %v3522_v5, %s3410_s29 }
  0x76   : > { %695 = vrot.lane.b32.xlu1 %v3522_v5, %s3411_s30  ;;  %693 = vrot.lane.b32.xlu0 %v3529_v6, %s3411_s30 }
  0x7a   : > { %758 = vrot.lane.b32.xlu1 %v492_v11, %s3412_s7  ;;  %756 = vrot.lane.b32.xlu0 %v3509_v2, %s3412_s7 }
  0x7e   : > { %821 = vrot.lane.b32.xlu1 %v3522_v5, %s3413_s8  ;;  %819 = vrot.lane.b32.xlu0 %v3529_v6, %s3413_s8 }
  0x82   : > { %884 = vrot.lane.b32.xlu1 %v492_v11, %s3414_s9  ;;  %882 = vrot.lane.b32.xlu0 %v3509_v2, %s3414_s9  ;;  %v1511_v11 = vrot.slane %v1507_v9, 5 }
  0x84   : > { %v562_v15 = vpop.permute.xlu1 %561  ;;  %v497_v16 = vpop.permute.xlu0 %496 }
  0x86   : > { %943 = vrot.lane.b32.xlu1 %v3509_v2, %s3415_s10  ;;  %941 = vrot.lane.b32.xlu0 %v3515_v3, %s3415_s10 }
  0x88   : > { %v560_v17 = vpop.permute.xlu1 %559  ;;  %v623_v18 = vpop.permute.xlu0 %622 }
  0x89   : > { %v579_v19 = vsel %vm4576_vm0, %v560_v17, %v562_v15 }
  0x8a   : > { %597 = vst [vmem:[#allocation2 + $0x50] sm:$0xf] %v579_v19  ;;  %699 = vrot.lane.b32.xlu1 %v3610_v12, %s3411_s30  ;;  %697 = vrot.lane.b32.xlu0 %v3534_v7, %s3411_s30  ;;  %v1563_v19 = vld [vmem:[%s3728_s14 + $0x7] sm:$0x1] }
  0x8c   : > { %v625_v20 = vpop.permute.xlu1 %624  ;;  %v499_v21 = vpop.permute.xlu0 %498 }
  0x8d   : > { %v642_v22 = vsel %vm4574_vm1, %v623_v18, %v625_v20  ;;  %v516_v23 = vsel %vm4575_vm2, %v497_v16, %v499_v21 }
  0x8e   : > { %660 = vst [vmem:[#allocation2 + $0x50] sm:$0xf0] %v642_v22  ;;  %534 = vst [vmem:[#allocation2 + $0x8] sm:$0xf0] %v516_v23  ;;  %762 = vrot.lane.b32.xlu1 %v493_v14, %s3412_s7  ;;  %760 = vrot.lane.b32.xlu0 %v3522_v5, %s3412_s7  ;;  %v1512_v23 = vsel %vm1497_vm7, %v1511_v11, %v1510_v10 }
  0x90   : > { %v558_v24 = vpop.permute.xlu1 %557  ;;  %v495_v25 = vpop.permute.xlu0 %494 }
  0x91   : > { %v578_v26 = vsel %vm4576_vm0, %v558_v24, %v560_v17  ;;  %v515_v27 = vsel %vm4575_vm2, %v495_v25, %v497_v16  ;;  %v1567_v24 = vrot.slane %v1563_v19, 6  ;;  %v1519_v25 = vld [vmem:[%s3728_s14 + $0x4] sm:$0x1]  ;;  %v1721_v19 = vld [vmem:[%s3728_s14 + $0x12] sm:$0x1] }
  0x92   : > { %596 = vst [vmem:[#allocation2 + $0x48] sm:$0xf] %v578_v26  ;;  %533 = vst [vmem:[#allocation2] sm:$0xf0] %v515_v27  ;;  %825 = vrot.lane.b32.xlu1 %v3610_v12, %s3413_s8  ;;  %823 = vrot.lane.b32.xlu0 %v3534_v7, %s3413_s8  ;;  %v1520_v26 = vld [vmem:[%s3728_s14 + $0x2c] sm:$0x1]  ;;  %v1513_v27 = vsel %vm1499_vm8, %v1511_v11, %v1512_v23 }
  0x93   : > { %v1652_v11 = vld [vmem:[%s3728_s14 + $0x35] sm:$0x1] }
  0x94   : > { %v501_v29 = vpop.permute.xlu1 %500  ;;  %v621_v30 = vpop.permute.xlu0 %620 }
  0x95   : > { %v517_v31 = vsel %vm4575_vm2, %v499_v21, %v501_v29  ;;  %v641_v32 = vsel %vm4574_vm1, %v621_v30, %v623_v18  ;;  %v985_v33 = vld [vmem:[#allocation2 + $0x8] sm:$0xff]  ;;  %v994_v34 = vld [vmem:[#allocation2 + $0x50] sm:$0xff]  ;;  %v1523_v30 = vrot.slane %v1519_v25, 6  ;;  %v3794_v25 = vld [vmem:[%s3728_s14 + $0x3a] sm:$0x1] }
  0x96   : > { %535 = vst [vmem:[#allocation2 + $0x10] sm:$0xf0] %v517_v31  ;;  %659 = vst [vmem:[#allocation2 + $0x48] sm:$0xf0] %v641_v32  ;;  %888 = vrot.lane.b32.xlu1 %v493_v14, %s3414_s9  ;;  %886 = vrot.lane.b32.xlu0 %v3522_v5, %s3414_s9  ;;  %v3230_v35 = vpack.c.bf16 %v994_v34, %v985_v33  ;;  %v1577_v14 = vld [vmem:[%s3728_s14 + $0x30] sm:$0x1] }
  0x97   : > { %v1581_v18 = vrot.slane %v1577_v14, 5  ;;  %v1594_v31 = vld [vmem:[%s3728_s14 + $0x9] sm:$0x1]  ;;  %v1524_v34 = vrot.slane %v1520_v26, 5 }
  0x98   : > { %v564_v36 = vpop.permute.xlu1 %563  ;;  %v3674_v37 = vpop.permute.xlu0 %502  ;;  %3231 = vmatprep.subr.bf16.mxu0 %v3230_v35  ;;  %v1595_v35 = vld [vmem:[%s3728_s14 + $0x31] sm:$0x1] }
  0x99   : > { %v580_v38 = vsel %vm4576_vm0, %v562_v15, %v564_v36  ;;  %v518_v39 = vsel %vm4575_vm2, %v501_v29, %v3674_v37  ;;  %v984_v45 = vld [vmem:[#allocation2] sm:$0xff] }
  0x9a   : > { %598 = vst [vmem:[#allocation2 + $0x58] sm:$0xf] %v580_v38  ;;  %536 = vst [vmem:[#allocation2 + $0x18] sm:$0xf0] %v518_v39  ;;  %947 = vrot.lane.b32.xlu1 %v3522_v5, %s3415_s10  ;;  %945 = vrot.lane.b32.xlu0 %v3529_v6, %s3415_s10  ;;  %v1029_v6 = vld [vmem:[%s4563_s3] sm:$0x3] }
  0x9c   : > { %v627_v41 = vpop.permute.xlu1 %626  ;;  %v3685_v42 = vpop.permute.xlu0 %565 }
  0x9d   : > { %v643_v43 = vsel %vm4574_vm1, %v625_v20, %v627_v41  ;;  %v581_v44 = vsel %vm4576_vm0, %v564_v36, %v3685_v42  ;;  %v993_v46 = vld [vmem:[#allocation2 + $0x48] sm:$0xff]  ;;  %v986_v61 = vld [vmem:[#allocation2 + $0x10] sm:$0xff]  ;;  %v1491_v36 = vld [vmem:[%s3728_s14 + $0x2] sm:$0x1] }
  0x9e   : > { %661 = vst [vmem:[#allocation2 + $0x58] sm:$0xf0] %v643_v43  ;;  %599 = vst [vmem:[#allocation2 + $0x60] sm:$0xf] %v581_v44  ;;  %575 = vrot.lane.b32.xlu1 %v556_v40, %s3408_s27  ;;  %512 = vrot.lane.b32.xlu0 %v3610_v12, %s3409_s28  ;;  %v3232_v47 = vpack.c.bf16 %v993_v46, %v984_v45  ;;  %v1564_v20 = vld [vmem:[%s3728_s14 + $0x2f] sm:$0x1] }
  0x9f   : > { %v1568_v29 = vrot.slane %v1564_v20, 5  ;;  %v1599_v43 = vrot.slane %v1595_v35, 5  ;;  %v1492_v44 = vld [vmem:[%s3728_s14 + $0x2a] sm:$0x1]  ;;  %v1495_v45 = vrot.slane %v1491_v36, 6 }
  0xa0   : > { %v686_v48 = vpop.permute.xlu1 %685  ;;  %v3693_v49 = vpop.permute.xlu0 %628  ;;  %3233 = vmatpush1.bf16.msra.mxu0 %v3232_v47  ;;  %v1621_v20 = vld [vmem:[%s3728_s14 + $0x33] sm:$0x1]  ;;  %v1607_v35 = vld [vmem:[%s3728_s14 + $0xa] sm:$0x1]  ;;  %v1608_v36 = vld [vmem:[%s3728_s14 + $0x32] sm:$0x1] }
  0xa1   : > { %v644_v50 = vsel %vm4574_vm1, %v627_v41, %v3693_v49  ;;  %v987_v58 = vld [vmem:[#allocation2 + $0x18] sm:$0xff]  ;;  %v1598_v41 = vrot.slane %v1594_v31, 6 }
  0xa2   : > { %662 = vst [vmem:[#allocation2 + $0x60] sm:$0xf0] %v644_v50  ;;  %949 = vrot.lane.b32.xlu1 %v3534_v7, %s3415_s10  ;;  %638 = vrot.lane.b32.xlu0 %v3610_v12, %s3410_s29  ;;  %v3417_v7 = vmov 0   ;;  %v1525_v50 = vsel %vm1497_vm7, %v1524_v34, %v1523_v30 }
  0xa3   : > { %3378 = vset.pattern.permute.xlu0 %v3417_v7  ;;  %3379 = vset.pattern.permute.xlu1 %v3417_v7 }
  0xa4   : > { %v749_v51 = vpop.permute.xlu1 %748  ;;  %v3701_v52 = vpop.permute.xlu0 %687 }
  0xa5   : > { %v705_v53 = vsel %vm4573_vm3, %v686_v48, %v3701_v52  ;;  %v995_v56 = vld [vmem:[#allocation2 + $0x58] sm:$0xff] }
  0xa6   : > { %723 = vst [vmem:[#allocation2 + $0x98] sm:$0xf] %v705_v53  ;;  %701 = vrot.lane.b32.xlu1 %v556_v40, %s3411_s30  ;;  %951 = vrot.lane.b32.xlu0 %v3610_v12, %s3415_s10  ;;  %v3240_v62 = vpack.c.bf16 %v995_v56, %v986_v61  ;;  %v3765_v53 = vld [vmem:[%s3728_s14 + $0x34] sm:$0x1]  ;;  %v1526_v56 = vsel %vm1499_vm8, %v1524_v34, %v1525_v50  ;;  %v1709_v50 = vld [vmem:[%s3728_s14 + $0x39] sm:$0x1] }
  0xa7   : > { %v1643_v10 = vrot.slane %v3765_v53, 5  ;;  %v1612_v53 = vrot.slane %v1608_v36, 5 }
  0xa8   : > { %v812_v54 = vpop.permute.xlu1 %811  ;;  %v3708_v55 = vpop.permute.xlu0 %750 }
  0xa9   : > { %v768_v57 = vsel %vm4572_vm4, %v749_v51, %v3708_v55  ;;  %v996_v59 = vld [vmem:[#allocation2 + $0x60] sm:$0xff] }
  0xaa   : > { %786 = vst [vmem:[#allocation2 + $0x98] sm:$0xf0] %v768_v57  ;;  %827 = vrot.lane.b32.xlu1 %v556_v40, %s3413_s8  ;;  %764 = vrot.lane.b32.xlu0 %v3610_v12, %s3412_s7  ;;  %v3238_v60 = vpack.c.bf16 %v996_v59, %v987_v58  ;;  %v1496_v57 = vrot.slane %v1492_v44, 5  ;;  %v1537_v58 = vld [vmem:[%s3728_s14 + $0x5] sm:$0x1] }
  0xab   : > { %v1538_v59 = vld [vmem:[%s3728_s14 + $0x2d] sm:$0x1] }
  0xac   : > { %v3716_v63 = vpop.permute.xlu1 %874  ;;  %v3718_v0 = vpop.permute.xlu0 %813  ;;  %3239 = vmatprep.subr.bf16.mxu1 %v3238_v60  ;;  %v1541_v60 = vrot.slane %v1537_v58, 6  ;;  %v1778_v58 = vld [vmem:[%s3728_s14 + $0x16] sm:$0x1] }
  0xad   : > { %v831_v1 = vsel %vm4571_vm5, %v812_v54, %v3718_v0  ;;  %3241 = vmatpush1.bf16.msra.mxu1 %v3240_v62 }
  0xae   : > { %849 = vst [vmem:[#allocation2 + $0xe0] sm:$0xf] %v831_v1  ;;  %890 = vrot.lane.b32.xlu0 %v3610_v12, %s3414_s9  ;;  %953 = vrot.lane.b32.xlu1 %v556_v40, %s3415_s10  ;;  %v1576_v12 = vld [vmem:[%s3728_s14 + $0x8] sm:$0x1]  ;;  %v1569_v40 = vsel %vm1497_vm7, %v1568_v29, %v1567_v24  ;;  %v1498_v1 = vsel %vm1497_vm7, %v1496_v57, %v1495_v45  ;;  %v1656_v24 = vrot.slane %v1652_v11, 5 }
  0xaf   : > { %v1580_v17 = vrot.slane %v1576_v12, 6  ;;  %v1500_v9 = vsel %vm1499_vm8, %v1496_v57, %v1498_v1  ;;  %v1551_v12 = vld [vmem:[%s3728_s14 + $0x2e] sm:$0x1]  ;;  %v3826_v1 = vld [vmem:[%s3728_s14 + $0x3e] sm:$0x1] }
  0xb0   : > { %v684_v2 = vpop.permute.xlu1 %683  ;;  %v3730_v3 = vpop.permute.xlu0 %876  ;;  %v1783_v11 = vrot.slane %v3826_v1, 5 }
  0xb1   : > { %v704_v4 = vsel %vm4573_vm3, %v684_v2, %v686_v48  ;;  %v894_v5 = vsel %vm4570_vm6, %v3716_v63, %v3730_v3  ;;  %v1582_v28 = vsel %vm1497_vm7, %v1581_v18, %v1580_v17  ;;  %v1003_v32 = vld [vmem:[#allocation2 + $0x98] sm:$0xff] }
  0xb2   : > { %722 = vst [vmem:[#allocation2 + $0x90] sm:$0xf] %v704_v4  ;;  %912 = vst [vmem:[#allocation2 + $0xe0] sm:$0xf0] %v894_v5  ;;  %1032 = vperm.xlu0 %3378, %v1029_v6   ;;  %v1583_v33 = vsel %vm1499_vm8, %v1581_v18, %v1582_v28  ;;  %1527 = vrot.lane.b32.xlu1 %v1526_v56, %s3420_s19  ;;  %v1542_v4 = vrot.slane %v1538_v59, 5  ;;  %v1555_v18 = vrot.slane %v1551_v12, 5 }
  0xb3   : > { %v1651_v5 = vld [vmem:[%s3728_s14 + $0xd] sm:$0x1]  ;;  %v1550_v6 = vld [vmem:[%s3728_s14 + $0x6] sm:$0x1]  ;;  %v1678_v56 = vld [vmem:[%s3728_s14 + $0x37] sm:$0x1] }
  0xb4   : > { %v810_v15 = vpop.permute.xlu1 %809  ;;  %v747_v16 = vpop.permute.xlu0 %746  ;;  %v1543_v14 = vsel %vm1497_vm7, %v1542_v4, %v1541_v60  ;;  %v1655_v17 = vrot.slane %v1651_v5, 6  ;;  %s3433_s19 = smov 114  }
  0xb5   : > { %v830_v21 = vsel %vm4571_vm5, %v810_v15, %v812_v54  ;;  %v767_v22 = vsel %vm4572_vm4, %v747_v16, %v749_v51  ;;  %v1638_v51 = vld [vmem:[%s3728_s14 + $0xc] sm:$0x1]  ;;  %v1554_v15 = vrot.slane %v1550_v6, 6  ;;  %v1620_v16 = vld [vmem:[%s3728_s14 + $0xb] sm:$0x1]  ;;  %v1544_v23 = vsel %vm1499_vm8, %v1542_v4, %v1543_v14 }
  0xb6   : > { %848 = vst [vmem:[#allocation2 + $0xd8] sm:$0xf] %v830_v21  ;;  %785 = vst [vmem:[#allocation2 + $0x90] sm:$0xf0] %v767_v22  ;;  %1514 = vrot.lane.b32.xlu0 %v1513_v27, %s3418_s17  ;;  %v1642_v2 = vrot.slane %v1638_v51, 6  ;;  %1501 = vrot.lane.b32.xlu1 %v1500_v9, %s3422_s23  ;;  %v1624_v26 = vrot.slane %v1620_v16, 6 }
  0xb7   : > { %v1625_v27 = vrot.slane %v1621_v20, 5  ;;  %v1611_v51 = vrot.slane %v1607_v35, 6  ;;  %v3835_v9 = vld [vmem:[%s3728_s14 + $0x36] sm:$0x1]  ;;  %s3431_s17 = smov 62   ;;  %s3435_s23 = smov 94  }
  0xb8   : > { %v690_v38 = vpop.permute.xlu1 %689  ;;  %v873_v39 = vpop.permute.xlu0 %872 }
  0xb9   : > { %v706_v46 = vsel %vm4573_vm3, %v3701_v52, %v690_v38  ;;  %v893_v47 = vsel %vm4570_vm6, %v873_v39, %v3716_v63  ;;  %v1012_v48 = vld [vmem:[#allocation2 + $0xe0] sm:$0xff]  ;;  %v1570_v52 = vsel %vm1499_vm8, %v1568_v29, %v1569_v40  ;;  %v1600_v63 = vsel %vm1497_vm7, %v1599_v43, %v1598_v41 }
  0xba   : > { %724 = vst [vmem:[#allocation2 + $0xa0] sm:$0xf] %v706_v46  ;;  %911 = vst [vmem:[#allocation2 + $0xd8] sm:$0xf0] %v893_v47  ;;  %v3234_v54 = vpack.c.bf16 %v1012_v48, %v1003_v32  ;;  %1584 = vrot.lane.b32.xlu0 %v1583_v33, %s3419_s18  ;;  %v1644_v32 = vsel %vm1497_vm7, %v1643_v10, %v1642_v2  ;;  %v1556_v33 = vsel %vm1497_vm7, %v1555_v18, %v1554_v15  ;;  %v1708_v46 = vld [vmem:[%s3728_s14 + $0x11] sm:$0x1] }
  0xbb   : > { %1545 = vrot.lane.b32.xlu1 %v1544_v23, %s3424_s25  ;;  %v1645_v41 = vsel %vm1499_vm8, %v1643_v10, %v1644_v32  ;;  %v1557_v44 = vsel %vm1499_vm8, %v1555_v18, %v1556_v33  ;;  %v1626_v45 = vsel %vm1497_vm7, %v1625_v27, %v1624_v26  ;;  %v1613_v6 = vsel %vm1497_vm7, %v1612_v53, %v1611_v51  ;;  %v1823_v23 = vld [vmem:[%s3728_s14 + $0x41] sm:$0x1]  ;;  %s3432_s18 = smov 118   ;;  %s3437_s25 = smov 58  }
  0xbc   : > { %v753_v61 = vpop.permute.xlu1 %752  ;;  %v3771_v62 = vpop.permute.xlu0 %691  ;;  %3235 = vmatprep.subr.bf16.mxu0 %v3234_v54  ;;  %v1677_v54 = vld [vmem:[%s3728_s14 + $0xf] sm:$0x1]  ;;  %v1627_v60 = vsel %vm1499_vm8, %v1625_v27, %v1626_v45  ;;  %v1614_v16 = vsel %vm1499_vm8, %v1612_v53, %v1613_v6  ;;  %v1827_v32 = vrot.slane %v1823_v23, 5 }
  0xbd   : > { %v769_v7 = vsel %vm4572_vm4, %v3708_v55, %v753_v61  ;;  %v707_v8 = vsel %vm4573_vm3, %v690_v38, %v3771_v62  ;;  %v1601_v55 = vsel %vm1499_vm8, %v1599_v43, %v1600_v63  ;;  %v1002_v30 = vld [vmem:[#allocation2 + $0x90] sm:$0xff]  ;;  %v1726_v38 = vrot.slane %v3794_v25, 5  ;;  %v1696_v25 = vld [vmem:[%s3728_s14 + $0x38] sm:$0x1] }
  0xbe   : > { %787 = vst [vmem:[#allocation2 + $0xa0] sm:$0xf0] %v769_v7  ;;  %725 = vst [vmem:[#allocation2 + $0xa8] sm:$0xf] %v707_v8  ;;  %1571 = vrot.lane.b32.xlu0 %v1570_v52, %s3421_s20  ;;  %v1657_v43 = vsel %vm1497_vm7, %v1656_v24, %v1655_v17  ;;  %v1713_v63 = vrot.slane %v1709_v50, 5  ;;  %v1681_v2 = vrot.slane %v1677_v54, 6 }
  0xbf   : > { %v1658_v57 = vsel %vm1499_vm8, %v1656_v24, %v1657_v43  ;;  %1558 = vrot.lane.b32.xlu1 %v1557_v44, %s3426_s11  ;;  %v1682_v7 = vrot.slane %v1678_v56, 5  ;;  %v1664_v8 = vld [vmem:[%s3728_s14 + $0xe] sm:$0x1]  ;;  %v1669_v17 = vrot.slane %v3835_v9, 5  ;;  %v1695_v24 = vld [vmem:[%s3728_s14 + $0x10] sm:$0x1] }
  0xc0   : > { %v816_v21 = vpop.permute.xlu1 %815  ;;  %v3790_v22 = vpop.permute.xlu0 %754  ;;  %v1700_v43 = vrot.slane %v1696_v25, 5  ;;  %s3434_s20 = smov 82  }
  0xc1   : > { %v832_v28 = vsel %vm4571_vm5, %v3718_v0, %v816_v21  ;;  %v770_v29 = vsel %vm4572_vm4, %v753_v61, %v3790_v22  ;;  %v1011_v31 = vld [vmem:[#allocation2 + $0xd8] sm:$0xff]  ;;  %v1725_v0 = vrot.slane %v1721_v19, 6  ;;  %v1712_v61 = vrot.slane %v1708_v46, 6  ;;  %v1739_v46 = vld [vmem:[%s3728_s14 + $0x13] sm:$0x1] }
  0xc2   : > { %850 = vst [vmem:[#allocation2 + $0xe8] sm:$0xf] %v832_v28  ;;  %788 = vst [vmem:[#allocation2 + $0xa8] sm:$0xf0] %v770_v29  ;;  %v3236_v34 = vpack.c.bf16 %v1011_v31, %v1002_v30  ;;  %1602 = vrot.lane.b32.xlu0 %v1601_v55, %s3423_s24  ;;  %v1668_v55 = vrot.slane %v1664_v8, 6  ;;  %v1683_v20 = vsel %vm1497_vm7, %v1682_v7, %v1681_v2  ;;  %s3436_s24 = smov 26  }
  0xc3   : > { %1628 = vrot.lane.b32.xlu1 %v1627_v60, %s3428_s13  ;;  %v1714_v15 = vsel %vm1497_vm7, %v1713_v63, %v1712_v61  ;;  %v1684_v30 = vsel %vm1499_vm8, %v1682_v7, %v1683_v20  ;;  %v1841_v60 = vld [vmem:[%s3728_s14 + $0x42] sm:$0x1]  ;;  %v1743_v61 = vrot.slane %v1739_v46, 6  ;;  %s3439_s13 = smov 2  }
  0xc4   : > { %v879_v39 = vpop.permute.xlu1 %878  ;;  %v3805_v40 = vpop.permute.xlu0 %817  ;;  %3237 = vmatpush1.bf16.msra.mxu0 %v3236_v34  ;;  %v1715_v26 = vsel %vm1499_vm8, %v1713_v63, %v1714_v15  ;;  %v1670_v33 = vsel %vm1497_vm7, %v1669_v17, %v1668_v55  ;;  %v1809_v34 = vld [vmem:[%s3728_s14 + $0x18] sm:$0x1]  ;;  %v1845_v8 = vrot.slane %v1841_v60, 5  ;;  %v1853_v15 = vld [vmem:[%s3728_s14 + $0x1b] sm:$0x1] }
  0xc5   : > { %v895_v47 = vsel %vm4570_vm6, %v3730_v3, %v879_v39  ;;  %v833_v48 = vsel %vm4571_vm5, %v816_v21, %v3805_v40  ;;  %v1727_v3 = vsel %vm1497_vm7, %v1726_v38, %v1725_v0  ;;  %v1822_v21 = vld [vmem:[%s3728_s14 + $0x19] sm:$0x1]  ;;  %v1004_v45 = vld [vmem:[#allocation2 + $0xa0] sm:$0xff]  ;;  %v1671_v54 = vsel %vm1499_vm8, %v1669_v17, %v1670_v33 }
  0xc6   : > { %913 = vst [vmem:[#allocation2 + $0xe8] sm:$0xf0] %v895_v47  ;;  %851 = vst [vmem:[#allocation2 + $0xf0] sm:$0xf] %v833_v48  ;;  %1646 = vrot.lane.b32.xlu0 %v1645_v41, %s3425_s26  ;;  %v1728_v10 = vsel %vm1499_vm8, %v1726_v38, %v1727_v3  ;;  %v1826_v31 = vrot.slane %v1822_v21, 6  ;;  %v1699_v41 = vrot.slane %v1695_v24, 6 }
  0xc7   : > { %1615 = vrot.lane.b32.xlu1 %v1614_v16, %s3430_s16  ;;  %v1740_v47 = vld [vmem:[%s3728_s14 + $0x3b] sm:$0x1]  ;;  %v1813_v56 = vrot.slane %v1809_v34, 6  ;;  %v1854_v16 = vld [vmem:[%s3728_s14 + $0x43] sm:$0x1]  ;;  %s3438_s26 = smov 6  }
  0xc8   : > { %v505_v59 = vpop.permute.xlu1 %504  ;;  %v3822_v52 = vpop.permute.xlu0 %880  ;;  %v1828_v53 = vsel %vm1497_vm7, %v1827_v32, %v1826_v31  ;;  %v1744_v63 = vrot.slane %v1740_v47, 5  ;;  %s3441_s16 = smov 38  }
  0xc9   : > { %v519_v4 = vsel %vm4575_vm2, %v3674_v37, %v505_v59  ;;  %v896_v5 = vsel %vm4570_vm6, %v879_v39, %v3822_v52  ;;  %v1782_v37 = vrot.slane %v1778_v58, 6  ;;  %v1005_v0 = vld [vmem:[#allocation2 + $0xa8] sm:$0xff]  ;;  %v1810_v39 = vld [vmem:[%s3728_s14 + $0x40] sm:$0x1]  ;;  %v1701_v58 = vsel %vm1497_vm7, %v1700_v43, %v1699_v41 }
  0xca   : > { %537 = vst [vmem:[#allocation2 + $0x20] sm:$0xf0] %v519_v4  ;;  %914 = vst [vmem:[#allocation2 + $0xf0] sm:$0xf0] %v896_v5  ;;  %1659 = vrot.lane.b32.xlu0 %v1658_v57, %s3427_s12  ;;  %v1814_v57 = vrot.slane %v1810_v39, 5  ;;  %v1829_v1 = vsel %vm1499_vm8, %v1827_v32, %v1828_v53  ;;  %v1702_v6 = vsel %vm1499_vm8, %v1700_v43, %v1701_v58 }
  0xcb   : > { %1685 = vrot.lane.b32.xlu1 %v1684_v30, %s3432_s18  ;;  %s3445_s18 = smov 22  }
  0xcc   : > { %v568_v12 = vpop.permute.xlu1 %567  ;;  %v3839_v14 = vpop.permute.xlu0 %506  ;;  %v1815_v5 = vsel %vm1497_vm7, %v1814_v57, %v1813_v56 }
  0xcd   : > { %v582_v18 = vsel %vm4576_vm0, %v3685_v42, %v568_v12  ;;  %v520_v19 = vsel %vm4575_vm2, %v505_v59, %v3839_v14  ;;  %v1784_v42 = vsel %vm1497_vm7, %v1783_v11, %v1782_v37  ;;  %v1013_v29 = vld [vmem:[#allocation2 + $0xe8] sm:$0xff]  ;;  %v1840_v59 = vld [vmem:[%s3728_s14 + $0x1a] sm:$0x1]  ;;  %v1745_v37 = vsel %vm1497_vm7, %v1744_v63, %v1743_v61 }
  0xce   : > { %600 = vst [vmem:[#allocation2 + $0x68] sm:$0xf] %v582_v18  ;;  %538 = vst [vmem:[#allocation2 + $0x28] sm:$0xf0] %v520_v19  ;;  %1729 = vrot.lane.b32.xlu0 %v1728_v10, %s3429_s15  ;;  %v3244_v48 = vpack.c.bf16 %v1013_v29, %v1004_v45  ;;  %v1844_v7 = vrot.slane %v1840_v59, 6  ;;  %v1816_v55 = vsel %vm1499_vm8, %v1814_v57, %v1815_v5  ;;  %s3440_s15 = smov 42  }
  0xcf   : > { %1672 = vrot.lane.b32.xlu1 %v1671_v54, %s3434_s20  ;;  %v1746_v20 = vsel %vm1499_vm8, %v1744_v63, %v1745_v37  ;;  %v1911_v29 = vld [vmem:[%s3728_s14 + $0x47] sm:$0x1]  ;;  %s3447_s20 = smov 74  }
  0xd0   : > { %v631_v27 = vpop.permute.xlu1 %630  ;;  %v3855_v28 = vpop.permute.xlu0 %569  ;;  %v1846_v19 = vsel %vm1497_vm7, %v1845_v8, %v1844_v7  ;;  %v1915_v45 = vrot.slane %v1911_v29, 5 }
  0xd1   : > { %v645_v35 = vsel %vm4574_vm1, %v3693_v49, %v631_v27  ;;  %v583_v36 = vsel %vm4576_vm0, %v568_v12, %v3855_v28  ;;  %v1014_v38 = vld [vmem:[#allocation2 + $0xf0] sm:$0xff]  ;;  %v1785_v49 = vsel %vm1499_vm8, %v1783_v11, %v1784_v42  ;;  %v1753_v12 = vld [vmem:[%s3728_s14 + $0x3c] sm:$0x1]  ;;  %v1858_v42 = vrot.slane %v1854_v16, 5  ;;  %v988_v47 = vld [vmem:[#allocation2 + $0x20] sm:$0xff] }
  0xd2   : > { %663 = vst [vmem:[#allocation2 + $0x68] sm:$0xf0] %v645_v35  ;;  %601 = vst [vmem:[#allocation2 + $0x70] sm:$0xf] %v583_v36  ;;  %v3242_v44 = vpack.c.bf16 %v1014_v38, %v1005_v0  ;;  %1716 = vrot.lane.b32.xlu0 %v1715_v26, %s3431_s17  ;;  %v1752_v11 = vld [vmem:[%s3728_s14 + $0x14] sm:$0x1]  ;;  %v1847_v34 = vsel %vm1499_vm8, %v1845_v8, %v1846_v19 }
  0xd3   : > { %1703 = vrot.lane.b32.xlu1 %v1702_v6, %s3436_s24  ;;  %v1756_v21 = vrot.slane %v1752_v11, 6  ;;  %v1757_v23 = vrot.slane %v1753_v12, 5  ;;  %v1857_v26 = vrot.slane %v1853_v15, 6  ;;  %s3444_s17 = smov 78  }
  0xd4   : > { %v938_v50 = vpop.permute.xlu1 %937  ;;  %v3868_v51 = vpop.permute.xlu0 %632  ;;  %3243 = vmatprep.subr.bf16.mxu1 %v3242_v44 }
  0xd5   : > { %v646_v3 = vsel %vm4574_vm1, %v631_v27, %v3868_v51  ;;  %3245 = vmatpush1.bf16.msra.mxu1 %v3244_v48  ;;  %v1910_v27 = vld [vmem:[%s3728_s14 + $0x1f] sm:$0x1]  ;;  %v1758_v35 = vsel %vm1497_vm7, %v1757_v23, %v1756_v21  ;;  %v989_v43 = vld [vmem:[#allocation2 + $0x28] sm:$0xff]  ;;  %v1859_v44 = vsel %vm1497_vm7, %v1858_v42, %v1857_v26 }
  0xd6   : > { %664 = vst [vmem:[#allocation2 + $0x70] sm:$0xf0] %v646_v3  ;;  %1786 = vrot.lane.b32.xlu0 %v1785_v49, %s3433_s19  ;;  %v1914_v36 = vrot.slane %v1910_v27, 6  ;;  %v1860_v53 = vsel %vm1499_vm8, %v1858_v42, %v1859_v44  ;;  %s3446_s19 = smov 110  }
  0xd7   : > { %1747 = vrot.lane.b32.xlu1 %v1746_v20, %s3438_s26 }
  0xd8   : > { %v936_v2 = vpop.permute.xlu1 %935  ;;  %v3878_v4 = vpop.permute.xlu0 %939  ;;  %v1916_v57 = vsel %vm1497_vm7, %v1915_v45, %v1914_v36 }
  0xd9   : > { %v956_v9 = vsel %vm4569_vm9, %v936_v2, %v938_v50  ;;  %v957_v10 = vsel %vm4569_vm9, %v938_v50, %v3878_v4  ;;  %v997_v33 = vld [vmem:[#allocation2 + $0x68] sm:$0xff]  ;;  %v1917_v59 = vsel %vm1499_vm8, %v1915_v45, %v1916_v57 }
  0xda   : > { %974 = vst [vmem:[#allocation2 + $0x120] sm:$0xf] %v956_v9  ;;  %975 = vst [vmem:[#allocation2 + $0x128] sm:$0xf] %v957_v10  ;;  %1830 = vrot.lane.b32.xlu0 %v1829_v1, %s3435_s23  ;;  %v3248_v48 = vpack.c.bf16 %v997_v33, %v988_v47  ;;  %s3448_s23 = smov 18  }
  0xdc   : > { %v3891_v17 = vpop.permute.xlu1 %510  ;;  %v509_v18 = vpop.permute.xlu0 %508 }
  0xdd   : > { %v521_v24 = vsel %vm4575_vm2, %v3839_v14, %v509_v18  ;;  %v522_v25 = vsel %vm4575_vm2, %v509_v18, %v3891_v17  ;;  %v998_v30 = vld [vmem:[#allocation2 + $0x70] sm:$0xff]  ;;  %v3906_v14 = vld [vmem:[%s4562_s2] sm:$0x3] }
  0xde   : > { %539 = vst [vmem:[#allocation2 + $0x30] sm:$0xf0] %v521_v24  ;;  %540 = vst [vmem:[#allocation2 + $0x38] sm:$0xf0] %v522_v25  ;;  %1817 = vrot.lane.b32.xlu0 %v1816_v55, %s3437_s25  ;;  %v3246_v46 = vpack.c.bf16 %v998_v30, %v989_v43 }
  0xe0   : > { %v3901_v31 = vpop.permute.xlu1 %573  ;;  %v572_v32 = vpop.permute.xlu0 %571 }
  0xe1   : > { %v584_v0 = vsel %vm4576_vm0, %v3855_v28, %v572_v32  ;;  %v585_v38 = vsel %vm4576_vm0, %v572_v32, %v3901_v31  ;;  %v1021_v39 = vld [vmem:[#allocation2 + $0x128] sm:$0xf]  ;;  %v1020_v41 = vld [vmem:[#allocation2 + $0x120] sm:$0xf]  ;;  %v1759_v28 = vsel %vm1499_vm8, %v1757_v23, %v1758_v35 }
  0xe2   : > { %602 = vst [vmem:[#allocation2 + $0x78] sm:$0xf] %v584_v0  ;;  %603 = vst [vmem:[#allocation2 + $0x80] sm:$0xf] %v585_v38  ;;  %3161 = vmatprep.subr.msk.mxu0 %vm1039_vm10, %v1021_v39  ;;  %1848 = vrot.lane.b32.xlu0 %v1847_v34, %s3439_s13 }
  0xe3   : > { %3162 = vmatpush1.msk.msra.mxu0 %vm1039_vm10, %v1020_v41  ;;  %1760 = vrot.lane.b32.xlu1 %v1759_v28, %s3440_s15  ;;  %v3962_v41 = vld [vmem:[#allocation3] sm:$0xff] }
  0xe4   : > { %v3918_v49 = vpop.permute.xlu1 %636  ;;  %v635_v50 = vpop.permute.xlu0 %634  ;;  %3163 = vmatmul.mubr.msk.f32.vlgmr.msra.gmra.mrb[0].mxu0 %vm4568_vm11, %v3906_v14  ;;  %3247 = vmatprep.subr.bf16.mxu0 %v3246_v46 }
  0xe5   : > { %v647_v54 = vsel %vm4574_vm1, %v3868_v51, %v635_v50  ;;  %v648_v56 = vsel %vm4574_vm1, %v635_v50, %v3918_v49  ;;  %3249 = vmatpush1.bf16.msra.mxu0 %v3248_v48  ;;  %1273 = vmatprep.mubr.f32.mxu0 %v3416_v13  ;;  %v991_v32 = vld [vmem:[#allocation2 + $0x38] sm:$0xff]  ;;  %v990_v34 = vld [vmem:[#allocation2 + $0x30] sm:$0xff] }
  0xe6   : > { %665 = vst [vmem:[#allocation2 + $0x78] sm:$0xf0] %v647_v54  ;;  %666 = vst [vmem:[#allocation2 + $0x80] sm:$0xf0] %v648_v56  ;;  %1861 = vrot.lane.b32.xlu0 %v1860_v53, %s3441_s16 }
  0xe8   : > { %v696_v3 = vpop.permute.xlu1 %695  ;;  %v694_v58 = vpop.permute.xlu0 %693 }
  0xe9   : > { %v708_v51 = vsel %vm4573_vm3, %v3771_v62, %v694_v58  ;;  %v709_v60 = vsel %vm4573_vm3, %v694_v58, %v696_v3 }
  0xea   : > { %726 = vst [vmem:[#allocation2 + $0xb0] sm:$0xf] %v708_v51  ;;  %727 = vst [vmem:[#allocation2 + $0xb8] sm:$0xf] %v709_v60  ;;  %1918 = vrot.lane.b32.xlu0 %v1917_v59, %s3415_s10 }
  0xec   : > { %v759_v13 = vpop.permute.xlu1 %758  ;;  %v757_v61 = vpop.permute.xlu0 %756 }
  0xed   : > { %v771_v63 = vsel %vm4572_vm4, %v3790_v22, %v757_v61  ;;  %v772_v1 = vsel %vm4572_vm4, %v757_v61, %v759_v13  ;;  %v1000_v23 = vld [vmem:[#allocation2 + $0x80] sm:$0xff]  ;;  %v999_v26 = vld [vmem:[#allocation2 + $0x78] sm:$0xff] }
  0xee   : > { %789 = vst [vmem:[#allocation2 + $0xb0] sm:$0xf0] %v771_v63  ;;  %790 = vst [vmem:[#allocation2 + $0xb8] sm:$0xf0] %v772_v1  ;;  %v3254_v33 = vpack.c.bf16 %v1000_v23, %v991_v32  ;;  %v3256_v35 = vpack.c.bf16 %v999_v26, %v990_v34  ;;  %v1765_v23 = vld [vmem:[%s3728_s14 + $0x15] sm:$0x1] }
  0xf0   : > { %v822_v2 = vpop.permute.xlu1 %821  ;;  %v820_v5 = vpop.permute.xlu0 %819 }
  0xf1   : > { %v834_v62 = vsel %vm4571_vm5, %v3805_v40, %v820_v5  ;;  %v835_v6 = vsel %vm4571_vm5, %v820_v5, %v822_v2 }
  0xf2   : > { %852 = vst [vmem:[#allocation2 + $0xf8] sm:$0xf] %v834_v62  ;;  %853 = vst [vmem:[#allocation2 + $0x100] sm:$0xf] %v835_v6  ;;  %v3442_v6 = vmov 0.0|0.0  }
  0xf4   : > { %v885_v7 = vpop.permute.xlu1 %884  ;;  %v883_v8 = vpop.permute.xlu0 %882 }
  0xf5   : > { %v897_v9 = vsel %vm4570_vm6, %v3822_v52, %v883_v8  ;;  %v898_v22 = vsel %vm4570_vm6, %v883_v8, %v885_v7  ;;  %v1007_v16 = vld [vmem:[#allocation2 + $0xb8] sm:$0xff]  ;;  %v1006_v19 = vld [vmem:[#allocation2 + $0xb0] sm:$0xff] }
  0xf6   : > { %915 = vst [vmem:[#allocation2 + $0xf8] sm:$0xf0] %v897_v9  ;;  %916 = vst [vmem:[#allocation2 + $0x100] sm:$0xf0] %v898_v22 }
  0xf8   : > { %v944_v10 = vpop.permute.xlu1 %943  ;;  %v942_v37 = vpop.permute.xlu0 %941 }
  0xf9   : > { %v958_v11 = vsel %vm4569_vm9, %v3878_v4, %v942_v37  ;;  %v959_v40 = vsel %vm4569_vm9, %v942_v37, %v944_v10 }
  0xfa   : > { %976 = vst [vmem:[#allocation2 + $0x130] sm:$0xf] %v958_v11  ;;  %977 = vst [vmem:[#allocation2 + $0x138] sm:$0xf] %v959_v40 }
  0xfc   : > { %v3946_v12 = vpop.permute.xlu1 %699  ;;  %v698_v15 = vpop.permute.xlu0 %697 }
  0xfd   : > { %v710_v55 = vsel %vm4573_vm3, %v696_v3, %v698_v15  ;;  %v711_v52 = vsel %vm4573_vm3, %v698_v15, %v3946_v12  ;;  %v1016_v18 = vld [vmem:[#allocation2 + $0x100] sm:$0xff]  ;;  %v1015_v20 = vld [vmem:[#allocation2 + $0xf8] sm:$0xff] }
  0xfe   : > { %728 = vst [vmem:[#allocation2 + $0xc0] sm:$0xf] %v710_v55  ;;  %729 = vst [vmem:[#allocation2 + $0xc8] sm:$0xf] %v711_v52  ;;  %v3250_v21 = vpack.c.bf16 %v1016_v18, %v1007_v16  ;;  %v3252_v4 = vpack.c.bf16 %v1015_v20, %v1006_v19 }
 0x100   : > { %v3951_v24 = vpop.permute.xlu1 %762  ;;  %v761_v25 = vpop.permute.xlu0 %760  ;;  %3251 = vmatprep.subr.bf16.mxu0 %v3250_v21 }
 0x101   : > { %v773_v42 = vsel %vm4572_vm4, %v759_v13, %v761_v25  ;;  %v774_v27 = vsel %vm4572_vm4, %v761_v25, %v3951_v24  ;;  %3253 = vmatpush1.bf16.msra.mxu0 %v3252_v4  ;;  %v1023_v29 = vld [vmem:[#allocation2 + $0x138] sm:$0xf]  ;;  %v1022_v30 = vld [vmem:[#allocation2 + $0x130] sm:$0xf]  ;;  %v1769_v25 = vrot.slane %v1765_v23, 6 }
 0x102   : > { %791 = vst [vmem:[#allocation2 + $0xc0] sm:$0xf0] %v773_v42  ;;  %792 = vst [vmem:[#allocation2 + $0xc8] sm:$0xf0] %v774_v27  ;;  %3164 = vmatprep.subr.msk.mxu1 %vm1039_vm10, %v1023_v29  ;;  %v1936_v42 = vld [vmem:[%s3728_s14 + $0x21] sm:$0x1] }
 0x103   : > { %3165 = vmatpush1.msk.msra.mxu1 %vm1039_vm10, %v1022_v30  ;;  %v1937_v27 = vld [vmem:[%s3728_s14 + $0x49] sm:$0x1]  ;;  %v1940_v29 = vrot.slane %v1936_v42, 6 }
 0x104   : > { %v826_v36 = vpop.permute.xlu1 %825  ;;  %v824_v0 = vpop.permute.xlu0 %823  ;;  %3166 = vmatmul.mubr.msk.f32.vlgmr.msra.gmra.mrb[0].mxu1 %vm4568_vm11, %v3906_v14  ;;  %3255 = vmatprep.subr.bf16.mxu1 %v3254_v33  ;;  %v1941_v30 = vrot.slane %v1937_v27, 5  ;;  %v1796_v33 = vld [vmem:[%s3728_s14 + $0x17] sm:$0x1] }
 0x105   : > { %v836_v38 = vsel %vm4571_vm5, %v822_v2, %v824_v0  ;;  %v837_v39 = vsel %vm4571_vm5, %v824_v0, %v826_v36  ;;  %3257 = vmatpush1.bf16.msra.mxu1 %v3256_v35  ;;  %1344 = vmatprep.mubr.f32.mxu1 %v3962_v41  ;;  %v1800_v0 = vrot.slane %v1796_v33, 6 }
 0x106   : > { %854 = vst [vmem:[#allocation2 + $0x108] sm:$0xf] %v836_v38  ;;  %855 = vst [vmem:[#allocation2 + $0x110] sm:$0xf] %v837_v39  ;;  %v1942_v35 = vsel %vm1497_vm7, %v1941_v30, %v1940_v29 }
 0x108   : > { %v889_v43 = vpop.permute.xlu1 %888  ;;  %v887_v44 = vpop.permute.xlu0 %886 }
 0x109   : > { %v899_v45 = vsel %vm4570_vm6, %v885_v7, %v887_v44  ;;  %v900_v46 = vsel %vm4570_vm6, %v887_v44, %v889_v43  ;;  %v1009_v53 = vld [vmem:[#allocation2 + $0xc8] sm:$0xff]  ;;  %v1008_v59 = vld [vmem:[#allocation2 + $0xc0] sm:$0xff]  ;;  %v1879_v44 = vld [vmem:[%s3728_s14 + $0x1d] sm:$0x1] }
 0x10a   : > { %917 = vst [vmem:[#allocation2 + $0x108] sm:$0xf0] %v899_v45  ;;  %918 = vst [vmem:[#allocation2 + $0x110] sm:$0xf0] %v900_v46  ;;  %v1880_v45 = vld [vmem:[%s3728_s14 + $0x45] sm:$0x1] }
 0x10b   : > { %v1883_v46 = vrot.slane %v1879_v44, 6 }
 0x10c   : > { %v948_v47 = vpop.permute.xlu1 %947  ;;  %v946_v48 = vpop.permute.xlu0 %945 }
 0x10d   : > { %v960_v28 = vsel %vm4569_vm9, %v944_v10, %v946_v48  ;;  %v961_v50 = vsel %vm4569_vm9, %v946_v48, %v948_v47  ;;  %v1866_v48 = vld [vmem:[%s3728_s14 + $0x1c] sm:$0x1] }
 0x10e   : > { %978 = vst [vmem:[#allocation2 + $0x140] sm:$0xf] %v960_v28  ;;  %979 = vst [vmem:[#allocation2 + $0x148] sm:$0xf] %v961_v50  ;;  %v1867_v28 = vld [vmem:[%s3728_s14 + $0x44] sm:$0x1] }
 0x10f   : > { %v1870_v50 = vrot.slane %v1866_v48, 6 }
 0x110   : > { %v576_v54 = vpop.permute.xlu1 %575  ;;  %v513_v56 = vpop.permute.xlu0 %512 }
 0x111   : > { %v586_v57 = vsel %vm4576_vm0, %v3901_v31, %v576_v54  ;;  %v523_v3 = vsel %vm4575_vm2, %v3891_v17, %v513_v56  ;;  %v1018_v58 = vld [vmem:[#allocation2 + $0x110] sm:$0xff]  ;;  %v1017_v51 = vld [vmem:[#allocation2 + $0x108] sm:$0xff]  ;;  %v1897_v54 = vld [vmem:[%s3728_s14 + $0x1e] sm:$0x1]  ;;  %vm1836_vm2 = vcmask 1044234   ;;  %vm1837_vm0 = vcmask 7174  }
 0x112   : > { %604 = vst [vmem:[#allocation2 + $0x88] sm:$0xf] %v586_v57  ;;  %541 = vst [vmem:[#allocation2 + $0x40] sm:$0xf0] %v523_v3  ;;  %v3258_v60 = vpack.c.bf16 %v1018_v58, %v1009_v53  ;;  %v3260_v13 = vpack.c.bf16 %v1017_v51, %v1008_v59  ;;  %v1871_v53 = vrot.slane %v1867_v28, 5  ;;  %v1901_v3 = vrot.slane %v1897_v54, 6 }
 0x113   : > { %v1898_v56 = vld [vmem:[%s3728_s14 + $0x46] sm:$0x1] }
 0x114   : > { %v950_v61 = vpop.permute.xlu1 %949  ;;  %v639_v63 = vpop.permute.xlu0 %638  ;;  %3259 = vmatprep.subr.bf16.mxu1 %v3258_v60  ;;  %v1902_v58 = vrot.slane %v1898_v56, 5  ;;  %v1872_v51 = vsel %vm1497_vm7, %v1871_v53, %v1870_v50 }
 0x115   : > { %v962_v1 = vsel %vm4569_vm9, %v948_v47, %v950_v61  ;;  %v649_v2 = vsel %vm4574_vm1, %v3918_v49, %v639_v63  ;;  %3261 = vmatpush1.bf16.msra.mxu1 %v3260_v13  ;;  %v1025_v31 = vld [vmem:[#allocation2 + $0x148] sm:$0xf]  ;;  %v1024_v5 = vld [vmem:[#allocation2 + $0x140] sm:$0xf]  ;;  %v1884_v47 = vrot.slane %v1880_v45, 5  ;;  %v1873_v60 = vsel %vm1499_vm8, %v1871_v53, %v1872_v51 }
 0x116   : > { %980 = vst [vmem:[#allocation2 + $0x150] sm:$0xf] %v962_v1  ;;  %667 = vst [vmem:[#allocation2 + $0x88] sm:$0xf0] %v649_v2  ;;  %3167 = vmatprep.subr.msk.mxu0 %vm1039_vm10, %v1025_v31  ;;  %v1903_v13 = vsel %vm1497_vm7, %v1902_v58, %v1901_v3  ;;  %v1923_v63 = vld [vmem:[%s3728_s14 + $0x20] sm:$0x1] }
 0x117   : > { %3168 = vmatpush1.msk.msra.mxu0 %vm1039_vm10, %v1024_v5  ;;  %v1885_v57 = vsel %vm1497_vm7, %v1884_v47, %v1883_v46  ;;  %v1924_v1 = vld [vmem:[%s3728_s14 + $0x48] sm:$0x1]  ;;  %v1927_v2 = vrot.slane %v1923_v63, 6  ;;  %vm1833_vm1 = vcmask 769024  }
 0x118   : > { %v702_v17 = vpop.permute.xlu1 %701  ;;  %v952_v62 = vpop.permute.xlu0 %951  ;;  %3169 = vmatmul.mubr.msk.f32.vlgmr.msra.gmra.mrb[2].mxu0 %vm4568_vm11, %v3906_v14  ;;  %3262 = vmatprep.subr.bf16.mxu0 %v3442_v6  ;;  %v1886_v59 = vsel %vm1499_vm8, %v1884_v47, %v1885_v57  ;;  %v1928_v31 = vrot.slane %v1924_v1, 5 }
 0x119   : > { %v712_v49 = vsel %vm4573_vm3, %v3946_v12, %v702_v17  ;;  %v963_v7 = vsel %vm4569_vm9, %v950_v61, %v952_v62  ;;  %3214 = vmatprep.mubr.msk.f32.mxu0 %vm4567_vm12, %v3962_v41  ;;  %v992_v37 = vld [vmem:[#allocation2 + $0x40] sm:$0xff]  ;;  %v1904_v61 = vsel %vm1499_vm8, %v1902_v58, %v1903_v13  ;;  %vm1533_vm12 = vcmask 1044330  }
 0x11a   : > { %730 = vst [vmem:[#allocation2 + $0xd0] sm:$0xf] %v712_v49  ;;  %981 = vst [vmem:[#allocation2 + $0x158] sm:$0xf] %v963_v7  ;;  %v1929_v5 = vsel %vm1497_vm7, %v1928_v31, %v1927_v2  ;;  %vm1574_vm3 = vcmask 986826  }
 0x11b   : > { %v1930_v17 = vsel %vm1499_vm8, %v1928_v31, %v1929_v5 }
 0x11c   : > { %v828_v8 = vpop.permute.xlu1 %827  ;;  %v765_v9 = vpop.permute.xlu0 %764 }
 0x11d   : > { %v838_v22 = vsel %vm4571_vm5, %v826_v36, %v828_v8  ;;  %v775_v10 = vsel %vm4572_vm4, %v3951_v24, %v765_v9  ;;  %v1001_v11 = vld [vmem:[#allocation2 + $0x88] sm:$0xff]  ;;  %v1026_v15 = vld [vmem:[#allocation2 + $0x150] sm:$0xf]  ;;  %v1766_v24 = vld [vmem:[%s3728_s14 + $0x3d] sm:$0x1]  ;;  %v1943_v36 = vsel %vm1499_vm8, %v1941_v30, %v1942_v35  ;;  %vm1591_vm5 = vcmask 236550  }
 0x11e   : > { %856 = vst [vmem:[#allocation2 + $0x118] sm:$0xf] %v838_v22  ;;  %793 = vst [vmem:[#allocation2 + $0xd0] sm:$0xf0] %v775_v10  ;;  %v3263_v40 = vpack.c.bf16 %v1001_v11, %v992_v37  ;;  %v1770_v26 = vrot.slane %v1766_v24, 5  ;;  %1944 = vrot.lane.b32.xlu0 %v1943_v36, %s3408_s27  ;;  %vm1561_vm4 = vcmask 691626  }
 0x120   : > { %v891_v12 = vpop.permute.xlu0 %890  ;;  %3264 = vmatpush3.bf16.msra.mxu0 %v3263_v40  ;;  %v954_v16 = vpop.permute.xlu1 %953  ;;  %v1771_v32 = vsel %vm1497_vm7, %v1770_v26, %v1769_v25 }
 0x121   : > { %v901_v55 = vsel %vm4570_vm6, %v889_v43, %v891_v12  ;;  %v1027_v52 = vld [vmem:[#allocation2 + $0x158] sm:$0xf]  ;;  %v964_v18 = vsel %vm4569_vm9, %v952_v62, %v954_v16  ;;  %3265 = vmatprep.subr.bf16.mxu0 %v3442_v6  ;;  %v1772_v34 = vsel %vm1499_vm8, %v1770_v26, %v1771_v32  ;;  %vm1587_vm9 = vcmask 998400  }
 0x122   : > { %919 = vst [vmem:[#allocation2 + $0x118] sm:$0xf0] %v901_v55  ;;  %3170 = vmatprep.subr.msk.mxu1 %vm1039_vm10, %v1027_v52  ;;  %982 = vst [vmem:[#allocation2 + $0x160] sm:$0xf] %v964_v18  ;;  %1773 = vrot.lane.b32.xlu1 %v1772_v34, %s3444_s17  ;;  %vm1590_vm6 = vcmask 1044458   ;;  %v272_v55 = vlaneseq }
 0x123   : > { %3171 = vmatpush1.msk.msra.mxu1 %vm1039_vm10, %v1026_v15 }
 0x124   : > { %3172 = vmatmul.mubr.msk.f32.vlgmr.msra.gmra.mrb[2].mxu1 %vm4568_vm11, %v3906_v14  ;;  %v1528_v9 = vpop.permute.xlu1 %1527 }
 0x125   : > { %2617 = vmatprep.mubr.f32.mxu1 %v3962_v41  ;;  %v1010_v19 = vld [vmem:[#allocation2 + $0xd0] sm:$0xff]  ;;  %v1529_v10 = vrot.slane %v1528_v9, 4 }
 0x127   : > { %v1531_v40 = vsel %vm1530_vm13, %v1529_v10, %v1528_v9  ;;  %vm1592_vm13 = vmor %vm1591_vm5, %vm1590_vm6  ;;  %vm1618_vm5 = vcmask 822826   ;;  %vm1662_vm6 = vcmask 658826  }
 0x128   : > { %v1502_v37 = vpop.permute.xlu1 %1501 }
 0x129   : > { %v1019_v20 = vld [vmem:[#allocation2 + $0x118] sm:$0xff]  ;;  %v1028_v4 = vld [vmem:[#allocation2 + $0x160] sm:$0xf]  ;;  %1505 = vst.msk [vmem:[#allocation3] sm:$0xc] %vm1504_vm14, %v1502_v37  ;;  %vm1434_vm14 = vcmask 883716  }
 0x12a   : > { %v3266_v21 = vpack.c.bf16 %v1019_v20, %v1010_v19  ;;  %v4035_v20 = vand.u32 127, %v272_v55 }
 0x12c   : > { %3267 = vmatpush3.bf16.msra.mxu0 %v3266_v21  ;;  %v274_v24 = vadd.s32 128, %v4035_v20  ;;  %v4041_v27 = vmul.u32.u64.low 3817748708, %v4035_v20  ;;  %v4042_v29 = vmul.u32.u64.high 3817748708, %v4035_v20, %v4041_v27  ;;  %v275_v5 = vadd.s32 256, %v4035_v20 }
 0x12d   : > { %3212 = vmatprep.subr.mxu0 %v3962_v41  ;;  %v1546_v15 = vpop.permute.xlu1 %1545 }
 0x12e   : > { %v4044_v30 = vmul.u32.u64.low 3817748708, %v274_v24  ;;  %v4045_v32 = vmul.u32.u64.high 3817748708, %v274_v24, %v4044_v30 }
 0x12f   : > { %v277_v30 = vadd.s32 512, %v4035_v20 }
 0x130   : > { %3213 = vmatpush3.msk.msra.mxu0 %vm1039_vm10, %v1028_v4 }
 0x131   : > { %3215 = vmatmul.mubr.msk.f32.vlgmr.msra.gmra.mrb[4].mxu0 %vm4568_vm11, %v3906_v14  ;;  %v1797_v14 = vld [vmem:[%s3728_s14 + $0x3f] sm:$0x1]  ;;  %v4032_v62 = vpop.permute.xlu0 %1032  ;;  %v1559_v18 = vpop.permute.xlu1 %1558  ;;  %s3449_s14 = smov 37  }
 0x132   : > { %2688 = vmatprep.mubr.f32.mxu0 %v3962_v41  ;;  %v1801_v38 = vrot.slane %v1797_v14, 5 }
 0x134   : > { %v1802_v39 = vsel %vm1497_vm7, %v1801_v38, %v1800_v0  ;;  %vm1534_vm7 = vcmask 105478  }
 0x135   : > { %v1803_v43 = vsel %vm1499_vm8, %v1801_v38, %v1802_v39  ;;  %v1515_v49 = vpop.permute.xlu0 %1514  ;;  %vm1535_vm11 = vmor %vm1534_vm7, %vm1533_vm12  ;;  %vm1548_vm8 = vcmask 396426   ;;  %vm1605_vm12 = vcmask 527626   ;;  %v1629_v21 = vpop.permute.xlu1 %1628  ;;  %vm1635_vm7 = vcmask 72710  }
 0x136   : > { %1804 = vrot.lane.b32.xlu1 %v1803_v43, %s3445_s18  ;;  %1518 = vst.msk [vmem:[#allocation3] sm:$0xc] %vm1517_vm15, %v1515_v49  ;;  %vm1631_vm15 = vcmask 834560   ;;  %v1630_v23 = vrot.slane %v1629_v21, 4  ;;  %v288_v39 = vshrl.u32 %v4042_v29, 5  ;;  %v299_v43 = vshrl.u32 %v4045_v32, 5 }
 0x137   : > { %1536 = vst.msk [vmem:[#allocation3] sm:$0xcc] %vm1535_vm11, %v1531_v40  ;;  %vm1634_vm11 = vcmask 1044298  }
 0x138   : > { %1549 = vst.msk [vmem:[#allocation3 + $0x4] sm:$0xc] %vm1548_vm8, %v1546_v15  ;;  %vm1435_vm8 = vmor %vm1434_vm14, %vm1039_vm10  ;;  %v1632_v25 = vsel %vm1631_vm15, %v1630_v23, %v1629_v21  ;;  %vm1675_vm14 = vcmask 954026   ;;  %v289_v47 = vmul.u32 36, %v288_v39  ;;  %v300_v48 = vmul.u32 36, %v299_v43 }
 0x139   : > { %v1585_v7 = vpop.permute.xlu0 %1584  ;;  %1562 = vst.msk [vmem:[#allocation3 + $0x4] sm:$0xc] %vm1561_vm4, %v1559_v18  ;;  %v1616_v26 = vpop.permute.xlu1 %1615  ;;  %vm1649_vm4 = vcmask 363626  }
 0x13a   : > { %1887 = vrot.lane.b32.xlu1 %v1886_v59, %s3446_s19  ;;  %v1586_v12 = vrot.slane %v1585_v7, 4  ;;  %1436 = vst.msk [vmem:[#allocation3 + $0x20] sm:$0xff] %vm1435_vm8, %v3962_v41  ;;  %vm1736_vm8 = vcmask 39942   ;;  %v290_v53 = vsub.s32 %v4035_v20, %v289_v47  ;;  %v301_v54 = vsub.s32 %v274_v24, %v300_v48 }
 0x13b   : > { %v279_v48 = vadd.s32 768, %v4035_v20 }
 0x13c   : > { %v1588_v52 = vsel %vm1587_vm9, %v1586_v12, %v1585_v7  ;;  %vm1688_vm9 = vcmask 965632   ;;  %v408_v58 = vadd.s32 36, %v290_v53  ;;  %v276_v7 = vadd.s32 384, %v4035_v20 }
 0x13d   : > { %v1572_v8 = vpop.permute.xlu0 %1571  ;;  %v1686_v33 = vpop.permute.xlu1 %1685 }
 0x13e   : > { %1874 = vrot.lane.b32.xlu1 %v1873_v60, %s3447_s20  ;;  %1575 = vst.msk [vmem:[#allocation3 + $0x4] sm:$0xc] %vm1574_vm3, %v1572_v8  ;;  %vm1636_vm3 = vmor %vm1635_vm7, %vm1634_vm11  ;;  %v1687_v35 = vrot.slane %v1686_v33, 4  ;;  %vm1732_vm11 = vcmask 801792   ;;  %vm1735_vm7 = vcmask 1044266   ;;  %v409_v60 = vadd.s32 36, %v301_v54 }
 0x13f   : > { %1593 = vst.msk [vmem:[#allocation3 + $0x4] sm:$0xcc] %vm1592_vm13, %v1588_v52  ;;  %vm1691_vm13 = vcmask 1044426   ;;  %v4077_v8 = vmul.u32.u64.low 3817748708, %v275_v5  ;;  %v4078_v9 = vmul.u32.u64.high 3817748708, %v275_v5, %v4077_v8 }
 0x140   : > { %v1689_v14 = vsel %vm1688_vm9, %v1687_v35, %v1686_v33  ;;  %vm1763_vm9 = vcmask 626026   ;;  %v4087_v12 = vmul.u32.u64.low 3817748708, %v276_v7  ;;  %v4088_v15 = vmul.u32.u64.high 3817748708, %v276_v7, %v4087_v12 }
 0x141   : > { %v1603_v22 = vpop.permute.xlu0 %1602  ;;  %v1673_v0 = vpop.permute.xlu1 %1672  ;;  %v310_v23 = vshrl.u32 %v4078_v9, 5  ;;  %v278_v33 = vadd.s32 640, %v4035_v20 }
 0x142   : > { %1905 = vrot.lane.b32.xlu1 %v1904_v61, %s3448_s23  ;;  %1606 = vst.msk [vmem:[#allocation3 + $0x8] sm:$0xc] %vm1605_vm12, %v1603_v22  ;;  %vm1692_vm12 = vcmask 203782  }
 0x143   : > { %1619 = vst.msk [vmem:[#allocation3 + $0x8] sm:$0xc] %vm1618_vm5, %v1616_v26  ;;  %vm1693_vm15 = vmor %vm1692_vm12, %vm1691_vm13  ;;  %vm1706_vm5 = vcmask 494826   ;;  %vm1789_vm13 = vcmask 932864   ;;  %vm1792_vm12 = vcmask 1044394   ;;  %v311_v27 = vmul.u32 36, %v310_v23 }
 0x144   : > { %1637 = vst.msk [vmem:[#allocation3 + $0x8] sm:$0xcc] %vm1636_vm3, %v1632_v25  ;;  %vm1719_vm3 = vcmask 790026   ;;  %v321_v25 = vshrl.u32 %v4088_v15, 5 }
 0x145   : > { %v1647_v11 = vpop.permute.xlu0 %1646  ;;  %v1704_v45 = vpop.permute.xlu1 %1703  ;;  %v312_v32 = vsub.s32 %v275_v5, %v311_v27 }
 0x146   : > { %1931 = vrot.lane.b32.xlu1 %v1930_v17, %s3412_s7  ;;  %1650 = vst.msk [vmem:[#allocation3 + $0xc] sm:$0xc] %vm1649_vm4, %v1647_v11  ;;  %vm1737_vm4 = vmor %vm1736_vm8, %vm1735_vm7  ;;  %vm382_vm7 = vcmp.ne.s32.totalorder %v301_v54, 0  ;;  %vm391_vm8 = vcmp.lt.s32.totalorder %v301_v54, 0  ;;  %v322_v29 = vmul.u32 36, %v321_v25 }
 0x149   : > { %v1660_v16 = vpop.permute.xlu0 %1659  ;;  %v1748_v28 = vpop.permute.xlu1 %1747 }
 0x14a   : > { %1663 = vst.msk [vmem:[#allocation3 + $0xc] sm:$0xc] %vm1662_vm6, %v1660_v16  ;;  %vm1750_vm6 = vcmask 330826  }
 0x14b   : > { %1676 = vst.msk [vmem:[#allocation3 + $0xc] sm:$0xc] %vm1675_vm14, %v1673_v0  ;;  %vm1793_vm14 = vcmask 171014  }
 0x14c   : > { %1694 = vst.msk [vmem:[#allocation3 + $0xc] sm:$0xcc] %vm1693_vm15, %v1689_v14  ;;  %vm381_vm15 = vcmp.ne.s32.totalorder %v290_v53, 0  ;;  %v4101_v35 = vmul.u32.u64.low 3817748708, %v277_v30  ;;  %v4102_v14 = vmul.u32.u64.high 3817748708, %v277_v30, %v4101_v35 }
 0x14d   : > { %v1730_v19 = vpop.permute.xlu0 %1729  ;;  %1707 = vst.msk [vmem:[#allocation3 + $0x10] sm:$0xc] %vm1706_vm5, %v1704_v45  ;;  %vm1776_vm5 = vcmask 921226  }
 0x14e   : > { %v1731_v36 = vrot.slane %v1730_v19, 4 }
 0x150   : > { %v1733_v44 = vsel %vm1732_vm11, %v1731_v36, %v1730_v19  ;;  %vm390_vm11 = vcmp.lt.s32.totalorder %v290_v53, 0  ;;  %v4104_v36 = vmul.u32.u64.low 3817748708, %v278_v33  ;;  %v4105_v0 = vmul.u32.u64.high 3817748708, %v278_v33, %v4104_v36 }
 0x151   : > { %v1717_v4 = vpop.permute.xlu0 %1716 }
 0x152   : > { %1720 = vst.msk [vmem:[#allocation3 + $0x10] sm:$0xc] %vm1719_vm3, %v1717_v4  ;;  %vm1794_vm3 = vmor %vm1793_vm14, %vm1792_vm12  ;;  %vm1820_vm12 = vcmask 757226   ;;  %v343_v47 = vshrl.u32 %v4105_v0, 5 }
 0x153   : > { %1738 = vst.msk [vmem:[#allocation3 + $0x10] sm:$0xcc] %vm1737_vm4, %v1733_v44  ;;  %vm1947_vm4 = vcmask 265226   ;;  %vm1838_vm14 = vmor %vm1837_vm0, %vm1836_vm2  ;;  %vm1851_vm0 = vcmask 298026   ;;  %vm1890_vm2 = vcmask 900096  }
 0x154   : > { %1751 = vst.msk [vmem:[#allocation3 + $0x14] sm:$0xc] %vm1750_vm6, %v1748_v28  ;;  %vm4060_vm6 = vmand %vm390_vm11, %vm381_vm15  ;;  %v280_v28 = vadd.s32 896, %v4035_v20 }
 0x155   : > { %v1787_v42 = vpop.permute.xlu0 %1786  ;;  %v1761_v57 = vpop.permute.xlu1 %1760  ;;  %v417_v2 = vsel %vm4060_vm6, %v408_v58, %v290_v53  ;;  %vm1921_vm6 = vcmask 724426  }
 0x156   : > { %v1788_v56 = vrot.slane %v1787_v42, 4  ;;  %1764 = vst.msk [vmem:[#allocation3 + $0x14] sm:$0xc] %vm1763_vm9, %v1761_v57  ;;  %vm4065_vm9 = vmand %vm391_vm8, %vm382_vm7  ;;  %vm426_vm15 = vcmp.lt.s32.totalorder %v417_v2, 32  ;;  %vm1877_vm7 = vcmask 888426   ;;  %vm1893_vm8 = vcmask 1044362  }
 0x157   : > { %v418_v31 = vsel %vm4065_vm9, %v409_v60, %v301_v54  ;;  %v4081_v10 = vsel %vm426_vm15, 1.0, %v3962_v41  ;;  %vm383_vm9 = vcmp.ne.s32.totalorder %v312_v32, 0  ;;  %vm1934_vm15 = vcmask 1019626  }
 0x158   : > { %v1790_v59 = vsel %vm1789_vm13, %v1788_v56, %v1787_v42  ;;  %vm1807_vm13 = vcmask 462026   ;;  %vm427_vm11 = vcmp.lt.s32.totalorder %v418_v31, 32  ;;  %v344_v56 = vmul.u32 36, %v343_v47 }
 0x159   : > { %v4047_v34 = vpop.permute.xlu0 %1830  ;;  %v4084_v37 = vsel %vm427_vm11, 1.0, %v3962_v41 }
 0x15a   : > { %v1832_v13 = vrot.slane %v4047_v34, 4  ;;  %v345_v31 = vsub.s32 %v278_v33, %v344_v56 }
 0x15c   : > { %v1834_v17 = vsel %vm1833_vm1, %v1832_v13, %v4047_v34  ;;  %vm1864_vm1 = vcmask 593226   ;;  %v323_v34 = vsub.s32 %v276_v7, %v322_v29  ;;  %v281_v7 = vadd.s32 1024, %v4035_v20 }
 0x15d   : > { %v4049_v38 = vpop.permute.xlu0 %1817  ;;  %v4121_v60 = vmul.u32.u64.low 3817748708, %v280_v28  ;;  %v4122_v13 = vmul.u32.u64.high 3817748708, %v280_v28, %v4121_v60  ;;  %v413_v9 = vadd.s32 36, %v345_v31 }
 0x15e   : > { %v411_v39 = vadd.s32 36, %v323_v34 }
 0x161   : > { %v4053_v46 = vpop.permute.xlu0 %1848 }
 0x165   : > { %v4055_v50 = vpop.permute.xlu0 %1861 }
 0x169   : > { %v4058_v3 = vpop.permute.xlu0 %1918 }
 0x190   : > { %v1945_v1 = vpop.permute.xlu0 %1944 }
 0x191   : > { %1948 = vst.msk [vmem:[#allocation3 + $0x24] sm:$0xc] %vm1947_vm4, %v1945_v1  ;;  %vm1908_vm4 = vcmask 429226  }
 0x194   : > { %v1774_v61 = vpop.permute.xlu1 %1773 }
 0x195   : > { %1777 = vst.msk [vmem:[#allocation3 + $0x14] sm:$0xc] %vm1776_vm5, %v1774_v61  ;;  %vm1894_vm5 = vcmask 138246  }
 0x196   : > { %1795 = vst.msk [vmem:[#allocation3 + $0x14] sm:$0xcc] %vm1794_vm3, %v1790_v59  ;;  %vm1895_vm3 = vmor %vm1894_vm5, %vm1893_vm8  ;;  %vm386_vm5 = vcmp.ne.s32.totalorder %v345_v31, 0 }
 0x1a8   : > { %v1805_v49 = vpop.permute.xlu1 %1804 }
 0x1a9   : > { %1808 = vst.msk [vmem:[#allocation3 + $0x18] sm:$0xc] %vm1807_vm13, %v1805_v49  ;;  %vm392_vm13 = vcmp.lt.s32.totalorder %v312_v32, 0  ;;  %v365_v49 = vshrl.u32 %v4122_v13, 5 }
 0x1aa   : > { %1821 = vst.msk [vmem:[#allocation3 + $0x18] sm:$0xc] %vm1820_vm12, %v4049_v38  ;;  %vm384_vm12 = vcmp.ne.s32.totalorder %v323_v34, 0  ;;  %v410_v38 = vadd.s32 36, %v312_v32  ;;  %vm401_vm11 = vmand %vm392_vm13, %vm383_vm9 }
 0x1ab   : > { %1839 = vst.msk [vmem:[#allocation3 + $0x18] sm:$0xcc] %vm1838_vm14, %v1834_v17  ;;  %vm393_vm14 = vcmp.lt.s32.totalorder %v323_v34, 0 }
 0x1ac   : > { %v1888_v52 = vpop.permute.xlu1 %1887  ;;  %1852 = vst.msk [vmem:[#allocation3 + $0x1c] sm:$0xc] %vm1851_vm0, %v4053_v46  ;;  %vm402_vm0 = vmand %vm393_vm14, %vm384_vm12  ;;  %v419_v44 = vsel %vm401_vm11, %v410_v38, %v312_v32  ;;  %v332_v46 = vshrl.u32 %v4102_v14, 5 }
 0x1ad   : > { %v1889_v24 = vrot.slane %v1888_v52, 4  ;;  %1865 = vst.msk [vmem:[#allocation3 + $0x1c] sm:$0xc] %vm1864_vm1, %v4055_v50  ;;  %v420_v45 = vsel %vm402_vm0, %v411_v39, %v323_v34  ;;  %vm428_vm1 = vcmp.lt.s32.totalorder %v419_v44, 32 }
 0x1ae   : > { %v333_v50 = vmul.u32 36, %v332_v46  ;;  %v4112_v53 = vsel %vm428_vm1, 1.0, %v3962_v41 }
 0x1af   : > { %v1891_v26 = vsel %vm1890_vm2, %v1889_v24, %v1888_v52  ;;  %vm429_vm2 = vcmp.lt.s32.totalorder %v420_v45, 32 }
 0x1b0   : > { %v1875_v4 = vpop.permute.xlu1 %1874  ;;  %v4119_v59 = vsel %vm429_vm2, 1.0, %v3962_v41  ;;  %v334_v1 = vsub.s32 %v277_v30, %v333_v50 }
 0x1b1   : > { %1878 = vst.msk [vmem:[#allocation3 + $0x1c] sm:$0xc] %vm1877_vm7, %v1875_v4 }
 0x1b2   : > { %1896 = vst.msk [vmem:[#allocation3 + $0x1c] sm:$0xcc] %vm1895_vm3, %v1891_v26  ;;  %vm385_vm7 = vcmp.ne.s32.totalorder %v334_v1, 0  ;;  %vm394_vm8 = vcmp.lt.s32.totalorder %v334_v1, 0  ;;  %vm395_vm3 = vcmp.lt.s32.totalorder %v345_v31, 0  ;;  %v412_v8 = vadd.s32 36, %v334_v1 }
 0x1b4   : > { %v1906_v42 = vpop.permute.xlu1 %1905 }
 0x1b5   : > { %1909 = vst.msk [vmem:[#allocation3 + $0x20] sm:$0xc] %vm1908_vm4, %v1906_v42  ;;  %vm403_vm4 = vmand %vm394_vm8, %vm385_vm7 }
 0x1b6   : > { %1922 = vst.msk [vmem:[#allocation3 + $0x20] sm:$0xc] %vm1921_vm6, %v4058_v3  ;;  %v4114_v57 = vmul.u32.u64.low 3817748708, %v279_v48  ;;  %v4115_v3 = vmul.u32.u64.high 3817748708, %v279_v48, %v4114_v57  ;;  %vm404_vm6 = vmand %vm395_vm3, %vm386_vm5  ;;  %v421_v15 = vsel %vm403_vm4, %v412_v8, %v334_v1 }
 0x1b7   : > { %v1133_v22 = vpop.f32.mrb[0].mxu0  ;;  %vm430_vm9 = vcmp.lt.s32.totalorder %v421_v15, 32 }
 0x1b8   : > { %v1134_v11 = vadd.f32 %v1133_v22, %v4032_v62  ;;  %v1135_v40 = vpop.f32.mrb[1].mxu0  ;;  %v1932_v43 = vpop.permute.xlu1 %1931  ;;  %v354_v17 = vshrl.u32 %v4115_v3, 5 }
 0x1b9   : > { %v1136_v16 = vadd.f32 %v1135_v40, %v4032_v62  ;;  %1935 = vst.msk [vmem:[#allocation3 + $0x20] sm:$0xc] %vm1934_vm15, %v1932_v43  ;;  %v4131_v40 = vmul.u32.u64.low 3817748708, %v281_v7  ;;  %v4132_v12 = vmul.u32.u64.high 3817748708, %v281_v7, %v4131_v40 }
 0x1ba   : > { %v1421_v18 = vmul.f32 %v4081_v10, %v1134_v11  ;;  %v355_v22 = vmul.u32 36, %v354_v17  ;;  %v366_v11 = vmul.u32 36, %v365_v49 }
 0x1bb   : > { %v1422_v19 = vmul.f32 %v4084_v37, %v1136_v16  ;;  %v422_v16 = vsel %vm404_vm6, %v413_v9, %v345_v31  ;;  %v376_v24 = vshrl.u32 %v4132_v12, 5  ;;  %vm1480_vm6 = vcmask 1041704  }
 0x1bc   : > { %v356_v52 = vsub.s32 %v279_v48, %v355_v22  ;;  %vm431_vm13 = vcmp.lt.s32.totalorder %v422_v16, 32 }
 0x1bd   : > { %v1446_v21 = vcombine.low %v1421_v18, %v1422_v19  ;;  %v367_v18 = vsub.s32 %v280_v28, %v366_v11  ;;  %v4135_v19 = vsel %vm430_vm9, 1.0, %v3962_v41  ;;  %v4138_v20 = vsel %vm431_vm13, 1.0, %v3962_v41 }
 0x1be   : > { %vm387_vm12 = vcmp.ne.s32.totalorder %v356_v52, 0  ;;  %vm396_vm14 = vcmp.lt.s32.totalorder %v356_v52, 0  ;;  %v414_v26 = vadd.s32 36, %v356_v52  ;;  %v377_v30 = vmul.u32 36, %v376_v24 }
 0x1bf   : > { %1450 = vrot.lane.b32.xlu0 %v1446_v21, %s3449_s14  ;;  %vm388_vm15 = vcmp.ne.s32.totalorder %v367_v18, 0  ;;  %vm397_vm11 = vcmp.lt.s32.totalorder %v367_v18, 0  ;;  %vm405_vm0 = vmand %vm396_vm14, %vm387_vm12  ;;  %v415_v27 = vadd.s32 36, %v367_v18  ;;  %vm1481_vm9 = vcmask 1045508  }
 0x1c0   : > { %vm406_vm1 = vmand %vm397_vm11, %vm388_vm15  ;;  %v423_v33 = vsel %vm405_vm0, %v414_v26, %v356_v52  ;;  %v378_v35 = vsub.s32 %v281_v7, %v377_v30  ;;  %vm1465_vm13 = vcmask 302080   ;;  %vm1487_vm14 = vcmask 1041408  }
 0x1c1   : > { %v424_v34 = vsel %vm406_vm1, %v415_v27, %v367_v18  ;;  %vm432_vm2 = vcmp.lt.s32.totalorder %v423_v33, 32  ;;  %vm1482_vm12 = vmor %vm1481_vm9, %vm1480_vm6  ;;  %vm1488_vm15 = vcmask 300036   ;;  %vm4581_vm0 = vcmask 1031168  }
 0x1c2   : > { %vm433_vm7 = vcmp.lt.s32.totalorder %v424_v34, 32  ;;  %v4147_v14 = vsel %vm432_vm2, 1.0, %v3962_v41  ;;  %vm389_vm8 = vcmp.ne.s32.totalorder %v378_v35, 0  ;;  %vm398_vm5 = vcmp.lt.s32.totalorder %v378_v35, 0  ;;  %vm1489_vm11 = vmor %vm1488_vm15, %vm1487_vm14 }
 0x1c3   : > { %v4151_v38 = vsel %vm433_vm7, 1.0, %v3962_v41  ;;  %v416_v45 = vadd.s32 36, %v378_v35  ;;  %vm407_vm3 = vmand %vm398_vm5, %vm389_vm8  ;;  %vm4583_vm2 = vcmask 1039360   ;;  %vm4584_vm7 = vcmask 752640  }
 0x1c4   : > { %vm4582_vm1 = vmmov %vm4581_vm0  ;;  %vm4585_vm8 = vcmask 744448   ;;  %vm4590_vm9 = vcmask 449536  }
 0x1c5   : > { %v425_v48 = vsel %vm407_vm3, %v416_v45, %v378_v35  ;;  %vm4586_vm5 = vmmov %vm4585_vm8  ;;  %vm4587_vm3 = vcmask 736256  }
 0x1c6   : > { %vm434_vm4 = vcmp.lt.s32.totalorder %v425_v48, 32  ;;  %vm4593_vm15 = vmmov %vm4587_vm3 }
 0x1c7   : > { %v4158_v28 = vsel %vm434_vm4, 1.0, %v3962_v41  ;;  %vm4588_vm4 = vcmask 457728  }
 0x1c8   : > { %vm4589_vm6 = vmmov %vm4588_vm4 }
 0x1d7   : > { %v1204_v54 = vpop.f32.mrb[0].mxu1 }
 0x1d8   : > { %v1205_v58 = vadd.f32 %v1204_v54, %v4032_v62  ;;  %v1206_v51 = vpop.f32.mrb[1].mxu1 }
 0x1d9   : > { %v1207_v61 = vadd.f32 %v1206_v51, %v4032_v62 }
 0x1da   : > { %v1423_v63 = vmul.f32 %v4112_v53, %v1205_v58 }
 0x1db   : > { %v1424_v2 = vmul.f32 %v4119_v59, %v1207_v61 }
 0x1dd   : > { %v1447_v5 = vcombine.low %v1423_v63, %v1424_v2 }
 0x1df   : > { %1452 = vrot.lane.b32.xlu1 %v1447_v5, %s3449_s14 }
 0x1eb   : > { %v1275_v21 = vpop.f32.mrb[2].mxu0 }
 0x1ec   : > { %v1276_v4 = vadd.f32 %v1275_v21, %v4032_v62  ;;  %v1277_v23 = vpop.f32.mrb[3].mxu0 }
 0x1ed   : > { %v1278_v25 = vadd.f32 %v1277_v23, %v4032_v62 }
 0x1ee   : > { %v1425_v42 = vmul.f32 %v4135_v19, %v1276_v4 }
 0x1ef   : > { %v1426_v29 = vmul.f32 %v4138_v20, %v1278_v25 }
 0x1f1   : > { %v1448_v32 = vcombine.low %v1425_v42, %v1426_v29 }
 0x1f3   : > { %1454 = vrot.lane.b32.xlu0 %v1448_v32, %s3449_s14 }
 0x1f7   : > { %v1346_v36 = vpop.f32.mrb[2].mxu1 }
 0x1f8   : > { %v1347_v0 = vadd.f32 %v1346_v36, %v4032_v62  ;;  %v1348_v39 = vpop.f32.mrb[3].mxu1 }
 0x1f9   : > { %v1349_v43 = vadd.f32 %v1348_v39, %v4032_v62 }
 0x1fa   : > { %v1427_v44 = vmul.f32 %v4147_v14, %v1347_v0 }
 0x1fb   : > { %v1428_v46 = vmul.f32 %v4151_v38, %v1349_v43 }
 0x1fd   : > { %v1449_v47 = vcombine.low %v1427_v44, %v1428_v46 }
 0x1ff   : > { %1456 = vrot.lane.b32.xlu1 %v1449_v47, %s3449_s14 }
 0x204   : > { %v1417_v50 = vpop.f32.mrb[4].mxu0 }
 0x205   : > { %v1418_v54 = vadd.f32 %v1417_v50, %v4032_v62  ;;  %v3216_v56 = vpop.f32.mrb[5].mxu0 }
 0x207   : > { %v1429_v57 = vmul.f32 %v4158_v28, %v1418_v54 }
 0x209   : > { %1458 = vrot.lane.b32.xlu0 %v1429_v57, %s3449_s14 }
 0x231   : > { %v1451_v3 = vpop.permute.xlu0 %1450 }
 0x232   : > { %v1460_v58 = vrot.slane %v1451_v3, 4 }
 0x234   : > { %v1466_v51 = vsel %vm1465_vm13, %v1460_v58, %v1451_v3 }
 0x235   : > { %1483 = vst.msk [vmem:[#allocation3] sm:$0x33] %vm1482_vm12, %v1466_v51 }
 0x23c   : > { %v1949_v60 = vld [vmem:[#allocation3] sm:$0xff] }
 0x23d   : > { %v1958_v13 = vcombine.high %v1949_v60, %v1949_v60  ;;  %1966 = vst [vmem:[#allocation4] sm:$0xf] %v1949_v60  ;;  %2052 = vrot.lane.b32.xlu0 %v1949_v60, %s3408_s27  ;;  %1992 = vrot.lane.b32.xlu1 %v1949_v60, %s3409_s28  ;;  %v1985_v8 = vcombine.low %v1949_v60, %v1949_v60 }
 0x23f   : > { %1967 = vst [vmem:[#allocation4 + $0x8] sm:$0xf] %v1958_v13 }
 0x241   : > { %2240 = vrot.lane.b32.xlu0 %v1949_v60, %s3412_s7  ;;  %2116 = vrot.lane.b32.xlu1 %v1949_v60, %s3410_s29 }
 0x245   : > { %2364 = vrot.lane.b32.xlu0 %v1949_v60, %s3414_s9 }
 0x249   : > { %2176 = vrot.lane.b32.xlu0 %v1949_v60, %s3411_s30 }
 0x24d   : > { %2300 = vrot.lane.b32.xlu0 %v1949_v60, %s3413_s8 }
 0x251   : > { %v1453_v62 = vpop.permute.xlu1 %1452  ;;  %2424 = vrot.lane.b32.xlu0 %v1949_v60, %s3415_s10 }
 0x252   : > { %v1461_v61 = vrot.slane %v1453_v62, 4 }
 0x254   : > { %v1467_v63 = vsel %vm1039_vm10, %v1460_v58, %v1461_v61 }
 0x255   : > { %v1468_v1 = vsel %vm1465_vm13, %v1467_v63, %v1453_v62 }
 0x256   : > { %1484 = vst [vmem:[#allocation3 + $0x8] sm:$0x33] %v1468_v1 }
 0x25d   : > { %v1950_v2 = vld [vmem:[#allocation3 + $0x8] sm:$0xff] }
 0x25e   : > { %v1959_v31 = vcombine.high %v1950_v2, %v1950_v2  ;;  %1968 = vst [vmem:[#allocation4 + $0x10] sm:$0xf] %v1950_v2  ;;  %2056 = vrot.lane.b32.xlu0 %v1950_v2, %s3408_s27  ;;  %2180 = vrot.lane.b32.xlu1 %v1950_v2, %s3411_s30  ;;  %v1986_v52 = vcombine.low %v1950_v2, %v1950_v2 }
 0x260   : > { %1969 = vst [vmem:[#allocation4 + $0x18] sm:$0xf] %v1959_v31 }
 0x262   : > { %1996 = vrot.lane.b32.xlu0 %v1950_v2, %s3409_s28  ;;  %2304 = vrot.lane.b32.xlu1 %v1950_v2, %s3413_s8 }
 0x265   : > { %v1455_v5 = vpop.permute.xlu0 %1454 }
 0x266   : > { %v1462_v17 = vrot.slane %v1455_v5, 4  ;;  %2120 = vrot.lane.b32.xlu0 %v1950_v2, %s3410_s29  ;;  %2428 = vrot.lane.b32.xlu1 %v1950_v2, %s3415_s10 }
 0x268   : > { %v1469_v49 = vsel %vm1039_vm10, %v1461_v61, %v1462_v17 }
 0x269   : > { %v1470_v7 = vsel %vm1465_vm13, %v1469_v49, %v1455_v5 }
 0x26a   : > { %1485 = vst [vmem:[#allocation3 + $0x10] sm:$0x33] %v1470_v7  ;;  %2244 = vrot.lane.b32.xlu0 %v1950_v2, %s3412_s7  ;;  %2054 = vrot.lane.b32.xlu1 %v1958_v13, %s3408_s27 }
 0x26e   : > { %2368 = vrot.lane.b32.xlu0 %v1950_v2, %s3414_s9  ;;  %1990 = vrot.lane.b32.xlu1 %v1985_v8, %s3409_s28 }
 0x271   : > { %v1951_v9 = vld [vmem:[#allocation3 + $0x10] sm:$0xff]  ;;  %v1457_v22 = vpop.permute.xlu1 %1456 }
 0x272   : > { %v4186_v11 = vcombine.high %v1951_v9, %v1951_v9  ;;  %1970 = vst [vmem:[#allocation4 + $0x20] sm:$0xf] %v1951_v9  ;;  %v1463_v40 = vrot.slane %v1457_v22, 4  ;;  %2178 = vrot.lane.b32.xlu0 %v1958_v13, %s3411_s30  ;;  %2114 = vrot.lane.b32.xlu1 %v1985_v8, %s3410_s29  ;;  %v1987_v27 = vcombine.low %v1951_v9, %v1951_v9 }
 0x274   : > { %1971 = vst [vmem:[#allocation4 + $0x28] sm:$0xf] %v4186_v11  ;;  %v1471_v12 = vsel %vm1039_vm10, %v1462_v17, %v1463_v40 }
 0x275   : > { %v1472_v15 = vsel %vm1465_vm13, %v1471_v12, %v1457_v22 }
 0x276   : > { %1486 = vst [vmem:[#allocation3 + $0x18] sm:$0x33] %v1472_v15  ;;  %2302 = vrot.lane.b32.xlu0 %v1958_v13, %s3413_s8  ;;  %2238 = vrot.lane.b32.xlu1 %v1985_v8, %s3412_s7 }
 0x27a   : > { %2426 = vrot.lane.b32.xlu0 %v1958_v13, %s3415_s10  ;;  %2362 = vrot.lane.b32.xlu1 %v1985_v8, %s3414_s9 }
 0x27b   : > { %v1459_v16 = vpop.permute.xlu0 %1458 }
 0x27c   : > { %v1464_v18 = vrot.slane %v1459_v16, 4 }
 0x27d   : > { %v1952_v21 = vld [vmem:[#allocation3 + $0x18] sm:$0xff] }
 0x27e   : > { %v4198_v4 = vcombine.high %v1952_v21, %v1952_v21  ;;  %1972 = vst [vmem:[#allocation4 + $0x30] sm:$0xf] %v1952_v21  ;;  %v1473_v23 = vsel %vm1039_vm10, %v1463_v40, %v1464_v18  ;;  %1994 = vrot.lane.b32.xlu0 %v1986_v52, %s3409_s28  ;;  %2242 = vrot.lane.b32.xlu1 %v1986_v52, %s3412_s7 }
 0x27f   : > { %v1474_v24 = vsel %vm1465_vm13, %v1473_v23, %v1459_v16  ;;  %v1988_v26 = vcombine.low %v1952_v21, %v1952_v21  ;;  %vm4591_vm13 = vcmask 441344  }
 0x280   : > { %1973 = vst [vmem:[#allocation4 + $0x38] sm:$0xf] %v4198_v4  ;;  %1490 = vst.msk [vmem:[#allocation3 + $0x20] sm:$0x33] %vm1489_vm11, %v1474_v24 }
 0x281   : > { %vm4592_vm12 = vmmov %vm4591_vm13 }
 0x282   : > { %2118 = vrot.lane.b32.xlu0 %v1986_v52, %s3410_s29  ;;  %2366 = vrot.lane.b32.xlu1 %v1986_v52, %s3414_s9  ;;  %vm4594_vm11 = vmmov %vm4587_vm3 }
 0x286   : > { %2058 = vrot.lane.b32.xlu0 %v1959_v31, %s3408_s27  ;;  %2430 = vrot.lane.b32.xlu1 %v1959_v31, %s3415_s10 }
 0x287   : > { %v1953_v25 = vld [vmem:[#allocation3 + $0x20] sm:$0xf] }
 0x288   : > { %1974 = vst [vmem:[#allocation4 + $0x40] sm:$0xf] %v1953_v25  ;;  %v4234_v30 = vld [vmem:[#allocation3 + $0x20] sm:$0xff] }
 0x289   : > { %v1989_v34 = vcombine.low %v4234_v30, %v4234_v30  ;;  %v2051_v43 = vcombine.high %v4234_v30, %v4234_v30 }
 0x28a   : > { %2182 = vrot.lane.b32.xlu0 %v1959_v31, %s3411_s30  ;;  %2060 = vrot.lane.b32.xlu1 %v1951_v9, %s3408_s27 }
 0x28e   : > { %2306 = vrot.lane.b32.xlu0 %v1959_v31, %s3413_s8  ;;  %2064 = vrot.lane.b32.xlu1 %v1952_v21, %s3408_s27 }
 0x292   : > { %2184 = vrot.lane.b32.xlu1 %v1951_v9, %s3411_s30  ;;  %2000 = vrot.lane.b32.xlu0 %v1951_v9, %s3409_s28 }
 0x296   : > { %2308 = vrot.lane.b32.xlu1 %v1951_v9, %s3413_s8  ;;  %2124 = vrot.lane.b32.xlu0 %v1951_v9, %s3410_s29 }
 0x29a   : > { %2248 = vrot.lane.b32.xlu1 %v1951_v9, %s3412_s7  ;;  %2188 = vrot.lane.b32.xlu0 %v1952_v21, %s3411_s30 }
 0x29e   : > { %2372 = vrot.lane.b32.xlu1 %v1951_v9, %s3414_s9  ;;  %2312 = vrot.lane.b32.xlu0 %v1952_v21, %s3413_s8 }
 0x2a2   : > { %2004 = vrot.lane.b32.xlu1 %v1952_v21, %s3409_s28  ;;  %2432 = vrot.lane.b32.xlu0 %v1951_v9, %s3415_s10 }
 0x2a6   : > { %2128 = vrot.lane.b32.xlu1 %v1952_v21, %s3410_s29  ;;  %2436 = vrot.lane.b32.xlu0 %v1952_v21, %s3415_s10 }
 0x2aa   : > { %2252 = vrot.lane.b32.xlu1 %v1952_v21, %s3412_s7  ;;  %2062 = vrot.lane.b32.xlu0 %v4186_v11, %s3408_s27 }
 0x2ae   : > { %2376 = vrot.lane.b32.xlu1 %v1952_v21, %s3414_s9  ;;  %2250 = vrot.lane.b32.xlu0 %v1988_v26, %s3412_s7  ;;  %v2517_v21 = vld [vmem:[%s4565_s5] sm:$0x3] }
 0x2af   : > { %v2053_v42 = vpop.permute.xlu0 %2052  ;;  %v4251_v35 = vpop.permute.xlu1 %1992 }
 0x2b2   : > { %2374 = vrot.lane.b32.xlu0 %v1988_v26, %s3414_s9  ;;  %1998 = vrot.lane.b32.xlu1 %v1987_v27, %s3409_s28 }
 0x2b3   : > { %v4232_v29 = vpop.permute.xlu0 %2240  ;;  %v4258_v0 = vpop.permute.xlu1 %2116 }
 0x2b6   : > { %2122 = vrot.lane.b32.xlu1 %v1987_v27, %s3410_s29  ;;  %2068 = vrot.lane.b32.xlu0 %v4234_v30, %s3408_s27 }
 0x2b7   : > { %v4239_v32 = vpop.permute.xlu0 %2364 }
 0x2ba   : > { %2002 = vrot.lane.b32.xlu1 %v1988_v26, %s3409_s28  ;;  %2192 = vrot.lane.b32.xlu0 %v4234_v30, %s3411_s30 }
 0x2bb   : > { %v2177_v33 = vpop.permute.xlu0 %2176 }
 0x2be   : > { %2126 = vrot.lane.b32.xlu1 %v1988_v26, %s3410_s29  ;;  %2316 = vrot.lane.b32.xlu0 %v4234_v30, %s3413_s8 }
 0x2bf   : > { %v2301_v36 = vpop.permute.xlu0 %2300 }
 0x2c2   : > { %2246 = vrot.lane.b32.xlu1 %v1987_v27, %s3412_s7  ;;  %2006 = vrot.lane.b32.xlu0 %v1989_v34, %s3409_s28 }
 0x2c3   : > { %v2425_v39 = vpop.permute.xlu0 %2424 }
 0x2c6   : > { %2370 = vrot.lane.b32.xlu1 %v1987_v27, %s3414_s9  ;;  %2130 = vrot.lane.b32.xlu0 %v1989_v34, %s3410_s29 }
 0x2ca   : > { %2186 = vrot.lane.b32.xlu1 %v4186_v11, %s3411_s30  ;;  %2254 = vrot.lane.b32.xlu0 %v1989_v34, %s3412_s7 }
 0x2ce   : > { %2310 = vrot.lane.b32.xlu1 %v4186_v11, %s3413_s8  ;;  %2378 = vrot.lane.b32.xlu0 %v1989_v34, %s3414_s9 }
 0x2d0   : > { %v4265_v44 = vpop.permute.xlu1 %2180  ;;  %v4267_v45 = vpop.permute.xlu0 %2056 }
 0x2d2   : > { %2066 = vrot.lane.b32.xlu1 %v4198_v4, %s3408_s27  ;;  %2070 = vrot.lane.b32.xlu0 %v2051_v43, %s3408_s27 }
 0x2d4   : > { %v4272_v46 = vpop.permute.xlu1 %2304  ;;  %v4274_v47 = vpop.permute.xlu0 %1996 }
 0x2d6   : > { %2190 = vrot.lane.b32.xlu1 %v4198_v4, %s3411_s30  ;;  %2194 = vrot.lane.b32.xlu0 %v2051_v43, %s3411_s30 }
 0x2d8   : > { %v4279_v48 = vpop.permute.xlu1 %2428  ;;  %v4281_v50 = vpop.permute.xlu0 %2120 }
 0x2da   : > { %2314 = vrot.lane.b32.xlu1 %v4198_v4, %s3413_s8  ;;  %2318 = vrot.lane.b32.xlu0 %v2051_v43, %s3413_s8 }
 0x2dc   : > { %v2055_v54 = vpop.permute.xlu1 %2054  ;;  %v4286_v56 = vpop.permute.xlu0 %2244 }
 0x2dd   : > { %v2072_v57 = vsel %vm4581_vm0, %v2053_v42, %v2055_v54  ;;  %v2073_v3 = vsel %vm4582_vm1, %v2055_v54, %v4267_v45  ;;  %vm4595_vm0 = vmmov %vm4583_vm2 }
 0x2de   : > { %2090 = vst [vmem:[#allocation4 + $0x48] sm:$0xf] %v2072_v57  ;;  %2091 = vst [vmem:[#allocation4 + $0x50] sm:$0xf] %v2073_v3  ;;  %2434 = vrot.lane.b32.xlu1 %v4186_v11, %s3415_s10  ;;  %2438 = vrot.lane.b32.xlu0 %v4198_v4, %s3415_s10 }
 0x2df   : > { %vm4596_vm1 = vmmov %vm4595_vm0 }
 0x2e0   : > { %v1991_v58 = vpop.permute.xlu1 %1990  ;;  %v4295_v51 = vpop.permute.xlu0 %2368 }
 0x2e1   : > { %v2010_v60 = vsel %vm4583_vm2, %v1991_v58, %v4251_v35  ;;  %vm4597_vm2 = vmmov %vm4590_vm9 }
 0x2e2   : > { %2028 = vst [vmem:[#allocation4] sm:$0xf0] %v2010_v60  ;;  %2008 = vrot.lane.b32.xlu1 %v4234_v30, %s3409_s28  ;;  %2442 = vrot.lane.b32.xlu0 %v2051_v43, %s3415_s10 }
 0x2e4   : > { %v2115_v13 = vpop.permute.xlu1 %2114  ;;  %v2179_v62 = vpop.permute.xlu0 %2178 }
 0x2e5   : > { %v2134_v61 = vsel %vm4584_vm7, %v2115_v13, %v4258_v0  ;;  %v2196_v63 = vsel %vm4585_vm8, %v2177_v33, %v2179_v62  ;;  %v2197_v1 = vsel %vm4586_vm5, %v2179_v62, %v4265_v44  ;;  %vm4598_vm7 = vmmov %vm4597_vm2  ;;  %vm4599_vm8 = vcmask 752640  }
 0x2e6   : > { %2152 = vst [vmem:[#allocation4 + $0x48] sm:$0xf0] %v2134_v61  ;;  %2214 = vst [vmem:[#allocation4 + $0x90] sm:$0xf] %v2196_v63  ;;  %2132 = vrot.lane.b32.xlu1 %v4234_v30, %s3410_s29 }
 0x2e7   : > { %2215 = vst [vmem:[#allocation4 + $0x98] sm:$0xf] %v2197_v1  ;;  %vm4600_vm5 = vmmov %vm4599_vm8 }
 0x2e8   : > { %v2239_v2 = vpop.permute.xlu1 %2238  ;;  %v2303_v31 = vpop.permute.xlu0 %2302 }
 0x2e9   : > { %v2258_v5 = vsel %vm4587_vm3, %v2239_v2, %v4232_v29  ;;  %v2320_v17 = vsel %vm4588_vm4, %v2301_v36, %v2303_v31  ;;  %v2321_v49 = vsel %vm4589_vm6, %v2303_v31, %v4272_v46  ;;  %vm4601_vm3 = vmmov %vm4592_vm12  ;;  %vm4602_vm4 = vcmask 1031168  }
 0x2ea   : > { %2276 = vst [vmem:[#allocation4 + $0x90] sm:$0xf0] %v2258_v5  ;;  %2338 = vst [vmem:[#allocation4 + $0xd8] sm:$0xf] %v2320_v17  ;;  %2256 = vrot.lane.b32.xlu1 %v4234_v30, %s3412_s7  ;;  %s3308_s7 = smul.u32 18, %s4660_s22 }
 0x2eb   : > { %2339 = vst [vmem:[#allocation4 + $0xe0] sm:$0xf] %v2321_v49  ;;  %vm4603_vm6 = vmmov %vm4602_vm4 }
 0x2ec   : > { %v2363_v7 = vpop.permute.xlu1 %2362  ;;  %v2427_v8 = vpop.permute.xlu0 %2426  ;;  %s271_s22 = scalar_lea.vmem %s4566_s6, %s3308_s7 }
 0x2ed   : > { %v2382_v9 = vsel %vm4590_vm9, %v2363_v7, %v4239_v32  ;;  %v2444_v22 = vsel %vm4591_vm13, %v2425_v39, %v2427_v8  ;;  %v2445_v11 = vsel %vm4592_vm12, %v2427_v8, %v4279_v48  ;;  %vm4604_vm9 = vcmask 744448  }
 0x2ee   : > { %2400 = vst [vmem:[#allocation4 + $0xd8] sm:$0xf0] %v2382_v9  ;;  %2462 = vst [vmem:[#allocation4 + $0x120] sm:$0xf] %v2444_v22  ;;  %2380 = vrot.lane.b32.xlu1 %v4234_v30, %s3414_s9  ;;  %vm4605_vm13 = vcmask 457728  }
 0x2ef   : > { %2463 = vst [vmem:[#allocation4 + $0x128] sm:$0xf] %v2445_v11  ;;  %vm4606_vm12 = vmmov %vm4604_vm9 }
 0x2f0   : > { %v2243_v40 = vpop.permute.xlu1 %2242  ;;  %v1995_v12 = vpop.permute.xlu0 %1994 }
 0x2f1   : > { %v2259_v15 = vsel %vm4593_vm15, %v4232_v29, %v2243_v40  ;;  %v2260_v16 = vsel %vm4594_vm11, %v2243_v40, %v4286_v56  ;;  %v2011_v52 = vsel %vm4595_vm0, %v4251_v35, %v1995_v12  ;;  %v2012_v18 = vsel %vm4596_vm1, %v1995_v12, %v4274_v47  ;;  %v2481_v35 = vld [vmem:[#allocation4 + $0x48] sm:$0xff]  ;;  %vm4607_vm15 = vmmov %vm4605_vm13 }
 0x2f2   : > { %2277 = vst [vmem:[#allocation4 + $0x98] sm:$0xf0] %v2259_v15  ;;  %2278 = vst [vmem:[#allocation4 + $0xa0] sm:$0xf0] %v2260_v16  ;;  %2440 = vrot.lane.b32.xlu1 %v4234_v30, %s3415_s10  ;;  %vm4608_vm11 = vcmask 293888  }
 0x2f3   : > { %2029 = vst [vmem:[#allocation4 + $0x8] sm:$0xf0] %v2011_v52  ;;  %2030 = vst [vmem:[#allocation4 + $0x10] sm:$0xf0] %v2012_v18 }
 0x2f4   : > { %v2367_v4 = vpop.permute.xlu1 %2366  ;;  %v2119_v23 = vpop.permute.xlu0 %2118  ;;  %vm4609_vm0 = vmmov %vm4601_vm3 }
 0x2f5   : > { %v2383_v24 = vsel %vm4597_vm2, %v4239_v32, %v2367_v4  ;;  %v2384_v25 = vsel %vm4598_vm7, %v2367_v4, %v4295_v51  ;;  %v2135_v26 = vsel %vm4599_vm8, %v4258_v0, %v2119_v23  ;;  %v2136_v42 = vsel %vm4600_vm5, %v2119_v23, %v4281_v50  ;;  %v2499_v62 = vld [vmem:[#allocation4 + $0xd8] sm:$0xff]  ;;  %v2508_v7 = vld [vmem:[#allocation4 + $0x120] sm:$0xf]  ;;  %vm4610_vm1 = vmmov %vm4602_vm4 }
 0x2f6   : > { %2401 = vst [vmem:[#allocation4 + $0xe0] sm:$0xf0] %v2383_v24  ;;  %2402 = vst [vmem:[#allocation4 + $0xe8] sm:$0xf0] %v2384_v25  ;;  %2520 = vperm.xlu1 %3379, %v2517_v21   ;;  %v2509_v5 = vld [vmem:[#allocation4 + $0x128] sm:$0xf] }
 0x2f7   : > { %2153 = vst [vmem:[#allocation4 + $0x50] sm:$0xf0] %v2135_v26  ;;  %2154 = vst [vmem:[#allocation4 + $0x58] sm:$0xf0] %v2136_v42  ;;  %vm4612_vm7 = vcmask 736256   ;;  %vm4614_vm5 = vcmask 1039360  }
 0x2f8   : > { %v2431_v27 = vpop.permute.xlu1 %2430  ;;  %v2059_v29 = vpop.permute.xlu0 %2058  ;;  %vm4611_vm2 = vmmov %vm4610_vm1 }
 0x2f9   : > { %v2446_v30 = vsel %vm4601_vm3, %v4279_v48, %v2431_v27  ;;  %v2074_v32 = vsel %vm4602_vm4, %v4267_v45, %v2059_v29  ;;  %v2472_v48 = vld [vmem:[#allocation4] sm:$0xff]  ;;  %v2491_v58 = vld [vmem:[#allocation4 + $0x98] sm:$0xff]  ;;  %vm4613_vm8 = vmmov %vm4612_vm7  ;;  %vm4616_vm4 = vcmask 449536  }
 0x2fa   : > { %2464 = vst [vmem:[#allocation4 + $0x130] sm:$0xf] %v2446_v30  ;;  %2092 = vst [vmem:[#allocation4 + $0x58] sm:$0xf] %v2074_v32  ;;  %v2473_v39 = vld [vmem:[#allocation4 + $0x8] sm:$0xff]  ;;  %v3270_v3 = vpack.c.bf16 %v2481_v35, %v2472_v48 }
 0x2fb   : > { %vm4615_vm3 = vmmov %vm4614_vm5 }
 0x2fc   : > { %v2061_v33 = vpop.permute.xlu1 %2060  ;;  %v2183_v34 = vpop.permute.xlu0 %2182 }
 0x2fd   : > { %v2075_v36 = vsel %vm4603_vm6, %v2059_v29, %v2061_v33  ;;  %v2198_v0 = vsel %vm4604_vm9, %v4265_v44, %v2183_v34  ;;  %v2500_v54 = vld [vmem:[#allocation4 + $0xe0] sm:$0xff]  ;;  %v2490_v44 = vld [vmem:[#allocation4 + $0x90] sm:$0xff]  ;;  %vm4617_vm6 = vmmov %vm4616_vm4  ;;  %vm4618_vm9 = vcmask 752640  }
 0x2fe   : > { %v2482_v43 = vld [vmem:[#allocation4 + $0x50] sm:$0xff]  ;;  %2093 = vst [vmem:[#allocation4 + $0x60] sm:$0xf] %v2075_v36  ;;  %2216 = vst [vmem:[#allocation4 + $0xa0] sm:$0xf] %v2198_v0  ;;  %v3272_v13 = vpack.c.bf16 %v2500_v54, %v2491_v58  ;;  %v3274_v63 = vpack.c.bf16 %v2499_v62, %v2490_v44 }
 0x2ff   : > { %v3268_v57 = vpack.c.bf16 %v2482_v43, %v2473_v39 }
 0x300   : > { %v4351_v45 = vpop.permute.xlu1 %2064  ;;  %v2307_v60 = vpop.permute.xlu0 %2306 }
 0x301   : > { %3269 = vmatprep.subr.bf16.mxu1 %v3268_v57  ;;  %v2322_v61 = vsel %vm4605_vm13, %v4272_v46, %v2307_v60  ;;  %v4363_v46 = vld [vmem:[%s4564_s4] sm:$0x3]  ;;  %vm4619_vm13 = vmmov %vm4618_vm9 }
 0x302   : > { %3271 = vmatpush1.bf16.msra.mxu1 %v3270_v3  ;;  %2340 = vst [vmem:[#allocation4 + $0xe8] sm:$0xf] %v2322_v61 }
 0x303   : > { %3273 = vmatprep.subr.bf16.mxu1 %v3272_v13 }
 0x304   : > { %v4355_v1 = vpop.permute.xlu1 %2184  ;;  %v2001_v2 = vpop.permute.xlu0 %2000 }
 0x305   : > { %v2199_v31 = vsel %vm4606_vm12, %v2183_v34, %v4355_v1  ;;  %vm4620_vm12 = vmmov %vm4615_vm3 }
 0x306   : > { %3275 = vmatpush1.bf16.msra.mxu1 %v3274_v63  ;;  %2217 = vst [vmem:[#allocation4 + $0xa8] sm:$0xf] %v2199_v31  ;;  %v2474_v63 = vld [vmem:[#allocation4 + $0x10] sm:$0xff] }
 0x307   : > { %3175 = vmatprep.subr.msk.mxu1 %vm1039_vm10, %v2509_v5 }
 0x308   : > { %v4365_v17 = vpop.permute.xlu1 %2308  ;;  %v2125_v49 = vpop.permute.xlu0 %2124 }
 0x309   : > { %v2323_v8 = vsel %vm4607_vm15, %v2307_v60, %v4365_v17  ;;  %vm4621_vm15 = vmmov %vm4615_vm3  ;;  %v2483_v60 = vld [vmem:[#allocation4 + $0x58] sm:$0xff] }
 0x30a   : > { %3176 = vmatpush1.msk.msra.mxu1 %vm1039_vm10, %v2508_v7  ;;  %2341 = vst [vmem:[#allocation4 + $0xf0] sm:$0xf] %v2323_v8 }
 0x30b   : > { %3177 = vmatmul.mubr.msk.f32.vlgmr.msra.gmra.mrb[4].mxu1 %vm4608_vm11, %v4363_v46  ;;  %vm4622_vm11 = vmmov %vm4618_vm9 }
 0x30c   : > { %2759 = vmatprep.mubr.f32.mxu1 %v3962_v41  ;;  %v2249_v9 = vpop.permute.xlu1 %2248  ;;  %v4373_v22 = vpop.permute.xlu0 %2188 }
 0x310   : > { %v4375_v11 = vpop.permute.xlu1 %2372  ;;  %v4377_v40 = vpop.permute.xlu0 %2312 }
 0x314   : > { %v2005_v12 = vpop.permute.xlu1 %2004  ;;  %v4379_v15 = vpop.permute.xlu0 %2432 }
 0x315   : > { %v2447_v16 = vsel %vm4609_vm0, %v2431_v27, %v4379_v15  ;;  %vm4623_vm0 = vmmov %vm4618_vm9 }
 0x316   : > { %2465 = vst [vmem:[#allocation4 + $0x138] sm:$0xf] %v2447_v16 }
 0x318   : > { %v4383_v52 = vpop.permute.xlu1 %2128  ;;  %v4385_v18 = vpop.permute.xlu0 %2436 }
 0x31c   : > { %v4387_v21 = vpop.permute.xlu1 %2252  ;;  %v2063_v4 = vpop.permute.xlu0 %2062 }
 0x31d   : > { %v2076_v23 = vsel %vm4610_vm1, %v2061_v33, %v2063_v4  ;;  %v2077_v24 = vsel %vm4611_vm2, %v2063_v4, %v4351_v45  ;;  %vm4624_vm1 = vmmov %vm4612_vm7 }
 0x31e   : > { %2094 = vst [vmem:[#allocation4 + $0x68] sm:$0xf] %v2076_v23  ;;  %2095 = vst [vmem:[#allocation4 + $0x70] sm:$0xf] %v2077_v24 }
 0x31f   : > { %vm4625_vm2 = vmmov %vm4624_vm1 }
 0x320   : > { %v4392_v25 = vpop.permute.xlu1 %2376  ;;  %v2251_v26 = vpop.permute.xlu0 %2250 }
 0x321   : > { %v2263_v42 = vsel %vm4612_vm7, %v2249_v9, %v2251_v26  ;;  %v2264_v27 = vsel %vm4613_vm8, %v2251_v26, %v4387_v21  ;;  %vm4626_vm7 = vmmov %vm4615_vm3 }
 0x322   : > { %2281 = vst [vmem:[#allocation4 + $0xb8] sm:$0xf0] %v2263_v42  ;;  %2282 = vst [vmem:[#allocation4 + $0xc0] sm:$0xf0] %v2264_v27 }
 0x323   : > { %vm4627_vm8 = vmmov %vm4616_vm4 }
 0x324   : > { %v1999_v29 = vpop.permute.xlu1 %1998  ;;  %v2375_v30 = vpop.permute.xlu0 %2374 }
 0x325   : > { %v2013_v32 = vsel %vm4614_vm5, %v4274_v47, %v1999_v29  ;;  %v2014_v33 = vsel %vm4615_vm3, %v1999_v29, %v2001_v2  ;;  %v2387_v34 = vsel %vm4616_vm4, %v4375_v11, %v2375_v30  ;;  %v2388_v35 = vsel %vm4617_vm6, %v2375_v30, %v4392_v25  ;;  %vm4628_vm5 = vmmov %vm4616_vm4 }
 0x326   : > { %2031 = vst [vmem:[#allocation4 + $0x18] sm:$0xf0] %v2013_v32  ;;  %2032 = vst [vmem:[#allocation4 + $0x20] sm:$0xf0] %v2014_v33  ;;  %vm4630_vm4 = vcmask 744448  }
 0x327   : > { %2405 = vst [vmem:[#allocation4 + $0x100] sm:$0xf0] %v2387_v34  ;;  %2406 = vst [vmem:[#allocation4 + $0x108] sm:$0xf0] %v2388_v35  ;;  %v2501_v35 = vld [vmem:[#allocation4 + $0xe8] sm:$0xff] }
 0x328   : > { %v2123_v36 = vpop.permute.xlu1 %2122  ;;  %v4404_v0 = vpop.permute.xlu0 %2068  ;;  %vm4629_vm3 = vmmov %vm4623_vm0 }
 0x329   : > { %v2137_v39 = vsel %vm4618_vm9, %v4281_v50, %v2123_v36  ;;  %v2138_v47 = vsel %vm4619_vm13, %v2123_v36, %v2125_v49  ;;  %vm4631_vm6 = vmmov %vm4630_vm4  ;;  %vm4633_vm13 = vcmask 457728  }
 0x32a   : > { %2155 = vst [vmem:[#allocation4 + $0x60] sm:$0xf0] %v2137_v39  ;;  %2156 = vst [vmem:[#allocation4 + $0x68] sm:$0xf0] %v2138_v47 }
 0x32b   : > { %vm4632_vm9 = vmmov %vm4624_vm1 }
 0x32c   : > { %v2003_v43 = vpop.permute.xlu1 %2002  ;;  %v4409_v54 = vpop.permute.xlu0 %2192 }
 0x32d   : > { %v2015_v57 = vsel %vm4620_vm12, %v2001_v2, %v2003_v43  ;;  %v2016_v48 = vsel %vm4621_vm15, %v2003_v43, %v2005_v12  ;;  %v2475_v62 = vld [vmem:[#allocation4 + $0x18] sm:$0xff]  ;;  %v3278_v2 = vpack.c.bf16 %v2483_v60, %v2474_v63  ;;  %v2476_v27 = vld [vmem:[#allocation4 + $0x20] sm:$0xff]  ;;  %vm4634_vm12 = vmmov %vm4633_vm13 }
 0x32e   : > { %2033 = vst [vmem:[#allocation4 + $0x28] sm:$0xf0] %v2015_v57  ;;  %2034 = vst [vmem:[#allocation4 + $0x30] sm:$0xf0] %v2016_v48  ;;  %v2492_v57 = vld [vmem:[#allocation4 + $0xa0] sm:$0xff] }
 0x32f   : > { %vm4635_vm15 = vmmov %vm4628_vm5  ;;  %v3282_v48 = vpack.c.bf16 %v2501_v35, %v2492_v57 }
 0x330   : > { %v2127_v3 = vpop.permute.xlu1 %2126  ;;  %v4413_v58 = vpop.permute.xlu0 %2316 }
 0x331   : > { %v2139_v13 = vsel %vm4622_vm11, %v2125_v49, %v2127_v3  ;;  %v2140_v50 = vsel %vm4623_vm0, %v2127_v3, %v4383_v52  ;;  %v2484_v61 = vld [vmem:[#allocation4 + $0x60] sm:$0xff]  ;;  %v2485_v23 = vld [vmem:[#allocation4 + $0x68] sm:$0xff]  ;;  %vm4636_vm11 = vcmask 1031168  }
 0x332   : > { %2157 = vst [vmem:[#allocation4 + $0x70] sm:$0xf0] %v2139_v13  ;;  %2158 = vst [vmem:[#allocation4 + $0x78] sm:$0xf0] %v2140_v50  ;;  %v3276_v44 = vpack.c.bf16 %v2484_v61, %v2475_v62  ;;  %v3286_v29 = vpack.c.bf16 %v2485_v23, %v2476_v27  ;;  %v2511_v50 = vld [vmem:[#allocation4 + $0x138] sm:$0xf] }
 0x333   : > { %vm4637_vm0 = vmmov %vm4636_vm11 }
 0x334   : > { %v2247_v31 = vpop.permute.xlu1 %2246  ;;  %3277 = vmatprep.subr.bf16.mxu0 %v3276_v44  ;;  %v4418_v5 = vpop.permute.xlu0 %2006  ;;  %v2510_v44 = vld [vmem:[#allocation4 + $0x130] sm:$0xf] }
 0x335   : > { %v2261_v7 = vsel %vm4624_vm1, %v4286_v56, %v2247_v31  ;;  %v2262_v8 = vsel %vm4625_vm2, %v2247_v31, %v2249_v9  ;;  %v2017_v49 = vsel %vm4626_vm7, %v2005_v12, %v4418_v5  ;;  %3279 = vmatpush1.bf16.msra.mxu0 %v3278_v2  ;;  %v2477_v9 = vld [vmem:[#allocation4 + $0x28] sm:$0xff]  ;;  %vm4638_vm1 = vmmov %vm4637_vm0 }
 0x336   : > { %2279 = vst [vmem:[#allocation4 + $0xa8] sm:$0xf0] %v2261_v7  ;;  %2280 = vst [vmem:[#allocation4 + $0xb0] sm:$0xf0] %v2262_v8 }
 0x337   : > { %2035 = vst [vmem:[#allocation4 + $0x38] sm:$0xf0] %v2017_v49  ;;  %vm4639_vm2 = vmmov %vm4630_vm4 }
 0x338   : > { %v2371_v16 = vpop.permute.xlu1 %2370  ;;  %v4425_v4 = vpop.permute.xlu0 %2130  ;;  %vm4640_vm7 = vmmov %vm4639_vm2 }
 0x339   : > { %v2385_v24 = vsel %vm4627_vm8, %v4295_v51, %v2371_v16  ;;  %v2386_v26 = vsel %vm4628_vm5, %v2371_v16, %v4375_v11  ;;  %v2141_v56 = vsel %vm4629_vm3, %v4383_v52, %v4425_v4  ;;  %v2486_v12 = vld [vmem:[#allocation4 + $0x70] sm:$0xff]  ;;  %vm4641_vm8 = vmmov %vm4639_vm2  ;;  %vm4642_vm5 = vcmask 293888  }
 0x33a   : > { %2403 = vst [vmem:[#allocation4 + $0xf0] sm:$0xf0] %v2385_v24  ;;  %2404 = vst [vmem:[#allocation4 + $0xf8] sm:$0xf0] %v2386_v26  ;;  %v3284_v42 = vpack.c.bf16 %v2486_v12, %v2477_v9  ;;  %v2478_v24 = vld [vmem:[#allocation4 + $0x30] sm:$0xff] }
 0x33b   : > { %2159 = vst [vmem:[#allocation4 + $0x80] sm:$0xf0] %v2141_v56  ;;  %vm4643_vm3 = vmmov %vm4634_vm12 }
 0x33c   : > { %v2187_v30 = vpop.permute.xlu1 %2186  ;;  %3285 = vmatprep.subr.bf16.mxu1 %v3284_v42  ;;  %v4434_v32 = vpop.permute.xlu0 %2254 }
 0x33d   : > { %v2200_v51 = vsel %vm4630_vm4, %v4355_v1, %v2187_v30  ;;  %v2201_v11 = vsel %vm4631_vm6, %v2187_v30, %v4373_v22  ;;  %v2265_v52 = vsel %vm4632_vm9, %v4387_v21, %v4434_v32  ;;  %3287 = vmatpush1.bf16.msra.mxu1 %v3286_v29  ;;  %v2493_v47 = vld [vmem:[#allocation4 + $0xa8] sm:$0xff]  ;;  %vm4644_vm4 = vmmov %vm4643_vm3  ;;  %vm4646_vm9 = vcmask 441344  }
 0x33e   : > { %2218 = vst [vmem:[#allocation4 + $0xb0] sm:$0xf] %v2200_v51  ;;  %2219 = vst [vmem:[#allocation4 + $0xb8] sm:$0xf] %v2201_v11  ;;  %v2479_v9 = vld [vmem:[#allocation4 + $0x38] sm:$0xff] }
 0x33f   : > { %2283 = vst [vmem:[#allocation4 + $0xc8] sm:$0xf0] %v2265_v52  ;;  %vm4645_vm6 = vmmov %vm4643_vm3 }
 0x340   : > { %v2311_v33 = vpop.permute.xlu1 %2310  ;;  %v4443_v34 = vpop.permute.xlu0 %2378 }
 0x341   : > { %v2324_v36 = vsel %vm4633_vm13, %v4365_v17, %v2311_v33  ;;  %v2325_v1 = vsel %vm4634_vm12, %v2311_v33, %v4377_v40  ;;  %v2389_v39 = vsel %vm4635_vm15, %v4392_v25, %v4443_v34  ;;  %v2502_v21 = vld [vmem:[#allocation4 + $0xf0] sm:$0xff]  ;;  %vm4647_vm13 = vmmov %vm4646_vm9  ;;  %vm4649_vm15 = vcmask 1039360  }
 0x342   : > { %2342 = vst [vmem:[#allocation4 + $0xf8] sm:$0xf] %v2324_v36  ;;  %2343 = vst [vmem:[#allocation4 + $0x100] sm:$0xf] %v2325_v1  ;;  %v3280_v43 = vpack.c.bf16 %v2502_v21, %v2493_v47 }
 0x343   : > { %2407 = vst [vmem:[#allocation4 + $0x110] sm:$0xf0] %v2389_v39  ;;  %vm4648_vm12 = vmmov %vm4646_vm9 }
 0x344   : > { %v2067_v3 = vpop.permute.xlu1 %2066  ;;  %3281 = vmatprep.subr.bf16.mxu0 %v3280_v43  ;;  %v2071_v60 = vpop.permute.xlu0 %2070 }
 0x345   : > { %v2078_v17 = vsel %vm4636_vm11, %v4351_v45, %v2067_v3  ;;  %v2079_v13 = vsel %vm4637_vm0, %v2067_v3, %v4404_v0  ;;  %v2080_v25 = vsel %vm4638_vm1, %v4404_v0, %v2071_v60  ;;  %3283 = vmatpush1.bf16.msra.mxu0 %v3282_v48  ;;  %v2495_v63 = vld [vmem:[#allocation4 + $0xb8] sm:$0xff]  ;;  %v2494_v7 = vld [vmem:[#allocation4 + $0xb0] sm:$0xff]  ;;  %vm4650_vm11 = vcmask 752640   ;;  %vm4651_vm0 = vmmov %vm4642_vm5 }
 0x346   : > { %2096 = vst [vmem:[#allocation4 + $0x78] sm:$0xf] %v2078_v17  ;;  %2097 = vst [vmem:[#allocation4 + $0x80] sm:$0xf] %v2079_v13  ;;  %3178 = vmatprep.subr.msk.mxu0 %vm1039_vm10, %v2511_v50  ;;  %vm4652_vm1 = vcmask 736256  }
 0x347   : > { %2098 = vst [vmem:[#allocation4 + $0x88] sm:$0xf] %v2080_v25 }
 0x348   : > { %v2191_v62 = vpop.permute.xlu1 %2190  ;;  %v2195_v61 = vpop.permute.xlu0 %2194 }
 0x349   : > { %v2202_v45 = vsel %vm4639_vm2, %v4373_v22, %v2191_v62  ;;  %v2203_v2 = vsel %vm4640_vm7, %v2191_v62, %v4409_v54  ;;  %v2204_v0 = vsel %vm4641_vm8, %v4409_v54, %v2195_v61  ;;  %3179 = vmatpush1.msk.msra.mxu0 %vm1039_vm10, %v2510_v44  ;;  %v2504_v31 = vld [vmem:[#allocation4 + $0x100] sm:$0xff]  ;;  %v2503_v8 = vld [vmem:[#allocation4 + $0xf8] sm:$0xff]  ;;  %vm4653_vm2 = vmmov 0   ;;  %vm4655_vm8 = vmmov %vm4646_vm9 }
 0x34a   : > { %2220 = vst [vmem:[#allocation4 + $0xc0] sm:$0xf] %v2202_v45  ;;  %2221 = vst [vmem:[#allocation4 + $0xc8] sm:$0xf] %v2203_v2  ;;  %v3288_v49 = vpack.c.bf16 %v2504_v31, %v2495_v63  ;;  %v3290_v16 = vpack.c.bf16 %v2503_v8, %v2494_v7  ;;  %3180 = vmatmul.mubr.msk.f32.vlgmr.msra.gmra.mrb[6].mxu0 %vm4642_vm5, %v4363_v46  ;;  %vm4654_vm7 = vcmask 449536  }
 0x34b   : > { %2222 = vst [vmem:[#allocation4 + $0xd0] sm:$0xf] %v2204_v0  ;;  %2830 = vmatprep.mubr.f32.mxu0 %v3962_v41  ;;  %vm4656_vm5 = vmmov %vm4655_vm8 }
 0x34c   : > { %v2315_v22 = vpop.permute.xlu1 %2314  ;;  %3289 = vmatprep.subr.bf16.mxu1 %v3288_v49  ;;  %v2319_v23 = vpop.permute.xlu0 %2318 }
 0x34d   : > { %v2326_v54 = vsel %vm4643_vm3, %v4377_v40, %v2315_v22  ;;  %v2327_v26 = vsel %vm4644_vm4, %v2315_v22, %v4413_v58  ;;  %v2328_v56 = vsel %vm4645_vm6, %v4413_v58, %v2319_v23  ;;  %3291 = vmatpush1.bf16.msra.mxu1 %v3290_v16  ;;  %v2488_v12 = vld [vmem:[#allocation4 + $0x80] sm:$0xff]  ;;  %v2487_v42 = vld [vmem:[#allocation4 + $0x78] sm:$0xff]  ;;  %vm4657_vm3 = vmmov %vm4651_vm0 }
 0x34e   : > { %2344 = vst [vmem:[#allocation4 + $0x108] sm:$0xf] %v2326_v54  ;;  %2345 = vst [vmem:[#allocation4 + $0x110] sm:$0xf] %v2327_v26  ;;  %v3292_v27 = vpack.c.bf16 %v2488_v12, %v2479_v9  ;;  %v3294_v29 = vpack.c.bf16 %v2487_v42, %v2478_v24 }
 0x34f   : > { %2346 = vst [vmem:[#allocation4 + $0x118] sm:$0xf] %v2328_v56  ;;  %vm4658_vm4 = vmmov %vm4651_vm0 }
 0x350   : > { %v2435_v30 = vpop.permute.xlu1 %2434  ;;  %3293 = vmatprep.subr.bf16.mxu0 %v3292_v27  ;;  %v2439_v51 = vpop.permute.xlu0 %2438 }
 0x351   : > { %v2448_v40 = vsel %vm4646_vm9, %v4379_v15, %v2435_v30  ;;  %v2449_v11 = vsel %vm4647_vm13, %v2435_v30, %v4385_v18  ;;  %v2450_v58 = vsel %vm4648_vm12, %v4385_v18, %v2439_v51  ;;  %3295 = vmatpush1.bf16.msra.mxu0 %v3294_v29  ;;  %v2497_v33 = vld [vmem:[#allocation4 + $0xc8] sm:$0xff]  ;;  %v2496_v1 = vld [vmem:[#allocation4 + $0xc0] sm:$0xff] }
 0x352   : > { %2466 = vst [vmem:[#allocation4 + $0x140] sm:$0xf] %v2448_v40  ;;  %2467 = vst [vmem:[#allocation4 + $0x148] sm:$0xf] %v2449_v11 }
 0x353   : > { %2468 = vst [vmem:[#allocation4 + $0x150] sm:$0xf] %v2450_v58 }
 0x354   : > { %v2009_v52 = vpop.permute.xlu1 %2008  ;;  %v2443_v25 = vpop.permute.xlu0 %2442 }
 0x355   : > { %v2018_v35 = vsel %vm4649_vm15, %v4418_v5, %v2009_v52  ;;  %v2506_v36 = vld [vmem:[#allocation4 + $0x110] sm:$0xff]  ;;  %v2505_v39 = vld [vmem:[#allocation4 + $0x108] sm:$0xff] }
 0x356   : > { %2036 = vst [vmem:[#allocation4 + $0x40] sm:$0xf0] %v2018_v35  ;;  %v3296_v15 = vpack.c.bf16 %v2506_v36, %v2497_v33  ;;  %v3298_v47 = vpack.c.bf16 %v2505_v39, %v2496_v1 }
 0x358   : > { %v2133_v21 = vpop.permute.xlu1 %2132  ;;  %3297 = vmatprep.subr.bf16.mxu0 %v3296_v15 }
 0x359   : > { %v2142_v18 = vsel %vm4650_vm11, %v4425_v4, %v2133_v21  ;;  %3299 = vmatpush1.bf16.msra.mxu0 %v3298_v47  ;;  %v2513_v43 = vld [vmem:[#allocation4 + $0x148] sm:$0xf]  ;;  %v2512_v57 = vld [vmem:[#allocation4 + $0x140] sm:$0xf] }
 0x35a   : > { %2160 = vst [vmem:[#allocation4 + $0x88] sm:$0xf0] %v2142_v18  ;;  %3181 = vmatprep.subr.msk.mxu1 %vm1039_vm10, %v2513_v43  ;;  %v2514_v45 = vld [vmem:[#allocation4 + $0x150] sm:$0xf] }
 0x35b   : > { %3182 = vmatpush1.msk.msra.mxu1 %vm1039_vm10, %v2512_v57 }
 0x35c   : > { %v2257_v5 = vpop.permute.xlu1 %2256  ;;  %3300 = vmatprep.subr.bf16.mxu1 %v3442_v6  ;;  %3183 = vmatmul.mubr.msk.f32.vlgmr.msra.gmra.mrb[6].mxu1 %vm4651_vm0, %v4363_v46 }
 0x35d   : > { %v2266_v48 = vsel %vm4652_vm1, %v4434_v32, %v2257_v5  ;;  %3227 = vmatprep.mubr.msk.f32.mxu1 %vm4653_vm2, %v3962_v41  ;;  %v2480_v60 = vld [vmem:[#allocation4 + $0x40] sm:$0xff] }
 0x35e   : > { %2284 = vst [vmem:[#allocation4 + $0xd0] sm:$0xf0] %v2266_v48 }
 0x360   : > { %v2381_v4 = vpop.permute.xlu1 %2380 }
 0x361   : > { %v2390_v3 = vsel %vm4654_vm7, %v4443_v34, %v2381_v4  ;;  %v2489_v17 = vld [vmem:[#allocation4 + $0x88] sm:$0xff] }
 0x362   : > { %2408 = vst [vmem:[#allocation4 + $0x118] sm:$0xf0] %v2390_v3  ;;  %v3301_v13 = vpack.c.bf16 %v2489_v17, %v2480_v60 }
 0x364   : > { %v2441_v50 = vpop.permute.xlu1 %2440  ;;  %3302 = vmatpush3.bf16.msra.mxu1 %v3301_v13 }
 0x365   : > { %v2451_v62 = vsel %vm4655_vm8, %v2439_v51, %v2441_v50  ;;  %v2452_v61 = vsel %vm4656_vm5, %v2441_v50, %v2443_v25  ;;  %3303 = vmatprep.subr.bf16.mxu1 %v3442_v6  ;;  %v2498_v32 = vld [vmem:[#allocation4 + $0xd0] sm:$0xff] }
 0x366   : > { %2469 = vst [vmem:[#allocation4 + $0x158] sm:$0xf] %v2451_v62  ;;  %2470 = vst [vmem:[#allocation4 + $0x160] sm:$0xf] %v2452_v61 }
 0x369   : > { %v2507_v44 = vld [vmem:[#allocation4 + $0x118] sm:$0xff] }
 0x36a   : > { %v3304_v63 = vpack.c.bf16 %v2507_v44, %v2498_v32 }
 0x36c   : > { %3305 = vmatpush3.bf16.msra.mxu1 %v3304_v63 }
 0x36d   : > { %v2515_v34 = vld [vmem:[#allocation4 + $0x158] sm:$0xf]  ;;  %3225 = vmatprep.subr.mxu1 %v3962_v41  ;;  %v2516_v2 = vld [vmem:[#allocation4 + $0x160] sm:$0xf] }
 0x36e   : > { %3184 = vmatprep.subr.msk.mxu0 %vm1039_vm10, %v2515_v34 }
 0x36f   : > { %3185 = vmatpush1.msk.msra.mxu0 %vm1039_vm10, %v2514_v45 }
 0x370   : > { %3186 = vmatmul.mubr.msk.f32.vlgmr.msra.gmra.mrb[8].mxu0 %vm4657_vm3, %v4363_v46  ;;  %3226 = vmatpush3.msk.msra.mxu1 %vm1039_vm10, %v2516_v2 }
 0x371   : > { %3228 = vmatmul.mubr.msk.f32.vlgmr.msra.gmra.mrb[8].mxu1 %vm4658_vm4, %v4363_v46 }
 0x375   : > { %v2521_v8 = vpop.permute.xlu1 %2520 }
 0x3de   : > { %v2619_v6 = vpop.f32.mrb[4].mxu1 }
 0x3df   : > { %v2621_v0 = vpop.f32.mrb[5].mxu1  ;;  %v2620_v41 = vadd.f32 %v2619_v6, %v2521_v8 }
 0x3e0   : > { %v2622_v49 = vadd.f32 %v2621_v0, %v2521_v8 }
 0x3e1   : > { %v2907_v22 = vmul.f32 %v4081_v10, %v2620_v41 }
 0x3e2   : > { %v2908_v23 = vmul.f32 %v4084_v37, %v2622_v49 }
 0x3e3   : > { %v2916_v26 = vsel %vm1487_vm14, %v2907_v22, 0.0 }
 0x3e4   : > { %v2917_v56 = vsel %vm1487_vm14, %v2908_v23, 0.0 }
 0x3e5   : > { %v2918_v12 = vadd.f32 %v2917_v56, %v2916_v26 }
 0x41d   : > { %v2690_v31 = vpop.f32.mrb[6].mxu0 }
 0x41e   : > { %v2692_v7 = vpop.f32.mrb[7].mxu0  ;;  %v2691_v24 = vadd.f32 %v2690_v31, %v2521_v8 }
 0x41f   : > { %v2693_v9 = vadd.f32 %v2692_v7, %v2521_v8 }
 0x420   : > { %v2909_v46 = vmul.f32 %v4112_v53, %v2691_v24 }
 0x421   : > { %v2910_v27 = vmul.f32 %v4119_v59, %v2693_v9 }
 0x422   : > { %v2919_v42 = vsel %vm1487_vm14, %v2909_v46, 0.0 }
 0x423   : > { %v2920_v30 = vadd.f32 %v2919_v42, %v2918_v12  ;;  %v2921_v51 = vsel %vm1487_vm14, %v2910_v27, 0.0 }
 0x425   : > { %v2922_v58 = vadd.f32 %v2921_v51, %v2920_v30 }
 0x42f   : > { %v2761_v16 = vpop.f32.mrb[6].mxu1 }
 0x430   : > { %v2763_v54 = vpop.f32.mrb[7].mxu1  ;;  %v2762_v29 = vadd.f32 %v2761_v16, %v2521_v8 }
 0x431   : > { %v2764_v11 = vadd.f32 %v2763_v54, %v2521_v8 }
 0x432   : > { %v2911_v40 = vmul.f32 %v4135_v19, %v2762_v29 }
 0x433   : > { %v2912_v33 = vmul.f32 %v4138_v20, %v2764_v11 }
 0x434   : > { %v2923_v52 = vsel %vm1487_vm14, %v2911_v40, 0.0 }
 0x435   : > { %v2924_v35 = vadd.f32 %v2923_v52, %v2922_v58  ;;  %v2925_v1 = vsel %vm1487_vm14, %v2912_v33, 0.0 }
 0x437   : > { %v2926_v5 = vadd.f32 %v2925_v1, %v2924_v35 }
 0x443   : > { %v2832_v36 = vpop.f32.mrb[8].mxu0 }
 0x444   : > { %v2833_v39 = vadd.f32 %v2832_v36, %v2521_v8  ;;  %v2834_v15 = vpop.f32.mrb[9].mxu0  ;;  %v2903_v47 = vpop.f32.mrb[8].mxu1 }
 0x445   : > { %v2835_v21 = vadd.f32 %v2834_v15, %v2521_v8  ;;  %v2904_v18 = vadd.f32 %v2903_v47, %v2521_v8  ;;  %v3229_v43 = vpop.f32.mrb[9].mxu1 }
 0x446   : > { %v2913_v57 = vmul.f32 %v4147_v14, %v2833_v39 }
 0x447   : > { %v2914_v48 = vmul.f32 %v4151_v38, %v2835_v21  ;;  %v2915_v3 = vmul.f32 %v4158_v28, %v2904_v18 }
 0x448   : > { %v2927_v4 = vsel %vm1487_vm14, %v2913_v57, 0.0 }
 0x449   : > { %v2928_v60 = vadd.f32 %v2927_v4, %v2926_v5  ;;  %v2929_v17 = vsel %vm1487_vm14, %v2914_v48, 0.0  ;;  %v2931_v25 = vsel %vm1487_vm14, %v2915_v3, 0.0 }
 0x44b   : > { %v2930_v13 = vadd.f32 %v2929_v17, %v2928_v60 }
 0x44d   : > { %v2932_v50 = vadd.f32 %v2931_v25, %v2930_v13 }
 0x44f   : > { %2933 = vadd.xlane.f32.xlu0 %v2932_v50 }
 0x4dc   : > { %v2934_v62 = vpop.xlane.xlu0 %2933 }
 0x4dd   : > { %v2935_v61 = vmul.f32 0.0009765625, %v2934_v62 }
 0x4df   : > { %v2936_v32 = vsub.f32 %v2620_v41, %v2935_v61  ;;  %v2937_v44 = vsub.f32 %v2622_v49, %v2935_v61  ;;  %v2938_v63 = vsub.f32 %v2691_v24, %v2935_v61  ;;  %v2939_v34 = vsub.f32 %v2693_v9, %v2935_v61 }
 0x4e0   : > { %v2940_v45 = vsub.f32 %v2762_v29, %v2935_v61  ;;  %v2941_v31 = vsub.f32 %v2764_v11, %v2935_v61  ;;  %v2942_v22 = vsub.f32 %v2833_v39, %v2935_v61  ;;  %v2943_v41 = vsub.f32 %v2835_v21, %v2935_v61 }
 0x4e1   : > { %v2945_v2 = vmul.f32 %v2936_v32, %v2936_v32  ;;  %v2946_v6 = vmul.f32 %v2937_v44, %v2937_v44  ;;  %v2947_v0 = vmul.f32 %v2938_v63, %v2938_v63  ;;  %v2948_v7 = vmul.f32 %v2939_v34, %v2939_v34 }
 0x4e2   : > { %v2949_v23 = vmul.f32 %v2940_v45, %v2940_v45  ;;  %v2950_v49 = vmul.f32 %v2941_v31, %v2941_v31  ;;  %v2944_v9 = vsub.f32 %v2904_v18, %v2935_v61  ;;  %v2951_v12 = vmul.f32 %v2942_v22, %v2942_v22 }
 0x4e3   : > { %v2954_v8 = vmul.f32 %v4081_v10, %v2945_v2  ;;  %v2955_v16 = vmul.f32 %v4084_v37, %v2946_v6  ;;  %v2956_v54 = vmul.f32 %v4112_v53, %v2947_v0  ;;  %v2957_v24 = vmul.f32 %v4119_v59, %v2948_v7 }
 0x4e4   : > { %v2958_v42 = vmul.f32 %v4135_v19, %v2949_v23  ;;  %v2952_v27 = vmul.f32 %v2943_v41, %v2943_v41  ;;  %v2959_v29 = vmul.f32 %v4138_v20, %v2950_v49  ;;  %v2953_v51 = vmul.f32 %v2944_v9, %v2944_v9 }
 0x4e5   : > { %v2963_v26 = vsel %vm1487_vm14, %v2954_v8, 0.0  ;;  %v2964_v56 = vsel %vm1487_vm14, %v2955_v16, 0.0  ;;  %v2966_v10 = vsel %vm1487_vm14, %v2956_v54, 0.0  ;;  %v2968_v53 = vsel %vm1487_vm14, %v2957_v24, 0.0 }
 0x4e6   : > { %v2965_v46 = vadd.f32 %v2964_v56, %v2963_v26  ;;  %v2960_v40 = vmul.f32 %v4147_v14, %v2951_v12  ;;  %v2970_v59 = vsel %vm1487_vm14, %v2958_v42, 0.0  ;;  %v2961_v58 = vmul.f32 %v4151_v38, %v2952_v27 }
 0x4e7   : > { %v2972_v52 = vsel %vm1487_vm14, %v2959_v29, 0.0  ;;  %v2962_v33 = vmul.f32 %v4158_v28, %v2953_v51  ;;  %v3450_v38 = vmov 1983009808   ;;  %v3036_v28 = vshrl.u32 %v272_v55, 7 }
 0x4e8   : > { %v2967_v37 = vadd.f32 %v2966_v10, %v2965_v46  ;;  %v2974_v35 = vsel %vm1487_vm14, %v2960_v40, 0.0  ;;  %v2976_v20 = vsel %vm1487_vm14, %v2961_v58, 0.0  ;;  %v3033_v18 = vunpack.c.l.s4 %v3450_v38 }
 0x4e9   : > { %v2978_v39 = vsel %vm1487_vm14, %v2962_v33, 0.0 }
 0x4ea   : > { %v2969_v30 = vadd.f32 %v2968_v53, %v2967_v37  ;;  %v3034_v57 = vunpack.c.0.s8 %v3033_v18 }
 0x4ec   : > { %v2971_v11 = vadd.f32 %v2970_v59, %v2969_v30  ;;  %v3037_v61 = vsub.s32 %v3034_v57, %v3036_v28 }
 0x4ee   : > { %v2973_v19 = vadd.f32 %v2972_v52, %v2971_v11 }
 0x4f0   : > { %v2975_v36 = vadd.f32 %v2974_v35, %v2973_v19 }
 0x4f2   : > { %v2977_v1 = vadd.f32 %v2976_v20, %v2975_v36 }
 0x4f4   : > { %v2979_v15 = vadd.f32 %v2978_v39, %v2977_v1 }
 0x4f6   : > { %2980 = vadd.xlane.f32.xlu1 %v2979_v15 }
 0x583   : > { %v2981_v14 = vpop.xlane.xlu1 %2980 }
 0x584   : > { %v2982_v47 = vmul.f32 0.0009765625, %v2981_v14 }
 0x586   : > { %v2983_v21 = vadd.f32 1e-05, %v2982_v47 }
 0x588   : > { %3397 = vrsqrt.f32 %v2983_v21 }
 0x592   : > { %v3398_v43 = vpop.eup %3397 }
 0x593   : > { %v2985_v5 = vmul.f32 %v3398_v43, %v2936_v32  ;;  %v2986_v48 = vmul.f32 %v3398_v43, %v2937_v44  ;;  %v2987_v4 = vmul.f32 %v3398_v43, %v2938_v63  ;;  %v2988_v3 = vmul.f32 %v3398_v43, %v2939_v34 }
 0x594   : > { %v2989_v60 = vmul.f32 %v3398_v43, %v2940_v45  ;;  %v2990_v17 = vmul.f32 %v3398_v43, %v2941_v31  ;;  %v2991_v13 = vmul.f32 %v3398_v43, %v2942_v22  ;;  %v2992_v25 = vmul.f32 %v3398_v43, %v2943_v41 }
 0x595   : > { %v2993_v50 = vmul.f32 %v3398_v43, %v2944_v9  ;;  %vm2994_vm10 = vcmp.ge.f32.partialorder %v2985_v5, 0.0  ;;  %vm2995_vm14 = vcmp.ge.f32.partialorder %v2986_v48, 0.0  ;;  %vm2996_vm6 = vcmp.ge.f32.partialorder %v2987_v4, 0.0 }
 0x596   : > { %vm2997_vm9 = vcmp.ge.f32.partialorder %v2988_v3, 0.0  ;;  %vm2998_vm13 = vcmp.ge.f32.partialorder %v2989_v60, 0.0  ;;  %vm2999_vm12 = vcmp.ge.f32.partialorder %v2990_v17, 0.0  ;;  %vm3000_vm15 = vcmp.ge.f32.partialorder %v2991_v13, 0.0 }
 0x597   : > { %vm3001_vm11 = vcmp.ge.f32.partialorder %v2992_v25, 0.0  ;;  %vm3002_vm0 = vcmp.ge.f32.partialorder %v2993_v50, 0.0  ;;  %v3003_v55 = vmul.f32 0.2, %v2985_v5  ;;  %v3004_v62 = vmul.f32 0.2, %v2986_v48 }
 0x598   : > { %v3005_v32 = vmul.f32 0.2, %v2987_v4  ;;  %v3006_v44 = vmul.f32 0.2, %v2988_v3  ;;  %v3007_v63 = vmul.f32 0.2, %v2989_v60 }
 0x599   : > { %v3008_v34 = vmul.f32 0.2, %v2990_v17  ;;  %v3009_v45 = vmul.f32 0.2, %v2991_v13  ;;  %v3010_v2 = vmul.f32 0.2, %v2992_v25  ;;  %v3012_v6 = vsel %vm2994_vm10, %v2985_v5, %v3003_v55 }
 0x59a   : > { %v3011_v0 = vmul.f32 0.2, %v2993_v50  ;;  %v3013_v31 = vsel %vm2995_vm14, %v2986_v48, %v3004_v62  ;;  %v3014_v7 = vsel %vm2996_vm6, %v2987_v4, %v3005_v32  ;;  %v3015_v8 = vsel %vm2997_vm9, %v2988_v3, %v3006_v44 }
 0x59b   : > { %v3016_v16 = vsel %vm2998_vm13, %v2989_v60, %v3007_v63  ;;  %v3017_v22 = vsel %vm2999_vm12, %v2990_v17, %v3008_v34  ;;  %v3018_v23 = vsel %vm3000_vm15, %v2991_v13, %v3009_v45  ;;  %v3019_v54 = vsel %vm3001_vm11, %v2992_v25, %v3010_v2 }
 0x59c   : > { %v3020_v26 = vsel %vm3002_vm0, %v2993_v50, %v3011_v0  ;;  %v3030_v41 = vcombine.low %v3012_v6, %v3013_v31  ;;  %v3031_v49 = vcombine.low %v3014_v7, %v3015_v8  ;;  %v3047_v24 = vcombine.low %v3016_v16, %v3017_v22 }
 0x59d   : > { %v3048_v56 = vcombine.low %v3018_v23, %v3019_v54  ;;  %3189 = vst.sshfl [vmem:[%s271_s22 + $0x10] sm:$0x3 pattern:$0x76325410] %v3020_v26 }
 0x59e   : > { %v3038_v46 = vrot.slane %v3030_v41, %v3037_v61  ;;  %v3045_v9 = vrot.slane %v3031_v49, %v3037_v61  ;;  %v3055_v12 = vrot.slane %v3047_v24, %v3037_v61 }
 0x59f   : > { %v3062_v42 = vrot.slane %v3048_v56, %v3037_v61 }
 0x5a0   : > { %v3046_v10 = vcombine.low %v3038_v46, %v3045_v9 }
 0x5a1   : > { %v3063_v37 = vcombine.low %v3055_v12, %v3062_v42 }
 0x5a2   : > { %3074 = vst [vmem:[%s271_s22] sm:$0xff] %v3046_v10 }
 0x5a3   : > { %3075 = vst [vmem:[%s271_s22 + $0x8] sm:$0xff] %v3063_v37 }
 0x5a4 PF: > { %s16_s21 = sadd.s32 1, %s3406_s21  }
 0x5a5   : > { %p13_p4 = scmp.ge.s32.totalorder %s16_s21, 4  }
 0x5a7   :  { %15 = sbr.rel (!%p13_p4) target bundleno = 1 (0x1), region = 77 }

</bundles_post_ra>
